<compile_context>
chip_gen: v5e
topology: v5e:2x2
jax: 0.10.0
libtpu: 0.0.40
codegen_flags: <defaults>
</compile_context>

<pallas_src>
import functools

import jax
import jax.numpy as jnp
from jax.experimental import pallas as pl
from jax.experimental.pallas import tpu as pltpu


_BN_EPS = 1e-5


# --------------------------------------------------------------------------
# Fused decoder kernel (one batch element per grid step)
# --------------------------------------------------------------------------

def _vggt_decoder_kernel(xp_ref, w1_ref, b1_ref, w2_ref, b2_ref, w3_ref, b3_ref,
                         wp_ref, bp_ref, wc_ref, bc_ref, wcol_ref, bcol_ref,
                         mask_ref, out_ref, *, H, W, out_width):
    """Whole VGGTDecoder forward for one image, entirely in VMEM.

    xp_ref : (1, Lin, Cin) bf16  -- zero 'same'-padded image flattened row-major
             with 2 extra trailing zero rows (Lin = (H+2)*(W+2)+2) so every
             tap's row-shifted slice stays in-bounds.
    w*_ref : tap-major (9*Cin, Cout) bf16 conv weights (BN scale folded in).
    b*_ref : (1, Cout) f32 conv bias + BN shift folded in.
    wp/wc/wcol, bp/bc/bcol : head Linear weights (In, Out) bf16 / biases f32.
    mask_ref : (HW2, 1) f32 -- 1.0 on valid output columns (x < W), else 0.
    out_ref  : (1, 1, out_width) f32 -- [points | sigmoid(conf) | sigmoid(col) | 0-pad].
    """
    Wp2 = W + 2
    HW2 = H * Wp2
    Lin = (H + 2) * Wp2 + 2
    n_top = Wp2 + 1
    n_bot = Lin - n_top - HW2
    inv_hw = 1.0 / float(H * W)

    def im2col(xpad):
        # (Lin, C) -> (HW2, 9*C): 9 static row-shifted slices concatenated
        # along lanes (tap-major) so the 3x3 conv is ONE K=9*C MXU matmul.
        slabs = []
        for ky in range(3):
            for kx in range(3):
                off = ky * Wp2 + kx
                slabs.append(xpad[off:off + HW2, :])
        return jnp.concatenate(slabs, axis=1)

    def repad(ext_masked):
        # Extended-rows activation (junk cols already zeroed) -> next layer's
        # padded-flat layout (zero halo), purely in VMEM.
        c = ext_masked.shape[1]
        top = jnp.zeros((n_top, c), ext_masked.dtype)
        bot = jnp.zeros((n_bot, c), ext_masked.dtype)
        return jnp.concatenate([top, ext_masked, bot], axis=0)

    mask = mask_ref[...]                                            # (HW2, 1) f32

    # ---- fused first layer: point(0:256) | conf(256:384) | color(384:640) ---
    a1 = im2col(xp_ref[0])                                          # (HW2, 9*Cin) bf16
    o1 = jnp.dot(a1, w1_ref[...], preferred_element_type=jnp.float32) + b1_ref[...]
    o1 = jnp.maximum(o1, 0.0)                                       # (HW2, 640) f32

    pooled1 = jnp.sum(o1 * mask, axis=0, keepdims=True) * inv_hw    # (1, 640)
    pooled_conf = pooled1[:, 256:384].astype(jnp.bfloat16)          # (1, 128)
    pooled_col = pooled1[:, 384:640].astype(jnp.bfloat16)           # (1, 256)

    # ---- point head conv2 ----------------------------------------------------
    h1 = (o1[:, :256] * mask).astype(jnp.bfloat16)                  # junk cols -> 0
    a2 = im2col(repad(h1))                                          # (HW2, 9*256) bf16
    o2 = jnp.maximum(
        jnp.dot(a2, w2_ref[...], preferred_element_type=jnp.float32) + b2_ref[...],
        0.0)                                                        # (HW2, 128) f32

    # ---- point head conv3 + fused global average pool ------------------------
    h2 = (o2 * mask).astype(jnp.bfloat16)
    a3 = im2col(repad(h2))                                          # (HW2, 9*128) bf16
    o3 = jnp.maximum(
        jnp.dot(a3, w3_ref[...], preferred_element_type=jnp.float32) + b3_ref[...],
        0.0)                                                        # (HW2, 64) f32
    pooled_p = (jnp.sum(o3 * mask, axis=0, keepdims=True) * inv_hw).astype(jnp.bfloat16)

    # ---- all three heads' Linear (+ Sigmoid) ---------------------------------
    pts = jnp.dot(pooled_p, wp_ref[...], preferred_element_type=jnp.float32) + bp_ref[...]
    cf = jnp.dot(pooled_conf, wc_ref[...], preferred_element_type=jnp.float32) + bc_ref[...]
    cl = jnp.dot(pooled_col, wcol_ref[...], preferred_element_type=jnp.float32) + bcol_ref[...]

    packed = jnp.concatenate([pts, jax.nn.sigmoid(cf), jax.nn.sigmoid(cl)], axis=1)
    pad = out_width - packed.shape[1]
    if pad:
        packed = jnp.concatenate([packed, jnp.zeros((1, pad), jnp.float32)], axis=1)
    out_ref[0] = packed                                             # (1, out_width)


def _resident_spec(shape):
    """BlockSpec for a grid-invariant operand (weights/biases/mask)."""
    ndim = len(shape)
    return pl.BlockSpec(shape, lambda b: (0,) * ndim)


# --------------------------------------------------------------------------
# Forward wrapper
# --------------------------------------------------------------------------

def vggt_decoder_forward(params, features_nchw, max_points):
    """features_nchw: (B, feature_dim, H, W) — matches the PyTorch signature."""
    B, Cin, H, W = features_nchw.shape
    Wp2 = W + 2
    HW2 = H * Wp2

    # bf16 BEFORE the NHWC transpose (halves that op's HBM traffic).
    x = jnp.transpose(features_nchw.astype(jnp.bfloat16), (0, 2, 3, 1))
    # zero 'same' pad, flatten row-major, +2 slack rows for the last taps.
    xp = jnp.pad(x, ((0, 0), (1, 1), (1, 1), (0, 0)))
    xp = xp.reshape(B, (H + 2) * Wp2, Cin)
    xp = jnp.pad(xp, ((0, 0), (0, 2), (0, 0)))
    Lin = xp.shape[1]

    # valid-column mask over extended rows (x = idx % (W+2) < W)
    mask = (jnp.arange(HW2) % Wp2 < W).astype(jnp.float32).reshape(HW2, 1)

    w1, b1 = params["conv1_fused"]
    w2, b2 = params["p_conv2"]
    w3, b3 = params["p_conv3"]
    wp, bp = params["p_lin"]
    wc, bc = params["c_lin"]
    wcol, bcol = params["col_lin"]

    P3 = max_points * 3
    out_width = ((7 * max_points + 127) // 128) * 128   # lane-dense (128-mult) slab

    operands = [
        xp,
        w1, b1.reshape(1, -1).astype(jnp.float32),
        w2, b2.reshape(1, -1).astype(jnp.float32),
        w3, b3.reshape(1, -1).astype(jnp.float32),
        wp, bp.reshape(1, -1).astype(jnp.float32),
        wc, bc.reshape(1, -1).astype(jnp.float32),
        wcol, bcol.reshape(1, -1).astype(jnp.float32),
        mask,
    ]
    in_specs = [pl.BlockSpec((1, Lin, Cin), lambda b: (b, 0, 0))]
    in_specs += [_resident_spec(op.shape) for op in operands[1:]]

    kern = functools.partial(_vggt_decoder_kernel, H=H, W=W, out_width=out_width)

    out = pl.pallas_call(
        kern,
        out_shape=jax.ShapeDtypeStruct((B, 1, out_width), jnp.float32),
        grid=(B,),
        in_specs=in_specs,
        out_specs=pl.BlockSpec((1, 1, out_width), lambda b: (b, 0, 0)),
        compiler_params=pltpu.CompilerParams(
            dimension_semantics=("parallel",),          # v7x: one image per TC
            vmem_limit_bytes=32 * 1024 * 1024,
        ),
    )(*operands)

    out = out[:, 0, :]
    points = out[:, :P3].reshape(B, max_points, 3)
    confidence = out[:, P3:P3 + max_points].reshape(B, max_points, 1)
    colors = out[:, P3 + max_points:P3 + max_points + P3].reshape(B, max_points, 3)
    return {"points": points, "colors": colors, "confidence": confidence}


# --------------------------------------------------------------------------
# Parameter construction (deterministic, synthetic) + BN folding
# --------------------------------------------------------------------------

def _make_conv_bn(key, cin, cout):
    """Conv(3x3)+BN params (PyTorch layouts), BN folded (eval mode), bf16 weight."""
    k = jax.random.split(key, 6)
    w = jax.random.normal(k[0], (cout, cin, 3, 3), jnp.float32) * 0.05   # (Cout,Cin,kH,kW)
    b = jax.random.normal(k[1], (cout,), jnp.float32) * 0.05
    gamma = 1.0 + 0.1 * jax.random.normal(k[2], (cout,), jnp.float32)
    beta = 0.1 * jax.random.normal(k[3], (cout,), jnp.float32)
    run_mean = 0.1 * jax.random.normal(k[4], (cout,), jnp.float32)
    run_var = jax.random.uniform(k[5], (cout,), jnp.float32, 0.5, 1.5)

    scale = gamma / jnp.sqrt(run_var + _BN_EPS)
    # torch weight -> (kH, kW, Cin, Cout) -> (9*Cin, Cout), tap-major to match im2col
    w_hwio = jnp.transpose(w, (2, 3, 1, 0)).reshape(9 * cin, cout)
    w_eff = (w_hwio * scale[None, :]).astype(jnp.bfloat16)
    b_eff = (b - run_mean) * scale + beta
    return w_eff, b_eff


def _make_linear(key, cin, cout):
    k = jax.random.split(key, 2)
    w = jax.random.normal(k[0], (cout, cin), jnp.float32) * 0.05         # torch (Out, In)
    b = jax.random.normal(k[1], (cout,), jnp.float32) * 0.05
    return jnp.transpose(w).astype(jnp.bfloat16), b                      # (In, Out), (Out,)


def init_vggt_decoder_params(key, feature_dim, max_points):
    ks = jax.random.split(key, 8)
    p1 = _make_conv_bn(ks[0], feature_dim, 256)      # point_head conv1
    c1 = _make_conv_bn(ks[4], feature_dim, 128)      # confidence_head conv1
    col1 = _make_conv_bn(ks[6], feature_dim, 256)    # color_head conv1
    # fuse the three first-layer convs along Cout: [0:256]=point, [256:384]=conf,
    # [384:640]=color -- they all consume the identical input.
    w_fused = jnp.concatenate([p1[0], c1[0], col1[0]], axis=1)
    b_fused = jnp.concatenate([p1[1], c1[1], col1[1]], axis=0)
    return {
        "conv1_fused": (w_fused, b_fused),
        "p_conv2": _make_conv_bn(ks[1], 256, 128),
        "p_conv3": _make_conv_bn(ks[2], 128, 64),
        "p_lin": _make_linear(ks[3], 64, max_points * 3),
        "c_lin": _make_linear(ks[5], 128, max_points),
        "col_lin": _make_linear(ks[7], 256, max_points * 3),
    }


# --------------------------------------------------------------------------
# Main
# --------------------------------------------------------------------------

if __name__ == "__main__":
    B, FEATURE_DIM, H, W = 2, 32, 8, 8
    MAX_POINTS = 64

    key = jax.random.PRNGKey(0)
    k_feat, k_params = jax.random.split(key)

    features = jax.random.normal(k_feat, (B, FEATURE_DIM, H, W), jnp.float32)  # NCHW
    params = init_vggt_decoder_params(k_params, FEATURE_DIM, MAX_POINTS)

    fwd = jax.jit(functools.partial(vggt_decoder_forward, max_points=MAX_POINTS))
    out = jax.block_until_ready(fwd(params, features))

    assert out["points"].shape == (B, MAX_POINTS, 3)
    assert out["colors"].shape == (B, MAX_POINTS, 3)
    assert out["confidence"].shape == (B, MAX_POINTS, 1)
    assert jnp.all(jnp.isfinite(out["points"]))
    assert jnp.all((out["colors"] >= 0) & (out["colors"] <= 1))
    assert jnp.all((out["confidence"] >= 0) & (out["confidence"] <= 1))

    print("KERNEL_OK")
</pallas_src>

<mosaic_0001>
module attributes {stable_mosaic.version = 11 : i64} {
  func.func @_vggt_decoder_kernel(%arg0: i32, %arg1: memref<1x102x32xbf16, #tpu.memory_space<vmem>>, %arg2: memref<288x640xbf16, #tpu.memory_space<vmem>>, %arg3: memref<1x640xf32, #tpu.memory_space<vmem>>, %arg4: memref<2304x128xbf16, #tpu.memory_space<vmem>>, %arg5: memref<1x128xf32, #tpu.memory_space<vmem>>, %arg6: memref<1152x64xbf16, #tpu.memory_space<vmem>>, %arg7: memref<1x64xf32, #tpu.memory_space<vmem>>, %arg8: memref<64x192xbf16, #tpu.memory_space<vmem>>, %arg9: memref<1x192xf32, #tpu.memory_space<vmem>>, %arg10: memref<128x64xbf16, #tpu.memory_space<vmem>>, %arg11: memref<1x64xf32, #tpu.memory_space<vmem>>, %arg12: memref<256x192xbf16, #tpu.memory_space<vmem>>, %arg13: memref<1x192xf32, #tpu.memory_space<vmem>>, %arg14: memref<80x1xf32, #tpu.memory_space<vmem>>, %arg15: memref<1x1x512xf32, #tpu.memory_space<vmem>>) attributes {dimension_semantics = [#tpu.dimension_semantics<parallel>], iteration_bounds = array<i64: 2>, scalar_prefetch = 0 : i64, scratch_operands = 0 : i64, tpu.core_type = #tpu.core_type<tc>, window_params = [{transform_indices = @transform_0, window_bounds = array<i64: 1, 102, 32>}, {pipeline_mode = #tpu.pipeline_mode<synchronous>, transform_indices = @transform_1, window_bounds = array<i64: 288, 640>}, {pipeline_mode = #tpu.pipeline_mode<synchronous>, transform_indices = @transform_2, window_bounds = array<i64: 1, 640>}, {pipeline_mode = #tpu.pipeline_mode<synchronous>, transform_indices = @transform_3, window_bounds = array<i64: 2304, 128>}, {pipeline_mode = #tpu.pipeline_mode<synchronous>, transform_indices = @transform_4, window_bounds = array<i64: 1, 128>}, {pipeline_mode = #tpu.pipeline_mode<synchronous>, transform_indices = @transform_5, window_bounds = array<i64: 1152, 64>}, {pipeline_mode = #tpu.pipeline_mode<synchronous>, transform_indices = @transform_6, window_bounds = array<i64: 1, 64>}, {pipeline_mode = #tpu.pipeline_mode<synchronous>, transform_indices = @transform_7, window_bounds = array<i64: 64, 192>}, {pipeline_mode = #tpu.pipeline_mode<synchronous>, transform_indices = @transform_8, window_bounds = array<i64: 1, 192>}, {pipeline_mode = #tpu.pipeline_mode<synchronous>, transform_indices = @transform_9, window_bounds = array<i64: 128, 64>}, {pipeline_mode = #tpu.pipeline_mode<synchronous>, transform_indices = @transform_10, window_bounds = array<i64: 1, 64>}, {pipeline_mode = #tpu.pipeline_mode<synchronous>, transform_indices = @transform_11, window_bounds = array<i64: 256, 192>}, {pipeline_mode = #tpu.pipeline_mode<synchronous>, transform_indices = @transform_12, window_bounds = array<i64: 1, 192>}, {pipeline_mode = #tpu.pipeline_mode<synchronous>, transform_indices = @transform_13, window_bounds = array<i64: 80, 1>}, {transform_indices = @transform_14, window_bounds = array<i64: 1, 1, 512>}]} {
    %c0 = arith.constant 0 : index
    %c0_0 = arith.constant 0 : index
    %0 = vector.load %arg14[%c0, %c0_0] : memref<80x1xf32, #tpu.memory_space<vmem>>, vector<80x1xf32>
    %c0_1 = arith.constant 0 : index
    %c0_2 = arith.constant 0 : index
    %c0_3 = arith.constant 0 : index
    %1 = vector.load %arg1[%c0_1, %c0_2, %c0_3] : memref<1x102x32xbf16, #tpu.memory_space<vmem>>, vector<1x102x32xbf16>
    %2 = vector.shape_cast %1 : vector<1x102x32xbf16> to vector<102x32xbf16>
    %3 = vector.extract_strided_slice %2 {offsets = [0, 0], sizes = [80, 32], strides = [1, 1]} : vector<102x32xbf16> to vector<80x32xbf16>
    %4 = vector.extract_strided_slice %2 {offsets = [1, 0], sizes = [80, 32], strides = [1, 1]} : vector<102x32xbf16> to vector<80x32xbf16>
    %5 = vector.extract_strided_slice %2 {offsets = [2, 0], sizes = [80, 32], strides = [1, 1]} : vector<102x32xbf16> to vector<80x32xbf16>
    %6 = vector.extract_strided_slice %2 {offsets = [10, 0], sizes = [80, 32], strides = [1, 1]} : vector<102x32xbf16> to vector<80x32xbf16>
    %7 = vector.extract_strided_slice %2 {offsets = [11, 0], sizes = [80, 32], strides = [1, 1]} : vector<102x32xbf16> to vector<80x32xbf16>
    %8 = vector.extract_strided_slice %2 {offsets = [12, 0], sizes = [80, 32], strides = [1, 1]} : vector<102x32xbf16> to vector<80x32xbf16>
    %9 = vector.extract_strided_slice %2 {offsets = [20, 0], sizes = [80, 32], strides = [1, 1]} : vector<102x32xbf16> to vector<80x32xbf16>
    %10 = vector.extract_strided_slice %2 {offsets = [21, 0], sizes = [80, 32], strides = [1, 1]} : vector<102x32xbf16> to vector<80x32xbf16>
    %11 = vector.extract_strided_slice %2 {offsets = [22, 0], sizes = [80, 32], strides = [1, 1]} : vector<102x32xbf16> to vector<80x32xbf16>
    %12 = tpu.concatenate %3, %4, %5, %6, %7, %8, %9, %10, %11 in 1 : vector<80x32xbf16>, vector<80x32xbf16>, vector<80x32xbf16>, vector<80x32xbf16>, vector<80x32xbf16>, vector<80x32xbf16>, vector<80x32xbf16>, vector<80x32xbf16>, vector<80x32xbf16> -> vector<80x288xbf16>
    %c0_4 = arith.constant 0 : index
    %c0_5 = arith.constant 0 : index
    %13 = vector.load %arg2[%c0_4, %c0_5] : memref<288x640xbf16, #tpu.memory_space<vmem>>, vector<288x640xbf16>
    %cst = arith.constant dense<0.000000e+00> : vector<80x640xf32>
    %14 = tpu.matmul %12, %13, %cst {dimension_numbers = #tpu.dot_dimension_numbers<[1], [0], [0], [1], [0, 0, 1, 1], [], []>} : vector<80x288xbf16>, vector<288x640xbf16>, vector<80x640xf32> -> vector<80x640xf32>
    %c0_6 = arith.constant 0 : index
    %c0_7 = arith.constant 0 : index
    %15 = vector.load %arg3[%c0_6, %c0_7] : memref<1x640xf32, #tpu.memory_space<vmem>>, vector<1x640xf32>
    %16 = vector.broadcast %15 : vector<1x640xf32> to vector<80x640xf32>
    %17 = arith.addf %14, %16 : vector<80x640xf32>
    %cst_8 = arith.constant 0.000000e+00 : f32
    %18 = vector.broadcast %cst_8 : f32 to vector<80x640xf32>
    %19 = arith.maximumf %17, %18 : vector<80x640xf32>
    %20 = vector.broadcast %0 : vector<80x1xf32> to vector<80x640xf32>
    %21 = arith.mulf %19, %20 : vector<80x640xf32>
    %cst_9 = arith.constant dense<0.000000e+00> : vector<640xf32>
    %22 = vector.multi_reduction <add>, %21, %cst_9 [0] : vector<80x640xf32> to vector<640xf32>
    %23 = vector.shape_cast %22 : vector<640xf32> to vector<1x640xf32>
    %cst_10 = arith.constant 1.562500e-02 : f32
    %24 = vector.broadcast %cst_10 : f32 to vector<1x640xf32>
    %25 = arith.mulf %23, %24 : vector<1x640xf32>
    %26 = vector.extract_strided_slice %25 {offsets = [0, 256], sizes = [1, 128], strides = [1, 1]} : vector<1x640xf32> to vector<1x128xf32>
    %27 = arith.truncf %26 : vector<1x128xf32> to vector<1x128xbf16>
    %28 = vector.extract_strided_slice %25 {offsets = [0, 384], sizes = [1, 256], strides = [1, 1]} : vector<1x640xf32> to vector<1x256xf32>
    %29 = arith.truncf %28 : vector<1x256xf32> to vector<1x256xbf16>
    %30 = vector.extract_strided_slice %19 {offsets = [0, 0], sizes = [80, 256], strides = [1, 1]} : vector<80x640xf32> to vector<80x256xf32>
    %31 = vector.broadcast %0 : vector<80x1xf32> to vector<80x256xf32>
    %32 = arith.mulf %30, %31 : vector<80x256xf32>
    %33 = arith.truncf %32 : vector<80x256xf32> to vector<80x256xbf16>
    %cst_11 = arith.constant 0.000000e+00 : bf16
    %34 = vector.broadcast %cst_11 : bf16 to vector<11x256xbf16>
    %cst_12 = arith.constant 0.000000e+00 : bf16
    %35 = vector.broadcast %cst_12 : bf16 to vector<11x256xbf16>
    %36 = tpu.concatenate %34, %33, %35 in 0 : vector<11x256xbf16>, vector<80x256xbf16>, vector<11x256xbf16> -> vector<102x256xbf16>
    %37 = vector.extract_strided_slice %36 {offsets = [0, 0], sizes = [80, 256], strides = [1, 1]} : vector<102x256xbf16> to vector<80x256xbf16>
    %38 = vector.extract_strided_slice %36 {offsets = [1, 0], sizes = [80, 256], strides = [1, 1]} : vector<102x256xbf16> to vector<80x256xbf16>
    %39 = vector.extract_strided_slice %36 {offsets = [2, 0], sizes = [80, 256], strides = [1, 1]} : vector<102x256xbf16> to vector<80x256xbf16>
    %40 = vector.extract_strided_slice %36 {offsets = [10, 0], sizes = [80, 256], strides = [1, 1]} : vector<102x256xbf16> to vector<80x256xbf16>
    %41 = vector.extract_strided_slice %36 {offsets = [11, 0], sizes = [80, 256], strides = [1, 1]} : vector<102x256xbf16> to vector<80x256xbf16>
    %42 = vector.extract_strided_slice %36 {offsets = [12, 0], sizes = [80, 256], strides = [1, 1]} : vector<102x256xbf16> to vector<80x256xbf16>
    %43 = vector.extract_strided_slice %36 {offsets = [20, 0], sizes = [80, 256], strides = [1, 1]} : vector<102x256xbf16> to vector<80x256xbf16>
    %44 = vector.extract_strided_slice %36 {offsets = [21, 0], sizes = [80, 256], strides = [1, 1]} : vector<102x256xbf16> to vector<80x256xbf16>
    %45 = vector.extract_strided_slice %36 {offsets = [22, 0], sizes = [80, 256], strides = [1, 1]} : vector<102x256xbf16> to vector<80x256xbf16>
    %46 = tpu.concatenate %37, %38, %39, %40, %41, %42, %43, %44, %45 in 1 : vector<80x256xbf16>, vector<80x256xbf16>, vector<80x256xbf16>, vector<80x256xbf16>, vector<80x256xbf16>, vector<80x256xbf16>, vector<80x256xbf16>, vector<80x256xbf16>, vector<80x256xbf16> -> vector<80x2304xbf16>
    %c0_13 = arith.constant 0 : index
    %c0_14 = arith.constant 0 : index
    %47 = vector.load %arg4[%c0_13, %c0_14] : memref<2304x128xbf16, #tpu.memory_space<vmem>>, vector<2304x128xbf16>
    %cst_15 = arith.constant dense<0.000000e+00> : vector<80x128xf32>
    %48 = tpu.matmul %46, %47, %cst_15 {dimension_numbers = #tpu.dot_dimension_numbers<[1], [0], [0], [1], [0, 0, 1, 1], [], []>} : vector<80x2304xbf16>, vector<2304x128xbf16>, vector<80x128xf32> -> vector<80x128xf32>
    %c0_16 = arith.constant 0 : index
    %c0_17 = arith.constant 0 : index
    %49 = vector.load %arg5[%c0_16, %c0_17] : memref<1x128xf32, #tpu.memory_space<vmem>>, vector<1x128xf32>
    %50 = vector.broadcast %49 : vector<1x128xf32> to vector<80x128xf32>
    %51 = arith.addf %48, %50 : vector<80x128xf32>
    %cst_18 = arith.constant 0.000000e+00 : f32
    %52 = vector.broadcast %cst_18 : f32 to vector<80x128xf32>
    %53 = arith.maximumf %51, %52 : vector<80x128xf32>
    %54 = vector.broadcast %0 : vector<80x1xf32> to vector<80x128xf32>
    %55 = arith.mulf %53, %54 : vector<80x128xf32>
    %56 = arith.truncf %55 : vector<80x128xf32> to vector<80x128xbf16>
    %cst_19 = arith.constant 0.000000e+00 : bf16
    %57 = vector.broadcast %cst_19 : bf16 to vector<11x128xbf16>
    %cst_20 = arith.constant 0.000000e+00 : bf16
    %58 = vector.broadcast %cst_20 : bf16 to vector<11x128xbf16>
    %59 = tpu.concatenate %57, %56, %58 in 0 : vector<11x128xbf16>, vector<80x128xbf16>, vector<11x128xbf16> -> vector<102x128xbf16>
    %60 = vector.extract_strided_slice %59 {offsets = [0, 0], sizes = [80, 128], strides = [1, 1]} : vector<102x128xbf16> to vector<80x128xbf16>
    %61 = vector.extract_strided_slice %59 {offsets = [1, 0], sizes = [80, 128], strides = [1, 1]} : vector<102x128xbf16> to vector<80x128xbf16>
    %62 = vector.extract_strided_slice %59 {offsets = [2, 0], sizes = [80, 128], strides = [1, 1]} : vector<102x128xbf16> to vector<80x128xbf16>
    %63 = vector.extract_strided_slice %59 {offsets = [10, 0], sizes = [80, 128], strides = [1, 1]} : vector<102x128xbf16> to vector<80x128xbf16>
    %64 = vector.extract_strided_slice %59 {offsets = [11, 0], sizes = [80, 128], strides = [1, 1]} : vector<102x128xbf16> to vector<80x128xbf16>
    %65 = vector.extract_strided_slice %59 {offsets = [12, 0], sizes = [80, 128], strides = [1, 1]} : vector<102x128xbf16> to vector<80x128xbf16>
    %66 = vector.extract_strided_slice %59 {offsets = [20, 0], sizes = [80, 128], strides = [1, 1]} : vector<102x128xbf16> to vector<80x128xbf16>
    %67 = vector.extract_strided_slice %59 {offsets = [21, 0], sizes = [80, 128], strides = [1, 1]} : vector<102x128xbf16> to vector<80x128xbf16>
    %68 = vector.extract_strided_slice %59 {offsets = [22, 0], sizes = [80, 128], strides = [1, 1]} : vector<102x128xbf16> to vector<80x128xbf16>
    %69 = tpu.concatenate %60, %61, %62, %63, %64, %65, %66, %67, %68 in 1 : vector<80x128xbf16>, vector<80x128xbf16>, vector<80x128xbf16>, vector<80x128xbf16>, vector<80x128xbf16>, vector<80x128xbf16>, vector<80x128xbf16>, vector<80x128xbf16>, vector<80x128xbf16> -> vector<80x1152xbf16>
    %c0_21 = arith.constant 0 : index
    %c0_22 = arith.constant 0 : index
    %70 = vector.load %arg6[%c0_21, %c0_22] : memref<1152x64xbf16, #tpu.memory_space<vmem>>, vector<1152x64xbf16>
    %cst_23 = arith.constant dense<0.000000e+00> : vector<80x64xf32>
    %71 = tpu.matmul %69, %70, %cst_23 {dimension_numbers = #tpu.dot_dimension_numbers<[1], [0], [0], [1], [0, 0, 1, 1], [], []>} : vector<80x1152xbf16>, vector<1152x64xbf16>, vector<80x64xf32> -> vector<80x64xf32>
    %c0_24 = arith.constant 0 : index
    %c0_25 = arith.constant 0 : index
    %72 = vector.load %arg7[%c0_24, %c0_25] : memref<1x64xf32, #tpu.memory_space<vmem>>, vector<1x64xf32>
    %73 = vector.broadcast %72 : vector<1x64xf32> to vector<80x64xf32>
    %74 = arith.addf %71, %73 : vector<80x64xf32>
    %cst_26 = arith.constant 0.000000e+00 : f32
    %75 = vector.broadcast %cst_26 : f32 to vector<80x64xf32>
    %76 = arith.maximumf %74, %75 : vector<80x64xf32>
    %77 = vector.broadcast %0 : vector<80x1xf32> to vector<80x64xf32>
    %78 = arith.mulf %76, %77 : vector<80x64xf32>
    %cst_27 = arith.constant dense<0.000000e+00> : vector<64xf32>
    %79 = vector.multi_reduction <add>, %78, %cst_27 [0] : vector<80x64xf32> to vector<64xf32>
    %80 = vector.shape_cast %79 : vector<64xf32> to vector<1x64xf32>
    %cst_28 = arith.constant 1.562500e-02 : f32
    %81 = vector.broadcast %cst_28 : f32 to vector<1x64xf32>
    %82 = arith.mulf %80, %81 : vector<1x64xf32>
    %83 = arith.truncf %82 : vector<1x64xf32> to vector<1x64xbf16>
    %c0_29 = arith.constant 0 : index
    %c0_30 = arith.constant 0 : index
    %84 = vector.load %arg8[%c0_29, %c0_30] : memref<64x192xbf16, #tpu.memory_space<vmem>>, vector<64x192xbf16>
    %cst_31 = arith.constant dense<0.000000e+00> : vector<1x192xf32>
    %85 = tpu.matmul %83, %84, %cst_31 {dimension_numbers = #tpu.dot_dimension_numbers<[1], [0], [0], [1], [0, 0, 1, 1], [], []>} : vector<1x64xbf16>, vector<64x192xbf16>, vector<1x192xf32> -> vector<1x192xf32>
    %c0_32 = arith.constant 0 : index
    %c0_33 = arith.constant 0 : index
    %86 = vector.load %arg9[%c0_32, %c0_33] : memref<1x192xf32, #tpu.memory_space<vmem>>, vector<1x192xf32>
    %87 = arith.addf %85, %86 : vector<1x192xf32>
    %c0_34 = arith.constant 0 : index
    %c0_35 = arith.constant 0 : index
    %88 = vector.load %arg10[%c0_34, %c0_35] : memref<128x64xbf16, #tpu.memory_space<vmem>>, vector<128x64xbf16>
    %cst_36 = arith.constant dense<0.000000e+00> : vector<1x64xf32>
    %89 = tpu.matmul %27, %88, %cst_36 {dimension_numbers = #tpu.dot_dimension_numbers<[1], [0], [0], [1], [0, 0, 1, 1], [], []>} : vector<1x128xbf16>, vector<128x64xbf16>, vector<1x64xf32> -> vector<1x64xf32>
    %c0_37 = arith.constant 0 : index
    %c0_38 = arith.constant 0 : index
    %90 = vector.load %arg11[%c0_37, %c0_38] : memref<1x64xf32, #tpu.memory_space<vmem>>, vector<1x64xf32>
    %91 = arith.addf %89, %90 : vector<1x64xf32>
    %c0_39 = arith.constant 0 : index
    %c0_40 = arith.constant 0 : index
    %92 = vector.load %arg12[%c0_39, %c0_40] : memref<256x192xbf16, #tpu.memory_space<vmem>>, vector<256x192xbf16>
    %cst_41 = arith.constant dense<0.000000e+00> : vector<1x192xf32>
    %93 = tpu.matmul %29, %92, %cst_41 {dimension_numbers = #tpu.dot_dimension_numbers<[1], [0], [0], [1], [0, 0, 1, 1], [], []>} : vector<1x256xbf16>, vector<256x192xbf16>, vector<1x192xf32> -> vector<1x192xf32>
    %c0_42 = arith.constant 0 : index
    %c0_43 = arith.constant 0 : index
    %94 = vector.load %arg13[%c0_42, %c0_43] : memref<1x192xf32, #tpu.memory_space<vmem>>, vector<1x192xf32>
    %95 = arith.addf %93, %94 : vector<1x192xf32>
    %96 = arith.negf %91 : vector<1x64xf32>
    %97 = math.exp %96 : vector<1x64xf32>
    %cst_44 = arith.constant 1.000000e+00 : f32
    %98 = vector.broadcast %cst_44 : f32 to vector<1x64xf32>
    %99 = arith.addf %98, %97 : vector<1x64xf32>
    %100 = arith.divf %98, %99 : vector<1x64xf32>
    %101 = arith.negf %95 : vector<1x192xf32>
    %102 = math.exp %101 : vector<1x192xf32>
    %cst_45 = arith.constant 1.000000e+00 : f32
    %103 = vector.broadcast %cst_45 : f32 to vector<1x192xf32>
    %104 = arith.addf %103, %102 : vector<1x192xf32>
    %105 = arith.divf %103, %104 : vector<1x192xf32>
    %106 = tpu.concatenate %87, %100, %105 in 1 : vector<1x192xf32>, vector<1x64xf32>, vector<1x192xf32> -> vector<1x448xf32>
    %cst_46 = arith.constant 0.000000e+00 : f32
    %107 = vector.broadcast %cst_46 : f32 to vector<1x64xf32>
    %108 = tpu.concatenate %106, %107 in 1 : vector<1x448xf32>, vector<1x64xf32> -> vector<1x512xf32>
    %c0_47 = arith.constant 0 : index
    %c0_48 = arith.constant 0 : index
    %c0_49 = arith.constant 0 : index
    %109 = vector.load %arg15[%c0_47, %c0_48, %c0_49] : memref<1x1x512xf32, #tpu.memory_space<vmem>>, vector<1x1x512xf32>
    %110 = vector.shape_cast %109 : vector<1x1x512xf32> to vector<1x512xf32>
    %111 = vector.shape_cast %108 : vector<1x512xf32> to vector<1x1x512xf32>
    tpu.vector_store %arg15[%c0_47, %c0_48, %c0_49], %111 {strides = array<i32>} : memref<1x1x512xf32, #tpu.memory_space<vmem>>, vector<1x1x512xf32>,
    return
  }
  func.func @transform_0(%arg0: i32) -> (i32, i32, i32) {
    %c0_i32 = arith.constant 0 : i32
    %c0_i32_0 = arith.constant 0 : i32
    %c0_i32_1 = arith.constant 0 : i32
    return %arg0, %c0_i32, %c0_i32_0 : i32, i32, i32
  }
  func.func @transform_1(%arg0: i32) -> (i32, i32) {
    %c0_i32 = arith.constant 0 : i32
    %c0_i32_0 = arith.constant 0 : i32
    %c0_i32_1 = arith.constant 0 : i32
    return %c0_i32, %c0_i32_0 : i32, i32
  }
  func.func @transform_2(%arg0: i32) -> (i32, i32) {
    %c0_i32 = arith.constant 0 : i32
    %c0_i32_0 = arith.constant 0 : i32
    %c0_i32_1 = arith.constant 0 : i32
    return %c0_i32, %c0_i32_0 : i32, i32
  }
  func.func @transform_3(%arg0: i32) -> (i32, i32) {
    %c0_i32 = arith.constant 0 : i32
    %c0_i32_0 = arith.constant 0 : i32
    %c0_i32_1 = arith.constant 0 : i32
    return %c0_i32, %c0_i32_0 : i32, i32
  }
  func.func @transform_4(%arg0: i32) -> (i32, i32) {
    %c0_i32 = arith.constant 0 : i32
    %c0_i32_0 = arith.constant 0 : i32
    %c0_i32_1 = arith.constant 0 : i32
    return %c0_i32, %c0_i32_0 : i32, i32
  }
  func.func @transform_5(%arg0: i32) -> (i32, i32) {
    %c0_i32 = arith.constant 0 : i32
    %c0_i32_0 = arith.constant 0 : i32
    %c0_i32_1 = arith.constant 0 : i32
    return %c0_i32, %c0_i32_0 : i32, i32
  }
  func.func @transform_6(%arg0: i32) -> (i32, i32) {
    %c0_i32 = arith.constant 0 : i32
    %c0_i32_0 = arith.constant 0 : i32
    %c0_i32_1 = arith.constant 0 : i32
    return %c0_i32, %c0_i32_0 : i32, i32
  }
  func.func @transform_7(%arg0: i32) -> (i32, i32) {
    %c0_i32 = arith.constant 0 : i32
    %c0_i32_0 = arith.constant 0 : i32
    %c0_i32_1 = arith.constant 0 : i32
    return %c0_i32, %c0_i32_0 : i32, i32
  }
  func.func @transform_8(%arg0: i32) -> (i32, i32) {
    %c0_i32 = arith.constant 0 : i32
    %c0_i32_0 = arith.constant 0 : i32
    %c0_i32_1 = arith.constant 0 : i32
    return %c0_i32, %c0_i32_0 : i32, i32
  }
  func.func @transform_9(%arg0: i32) -> (i32, i32) {
    %c0_i32 = arith.constant 0 : i32
    %c0_i32_0 = arith.constant 0 : i32
    %c0_i32_1 = arith.constant 0 : i32
    return %c0_i32, %c0_i32_0 : i32, i32
  }
  func.func @transform_10(%arg0: i32) -> (i32, i32) {
    %c0_i32 = arith.constant 0 : i32
    %c0_i32_0 = arith.constant 0 : i32
    %c0_i32_1 = arith.constant 0 : i32
    return %c0_i32, %c0_i32_0 : i32, i32
  }
  func.func @transform_11(%arg0: i32) -> (i32, i32) {
    %c0_i32 = arith.constant 0 : i32
    %c0_i32_0 = arith.constant 0 : i32
    %c0_i32_1 = arith.constant 0 : i32
    return %c0_i32, %c0_i32_0 : i32, i32
  }
  func.func @transform_12(%arg0: i32) -> (i32, i32) {
    %c0_i32 = arith.constant 0 : i32
    %c0_i32_0 = arith.constant 0 : i32
    %c0_i32_1 = arith.constant 0 : i32
    return %c0_i32, %c0_i32_0 : i32, i32
  }
  func.func @transform_13(%arg0: i32) -> (i32, i32) {
    %c0_i32 = arith.constant 0 : i32
    %c0_i32_0 = arith.constant 0 : i32
    %c0_i32_1 = arith.constant 0 : i32
    return %c0_i32, %c0_i32_0 : i32, i32
  }
  func.func @transform_14(%arg0: i32) -> (i32, i32, i32) {
    %c0_i32 = arith.constant 0 : i32
    %c0_i32_0 = arith.constant 0 : i32
    %c0_i32_1 = arith.constant 0 : i32
    return %arg0, %c0_i32, %c0_i32_0 : i32, i32, i32
  }
}

</mosaic_0001>

<bundles_post_ra>
// kernel: vggt_decoder_forward.1
= control target key start
LH: loop header
LB: loop body
LE: loop exit
PB: predicated region body
PF: predicated region fallthrough
CT: control target
= control target key end

     0   :  { %19 = vsyncpa [#allocation3], 0  ;;  %s8313_s29 = smov 0   ;;  %s11316_s0 = inlined_call_operand.vmem [shape: bf16[2,102,32], index: 0, kind: input, shape index: {}]   ;;  %s11317_s1 = inlined_call_operand.vmem [shape: bf16[288,640], index: 1, kind: input, shape index: {}]   ;;  %s11318_s2 = inlined_call_operand.vmem [shape: f32[1,640], index: 2, kind: input, shape index: {}]   ;;  %s11319_s3 = inlined_call_operand.hbm [shape: bf16[2304,128], index: 3, kind: input, shape index: {}]   ;;  %s11320_s4 = inlined_call_operand.vmem [shape: f32[1,128], index: 4, kind: input, shape index: {}]   ;;  %s11321_s5 = inlined_call_operand.vmem [shape: bf16[1152,64], index: 5, kind: input, shape index: {}]   ;;  %s11322_s6 = inlined_call_operand.vmem [shape: f32[1,64], index: 6, kind: input, shape index: {}]   ;;  %s11323_s7 = inlined_call_operand.vmem [shape: bf16[64,192], index: 7, kind: input, shape index: {}]   ;;  %s11324_s8 = inlined_call_operand.vmem [shape: f32[1,192], index: 8, kind: input, shape index: {}]   ;;  %s11325_s9 = inlined_call_operand.vmem [shape: bf16[128,64], index: 9, kind: input, shape index: {}]   ;;  %s11326_s10 = inlined_call_operand.vmem [shape: f32[1,64], index: 10, kind: input, shape index: {}]   ;;  %s11327_s11 = inlined_call_operand.vmem [shape: bf16[256,192], index: 11, kind: input, shape index: {}]   ;;  %s11328_s12 = inlined_call_operand.vmem [shape: f32[1,192], index: 12, kind: input, shape index: {}]   ;;  %s11329_s13 = inlined_call_operand.vmem [shape: f32[80,1], index: 13, kind: input, shape index: {}]   ;;  %s11330_s14 = inlined_call_operand.vmem [shape: f32[2,1,512], index: 14, kind: output, shape index: {}]  }
   0x1 LB: > { %s372_s16 = sshll.u32 %s11319_s3, 4  ;;  %s6277_s17 = sadd.s32 4294967295, %s8229_s29   ;;  %s8229_s29 = sphi %s8313_s29, %s25_s29   ;;  %s373_s16 = int_to_ptr.hbm [resolvable:$true] %s372_s16 }
   0x2   : > { %p6279_p0 = scmp.ge.s32.totalorder %s8229_s29, 1  ;;  %p355_p1 = scmp.lt.s32.totalorder %s8229_s29, 3 }
   0x3   : > { %p8154_p2 = scmp.eq.s32.totalorder %s6277_s17, 0  ;;  %s8231_s18 = smov [#allocation2]  }
   0x4   : > { %p356_p3 = pnand %p6279_p0, %p355_p1  ;;  %s374_s19 = sshll.u32 %s8231_s18, 4  ;;  %s375_s19 = int_to_ptr.vmem [resolvable:$true] %s374_s19 }
   0x5   : > { %s8232_s20 = smov 64   ;;  %s8233_s21 = smov 4  }
   0x6   : > { %p8150_p4 = pneg %p356_p3  ;;  %428 = sbr.rel (%p356_p3) target bundleno = 1527 (0x5f7), region = 76 }
   0x8   : > { %p8151_p5 = pnand %p8154_p2, %p8150_p4 }
   0xa   : > { %8153 = dma.hbm_to_vmem [thread:$0]  (!%p8151_p5), %s373_s16, 18432, %s375_s19, [#allocation3], %s8232_s20, %s8232_s20, %s8233_s21  }
   0xb   : > { %8224 = dma.done.wait (%p8154_p2), [#allocation3], 18432  }
   0xc   : > { %8226 = vsyncadd (%p8154_p2), [#allocation3], 4294948864  ;;  %p474_p6 = scmp.lt.s32.totalorder %s6277_s17, 1  ;;  %vm590_vm0 = vcmask 1046528   ;;  %vm535_vm1 = vsmask.f32 7424 }
   0xd   : > { %v6628_v13 = vld [vmem:[%s11317_s1 + $0x2a8] sm:$0xf]  ;;  %v7821_v14 = vld [vmem:[%s11317_s1 + $0x2b8] sm:$0xf0]  ;;  %s11331_s15 = smov 96   ;;  %vm695_vm2 = vcmask 1045504  }
   0xe   : > { %s11544_s17 = smov (!%p474_p6, %s6277_s17), 1  ;;  %v6629_v23 = vor.u32 %v7821_v14, %v6628_v13  ;;  %s8235_s16 = smov 32   ;;  %v6608_v27 = vld [vmem:[%s11317_s1 + $0x280] sm:$0xf]  ;;  %v7816_v28 = vld [vmem:[%s11317_s1 + $0x290] sm:$0xf0] }
   0xf   : > { %s8145_s22 = smul.u32 52, %s11544_s17  ;;  %vm742_vm3 = vsmask.f32 5376  ;;  %v6609_v36 = vor.u32 %v7816_v28, %v6608_v27  ;;  %vm786_vm4 = vcmask 1044480   ;;  %vm798_vm5 = vcmask 261120   ;;  %s11379_s30 = smov 96  }
  0x10   : > { %1553 = vmatpush.bf16.msra.mxu2 %v6629_v23  ;;  %v7809_v45 = vld [vmem:[%s11317_s1 + $0x25c] sm:$0xf]  ;;  %v6590_v46 = vld [vmem:[%s11317_s1 + $0x26c] sm:$0xf0]  ;;  %v6550_v27 = vld [vmem:[%s11317_s1 + $0x21c] sm:$0xf0] }
  0x11   : > { %s8330_s25 = scalar_lea.vmem %s11316_s0, %s8145_s22  ;;  %s8236_s22 = smov 64   ;;  %v6593_v50 = vor.u32 %v7809_v45, %v6590_v46  ;;  %vm641_vm6 = vsmask.f32 6400  ;;  %vm809_vm7 = vcmask 523264   ;;  %vm820_vm8 = vcmask 785408   ;;  %vm9413_vm9 = vmand %vm695_vm2, %vm742_vm3 }
  0x12   : > { %v8333_v0 = vld [vmem:[%s8330_s25 + $0x4] sm:$0xff]   ;;  %v8336_v1 = vld [vmem:[%s8330_s25 + $0xc] sm:$0xff]   ;;  %v8397_v44 = vld [vmem:[%s8330_s25 + $0x14] sm:$0xff]   ;;  %vm2479_vm10 = vcmask 1042432   ;;  %vm2512_vm11 = vsmask.f32 2304 }
  0x13   : > { %v8339_v2 = vld [vmem:[%s8330_s25] sm:$0xff]   ;;  %v8342_v3 = vld [vmem:[%s8330_s25 + $0x8] sm:$0xff]   ;;  %v620_v6 = vrot.slane %v8333_v0, 1  ;;  %v621_v7 = vrot.slane %v8336_v1, 1  ;;  %v8353_v12 = vld [vmem:[%s8330_s25 + $0x10] sm:$0xff]   ;;  %v696_v17 = vrot.slane %v8333_v0, 2 }
  0x14   : > { %v537_v4 = vshrl.u32 %v8339_v2, 16  ;;  %v539_v5 = vshll.u32 %v8339_v2, 16  ;;  %v544_v8 = vshll.u32 %v8342_v3, 16  ;;  %v721_v16 = vrot.slane %v8342_v3, 2  ;;  %1554 = vmatpush.bf16.msra.mxu2 %v6609_v36  ;;  %v8408_v49 = vld [vmem:[%s8330_s25 + $0x18] sm:$0xff]   ;;  %v8452_v14 = vld [vmem:[%s8330_s25 + $0x20] sm:$0xff]  }
  0x15   : > { %v622_v10 = vsel %vm590_vm0, %v620_v6, %v621_v7  ;;  %v697_v18 = vrot.slane %v8336_v1, 2  ;;  %v548_v19 = vshrl.u32 %v8342_v3, 16  ;;  %v722_v20 = vrot.slane %v8353_v12, 2  ;;  %s6285_s20 = sshll.u32 %s11544_s17, 2 }
  0x16   : > { %v541_v9 = vrot.slane %v539_v5, 1  ;;  %v546_v11 = vrot.slane %v544_v8, 1  ;;  %631 = vrot.lane.b32.xlu1 %v622_v10, %s11331_s15  ;;  %v552_v22 = vshll.u32 %v8353_v12, 16  ;;  %v556_v25 = vshrl.u32 %v8353_v12, 16  ;;  %v6570_v10 = vld [vmem:[%s11317_s1 + $0x244] sm:$0xf0]  ;;  %s482_s23 = scalar_lea.vmem %s11330_s14, %s6285_s20 }
  0x17   : > { %v723_v24 = vsel %vm695_vm2, %v721_v16, %v722_v20  ;;  %v743_v26 = vrot.slane %v548_v19, 2  ;;  %v591_v29 = vrot.slane %v8339_v2, 1  ;;  %v592_v30 = vrot.slane %v8342_v3, 1 }
  0x18   : > { %v542_v15 = vor.u32 %v541_v9, %v537_v4  ;;  %732 = vrot.lane.b32.xlu2 %v723_v24, %s8236_s22  ;;  %v744_v31 = vrot.slane %v544_v8, 3  ;;  %v747_v32 = vrot.slane %v552_v22, 3  ;;  %v698_v33 = vsel %vm695_vm2, %v696_v17, %v697_v18  ;;  %1615 = vmatpush.bf16.msrb.mxu2 %v6593_v50  ;;  %v8439_v8 = vld [vmem:[%s8330_s25 + $0x1c] sm:$0xff]   ;;  %v7804_v9 = vld [vmem:[%s11317_s1 + $0x234] sm:$0xf] }
  0x19   : > { %v746_v34 = vrot.slane %v556_v25, 2  ;;  %v787_v37 = vrot.slane %v8342_v3, 3  ;;  %v788_v39 = vrot.slane %v8353_v12, 3  ;;  %v593_v40 = vsel %vm590_vm0, %v591_v29, %v592_v30 }
  0x1a   : > { %v547_v21 = vsel %vm535_vm1, %v542_v15, %v546_v11  ;;  %v745_v35 = vor.u32 %v744_v31, %v743_v26  ;;  %v594_v41 = vrot.slane %v8353_v12, 1  ;;  %v550_v47 = vor.u32 %v548_v19, %v546_v11  ;;  %v7799_v26 = vld [vmem:[%s11317_s1 + $0x20c] sm:$0xf] }
  0x1b   : > { %580 = vrot.lane.b32.xlu0 %v547_v21, %s8235_s16  ;;  %v748_v38 = vor.u32 %v747_v32, %v746_v34  ;;  %v8393_v43 = vsel %vm786_vm4, %v787_v37, %v788_v39  ;;  %v554_v48 = vrot.slane %v552_v22, 1  ;;  %v623_v52 = vrot.slane %v8397_v44, 1 }
  0x1c   : > { %6646 = vmatmul.msk.bf16.vlgmr.msra.gmra.mxu2 %vm798_vm5, %v8393_v43  ;;  %v595_v51 = vsel %vm590_vm0, %v592_v30, %v594_v41  ;;  %v564_v53 = vshrl.u32 %v8408_v49, 16  ;;  %v560_v54 = vshll.u32 %v8408_v49, 16  ;;  %v724_v56 = vrot.slane %v8408_v49, 2 }
  0x1d   : > { %v749_v42 = vsel %vm742_vm3, %v745_v35, %v748_v38  ;;  %v555_v55 = vsel %vm535_vm1, %v550_v47, %v554_v48  ;;  %v624_v57 = vsel %vm590_vm0, %v621_v7, %v623_v52  ;;  %v699_v60 = vrot.slane %v8397_v44, 2 }
  0x1e   : > { %707 = vrot.lane.b32.xlu1 %v698_v33, %s8235_s16  ;;  %v750_v58 = vrot.slane %v564_v53, 2  ;;  %v751_v59 = vrot.slane %v560_v54, 3  ;;  %v790_v61 = vrot.slane %v8408_v49, 3  ;;  %v725_v62 = vsel %vm695_vm2, %v722_v20, %v724_v56 }
  0x1f   : > { %v700_v4 = vsel %vm695_vm2, %v697_v18, %v699_v60  ;;  %v596_v6 = vrot.slane %v8408_v49, 1  ;;  %v558_v11 = vor.u32 %v556_v25, %v554_v48  ;;  %v562_v13 = vrot.slane %v560_v54, 1  ;;  %v8469_v25 = vld [vmem:[%s8330_s25 + $0x28] sm:$0xff]   ;;  %v6510_v54 = vld [vmem:[%s11317_s1 + $0x1cc] sm:$0xf0] }
  0x20   : > { %776 = vrot.lane.b32.xlu2 %v749_v42, %s11331_s15  ;;  %v752_v63 = vor.u32 %v751_v59, %v750_v58  ;;  %v8433_v5 = vsel %vm786_vm4, %v788_v39, %v790_v61  ;;  %v6573_v15 = vor.u32 %v7804_v9, %v6570_v10  ;;  %v625_v17 = vrot.slane %v8439_v8, 1  ;;  %v6530_v42 = vld [vmem:[%s11317_s1 + $0x1f4] sm:$0xf0]  ;;  %v7811_v58 = vld [vmem:[%s11317_s1 + $0x268] sm:$0xf0] }
  0x21   : > { %v597_v16 = vsel %vm590_vm0, %v594_v41, %v596_v6  ;;  %v572_v18 = vshrl.u32 %v8452_v14, 16  ;;  %v568_v19 = vshll.u32 %v8452_v14, 16  ;;  %v563_v20 = vsel %vm535_vm1, %v558_v11, %v562_v13  ;;  %v7794_v41 = vld [vmem:[%s11317_s1 + $0x1e4] sm:$0xf] }
  0x22   : > { %v753_v7 = vsel %vm742_vm3, %v748_v38, %v752_v63  ;;  %1616 = vmatpush.bf16.msrb.mxu2 %v6573_v15  ;;  %v726_v21 = vrot.slane %v8452_v14, 2  ;;  %v626_v22 = vsel %vm590_vm0, %v623_v52, %v625_v17  ;;  %v701_v28 = vrot.slane %v8439_v8, 2  ;;  %v7789_v52 = vld [vmem:[%s11317_s1 + $0x1bc] sm:$0xf]  ;;  %v7806_v9 = vld [vmem:[%s11317_s1 + $0x240] sm:$0xf0] }
  0x23   : > { %602 = vrot.lane.b32.xlu0 %v593_v40, %s8236_s22  ;;  %v754_v23 = vrot.slane %v572_v18, 2  ;;  %v755_v24 = vrot.slane %v568_v19, 3  ;;  %v6553_v29 = vor.u32 %v7799_v26, %v6550_v27  ;;  %v792_v30 = vrot.slane %v8452_v14, 3  ;;  %v7784_v15 = vld [vmem:[%s11317_s1 + $0x194] sm:$0xf] }
  0x24   : > { %v727_v31 = vsel %vm695_vm2, %v724_v56, %v726_v21  ;;  %v8107_v33 = vunpack.c.h.b16 %v8452_v14  ;;  %v8110_v34 = vunpack.c.l.b16 %v8469_v25  ;;  %v702_v35 = vsel %vm695_vm2, %v699_v60, %v701_v28  ;;  %v6410_v26 = vld [vmem:[%s11317_s1 + $0x104] sm:$0xf0] }
  0x25   : > { %v8483_v32 = vor.u32 %v755_v24, %v754_v23  ;;  %v8494_v36 = vsel %vm786_vm4, %v790_v61, %v792_v30  ;;  %v598_v37 = vrot.slane %v8452_v14, 1  ;;  %v8499_v39 = vrot.slane %v568_v19, 1  ;;  %v6428_v61 = vld [vmem:[%s11317_s1 + $0x118] sm:$0xf]  ;;  %v6408_v19 = vld [vmem:[%s11317_s1 + $0xf0] sm:$0xf] }
  0x26   : > { %604 = vrot.lane.b32.xlu1 %v595_v51, %s8236_s22  ;;  %1617 = vmatpush.bf16.msrb.mxu2 %v6553_v29  ;;  %v8501_v40 = vpack.c.b16 %v8110_v34, %v8107_v33  ;;  %v759_v45 = vshrl.u32 %v8469_v25, 16  ;;  %v762_v46 = vshll.u32 %v8469_v25, 16  ;;  %v566_v47 = vor.u32 %v564_v53, %v562_v13  ;;  %v7766_v23 = vld [vmem:[%s11317_s1 + $0x100] sm:$0xf0]  ;;  %v7764_v24 = vld [vmem:[%s11317_s1 + $0xf4] sm:$0xf] }
  0x27   : > { %v757_v38 = vsel %vm742_vm3, %v752_v63, %v8483_v32  ;;  %v728_v48 = vrot.slane %v8469_v25, 2  ;;  %v6533_v51 = vor.u32 %v7794_v41, %v6530_v42  ;;  %v6513_v59 = vor.u32 %v7789_v52, %v6510_v54  ;;  %v7769_v63 = vld [vmem:[%s11317_s1 + $0x11c] sm:$0xf]  ;;  %v6548_v33 = vld [vmem:[%s11317_s1 + $0x208] sm:$0xf] }
  0x28   : > { %633 = vrot.lane.b32.xlu2 %v624_v57, %s11331_s15  ;;  %v627_v50 = vrot.slane %v8501_v40, 1  ;;  %v761_v53 = vrot.slane %v759_v45, 2  ;;  %v764_v56 = vrot.slane %v762_v46, 3  ;;  %v6588_v57 = vld [vmem:[%s11317_s1 + $0x258] sm:$0xf]  ;;  %v571_v10 = vsel %vm535_vm1, %v566_v47, %v8499_v39 }
  0x29   : > { %v6589_v60 = vor.u32 %v7811_v58, %v6588_v57  ;;  %v703_v27 = vrot.slane %v8501_v40, 2  ;;  %v7759_v41 = vld [vmem:[%s11317_s1 + $0xcc] sm:$0xf]  ;;  %v506_v42 = vld [vmem:[%s8330_s25 + $0x30] sm:$0x7]  ;;  %v794_v45 = vrot.slane %v8469_v25, 3 }
  0x2a   : > { %1618 = vmatpush.bf16.msrb.mxu2 %v6533_v51  ;;  %v6390_v47 = vld [vmem:[%s11317_s1 + $0xdc] sm:$0xf0]  ;;  %v729_v51 = vsel %vm695_vm2, %v726_v21, %v728_v48  ;;  %v8609_v54 = vor.u32 %v764_v56, %v761_v53  ;;  %v7796_v58 = vld [vmem:[%s11317_s1 + $0x1f0] sm:$0xf0]  ;;  %v7754_v56 = vld [vmem:[%s11317_s1 + $0xa4] sm:$0xf] }
  0x2b   : > { %582 = vrot.lane.b32.xlu0 %v555_v55, %s8235_s16  ;;  %v599_v55 = vsel %vm590_vm0, %v596_v6, %v598_v37  ;;  %v6430_v6 = vld [vmem:[%s11317_s1 + $0x12c] sm:$0xf0]  ;;  %1513 = vmatpush.bf16.msra.mxu1 %v6589_v60  ;;  %v6528_v57 = vld [vmem:[%s11317_s1 + $0x1e0] sm:$0xf]  ;;  %v7756_v53 = vld [vmem:[%s11317_s1 + $0xb0] sm:$0xf0]  ;;  %v704_v60 = vsel %vm695_vm2, %v701_v28, %v703_v27  ;;  %v8648_v28 = vsel %vm786_vm4, %v792_v30, %v794_v45 }
  0x2c   : > { %6647 = vmatmul.msk.bf16.gmra.mxu2 %vm798_vm5, %v8433_v5  ;;  %v6433_v11 = vor.u32 %v7769_v63, %v6430_v6  ;;  %v6368_v21 = vld [vmem:[%s11317_s1 + $0xa0] sm:$0xf]  ;;  %v6370_v63 = vld [vmem:[%s11317_s1 + $0xb4] sm:$0xf0]  ;;  %vm2573_vm12 = vcmask 1041408  }
  0x2d   : > { %v6470_v6 = vld [vmem:[%s11317_s1 + $0x17c] sm:$0xf0]  ;;  %v6373_v30 = vor.u32 %v7754_v56, %v6370_v63  ;;  %v7774_v63 = vld [vmem:[%s11317_s1 + $0x144] sm:$0xf] }
  0x2e   : > { %734 = vrot.lane.b32.xlu1 %v725_v62, %s8236_s22  ;;  %v7771_v62 = vld [vmem:[%s11317_s1 + $0x128] sm:$0xf0]  ;;  %1619 = vmatpush.bf16.msrb.mxu2 %v6513_v59  ;;  %v6393_v59 = vor.u32 %v7759_v41, %v6390_v47 }
  0x2f   : > { %1581 = vmatpush.bf16.msra.mxu3 %v6433_v11  ;;  %v766_v11 = vsel %vm742_vm3, %v8483_v32, %v8609_v54  ;;  %v7751_v32 = vld [vmem:[%s11317_s1 + $0x88] sm:$0xf0] }
  0x30   : > { %778 = vrot.lane.b32.xlu2 %v753_v7, %s11331_s15  ;;  %v6568_v7 = vld [vmem:[%s11317_s1 + $0x230] sm:$0xf] }
  0x31   : > { %v6569_v13 = vor.u32 %v7806_v9, %v6568_v7  ;;  %v6529_v9 = vor.u32 %v7796_v58, %v6528_v57 }
  0x33   : > { %709 = vrot.lane.b32.xlu0 %v700_v4, %s8235_s16  ;;  %v6429_v4 = vor.u32 %v7771_v62, %v6428_v61  ;;  %1514 = vmatpush.bf16.msra.mxu1 %v6569_v13  ;;  %v8111_v61 = vunpack.c.h.b16 %v8469_v25  ;;  %v718_v62 = vunpack.c.l.b16 %v506_v42  ;;  %v6369_v13 = vor.u32 %v7756_v53, %v6368_v21  ;;  %v7786_v25 = vld [vmem:[%s11317_s1 + $0x1a0] sm:$0xf0]  ;;  %v6330_v53 = vld [vmem:[%s11317_s1 + $0x64] sm:$0xf0] }
  0x35   : > { %1479 = vmatpush.bf16.msra.mxu0 %v6429_v4  ;;  %v7779_v4 = vld [vmem:[%s11317_s1 + $0x16c] sm:$0xf] }
  0x36   : > { %606 = vrot.lane.b32.xlu1 %v597_v16, %s8236_s22  ;;  %v6490_v16 = vld [vmem:[%s11317_s1 + $0x1a4] sm:$0xf0] }
  0x37   : > { %v6493_v29 = vor.u32 %v7784_v15, %v6490_v16  ;;  %v6508_v15 = vld [vmem:[%s11317_s1 + $0x1b8] sm:$0xf]  ;;  %v7791_v16 = vld [vmem:[%s11317_s1 + $0x1c8] sm:$0xf0] }
  0x38   : > { %635 = vrot.lane.b32.xlu2 %v626_v22, %s11331_s15  ;;  %v628_v22 = vsel %vm590_vm0, %v625_v17, %v627_v50  ;;  %v6409_v17 = vor.u32 %v7766_v23, %v6408_v19  ;;  %v6348_v19 = vld [vmem:[%s11317_s1 + $0x78] sm:$0xf]  ;;  %v7749_v23 = vld [vmem:[%s11317_s1 + $0x7c] sm:$0xf] }
  0x39   : > { %1620 = vmatpush.bf16.msrb.mxu2 %v6493_v29 }
  0x3a   : > { %1480 = vmatpush.bf16.msra.mxu0 %v6409_v17 }
  0x3b   : > { %584 = vrot.lane.b32.xlu0 %v563_v20, %s8235_s16  ;;  %v8564_v20 = vpack.c.b16 %v8110_v34, %v8110_v34  ;;  %v7801_v34 = vld [vmem:[%s11317_s1 + $0x218] sm:$0xf0] }
  0x3c   : > { %6648 = vmatmul.msk.bf16.gmra.mxu2 %vm798_vm5, %v8494_v36  ;;  %v6549_v46 = vor.u32 %v7801_v34, %v6548_v33 }
  0x3d   : > { %v576_v52 = vshll.u32 %v8564_v20, 16  ;;  %v600_v7 = vrot.slane %v8564_v20, 1  ;;  %v8666_v20 = vpack.c.b16 %v8111_v61, %v8111_v61  ;;  %v7781_v61 = vld [vmem:[%s11317_s1 + $0x178] sm:$0xf0] }
  0x3e   : > { %736 = vrot.lane.b32.xlu1 %v727_v31, %s8236_s22  ;;  %v6413_v31 = vor.u32 %v7764_v24, %v6410_v26  ;;  %1515 = vmatpush.bf16.msra.mxu1 %v6549_v46  ;;  %v6350_v24 = vld [vmem:[%s11317_s1 + $0x8c] sm:$0xf0]  ;;  %v574_v26 = vor.u32 %v572_v18, %v8499_v39 }
  0x3f   : > { %v578_v29 = vrot.slane %v576_v52, 1  ;;  %v601_v17 = vsel %vm590_vm0, %v598_v37, %v600_v7  ;;  %v629_v33 = vrot.slane %v8666_v20, 1  ;;  %v6353_v41 = vor.u32 %v7749_v23, %v6350_v24  ;;  %v7734_v23 = vld [vmem:[%s11317_s1 + $0x4] sm:$0xf] }
  0x40   : > { %780 = vrot.lane.b32.xlu2 %v757_v38, %s11331_s15  ;;  %v7761_v38 = vld [vmem:[%s11317_s1 + $0xd8] sm:$0xf0]  ;;  %1582 = vmatpush.bf16.msra.mxu3 %v6413_v31  ;;  %v6509_v31 = vor.u32 %v7791_v16, %v6508_v15  ;;  %v705_v47 = vrot.slane %v8666_v20, 2  ;;  %v6448_v16 = vld [vmem:[%s11317_s1 + $0x140] sm:$0xf] }
  0x41   : > { %v579_v42 = vsel %vm535_vm1, %v574_v26, %v578_v29  ;;  %v630_v37 = vsel %vm590_vm0, %v627_v50, %v629_v33  ;;  %v6290_v26 = vld [vmem:[%s11317_s1 + $0x14] sm:$0xf0]  ;;  %v7819_v33 = vld [vmem:[%s11317_s1 + $0x2ac] sm:$0xf] }
  0x42   : > { %1516 = vmatpush.bf16.msra.mxu1 %v6529_v9  ;;  %v706_v50 = vsel %vm695_vm2, %v703_v27, %v705_v47  ;;  %v7741_v9 = vld [vmem:[%s11317_s1 + $0x38] sm:$0xf0]  ;;  %v6293_v29 = vor.u32 %v7734_v23, %v6290_v26 }
  0x43   : > { %711 = vrot.lane.b32.xlu0 %v702_v35, %s8235_s16  ;;  %v6388_v35 = vld [vmem:[%s11317_s1 + $0xc8] sm:$0xf] }
  0x44   : > { %1583 = vmatpush.bf16.msra.mxu3 %v6393_v59  ;;  %v7744_v59 = vld [vmem:[%s11317_s1 + $0x54] sm:$0xf] }
  0x45   : > { %v6333_v56 = vor.u32 %v7744_v59, %v6330_v53 }
  0x46   : > { %608 = vrot.lane.b32.xlu1 %v599_v55, %s8236_s22  ;;  %v6389_v55 = vor.u32 %v7761_v38, %v6388_v35  ;;  %v6349_v38 = vor.u32 %v7751_v32, %v6348_v19  ;;  %1517 = vmatpush.bf16.msra.mxu1 %v6509_v31  ;;  %v6288_v32 = vld [vmem:[%s11317_s1] sm:$0xf]  ;;  %v7812_v31 = vld [vmem:[%s11317_s1 + $0x270] sm:$0xf0] }
  0x48   : > { %637 = vrot.lane.b32.xlu2 %v628_v22, %s11379_s30  ;;  %1481 = vmatpush.bf16.msra.mxu0 %v6389_v55  ;;  %v720_v22 = vpack.c.b16 %v718_v62, %v718_v62 }
  0x49   : > { %1584 = vmatpush.bf16.msra.mxu3 %v6373_v30  ;;  %v7776_v30 = vld [vmem:[%s11317_s1 + $0x150] sm:$0xf0] }
  0x4a   : > { %v768_v34 = vshrl.u32 %v720_v22, 16  ;;  %v771_v35 = vshll.u32 %v720_v22, 16  ;;  %v730_v18 = vrot.slane %v720_v22, 2  ;;  %v6449_v19 = vor.u32 %v7776_v30, %v6448_v16  ;;  %v485_v16 = vld [vmem:[%s11329_s13 + $0x8] sm:$0xff] }
  0x4b   : > { %586 = vrot.lane.b32.xlu0 %v571_v10, %s8235_s16  ;;  %v6473_v10 = vor.u32 %v7779_v4, %v6470_v6  ;;  %v6450_v4 = vld [vmem:[%s11317_s1 + $0x154] sm:$0xf0]  ;;  %v6308_v6 = vld [vmem:[%s11317_s1 + $0x28] sm:$0xf] }
  0x4c   : > { %6649 = vmatmul.msk.bf16.gmra.mxu2 %vm798_vm5, %v8648_v28  ;;  %1482 = vmatpush.bf16.msra.mxu0 %v6369_v13  ;;  %v770_v39 = vrot.slane %v768_v34, 2  ;;  %v773_v46 = vrot.slane %v771_v35, 3  ;;  %v731_v52 = vsel %vm695_vm2, %v728_v48, %v730_v18  ;;  %v6488_v48 = vld [vmem:[%s11317_s1 + $0x190] sm:$0xf]  ;;  %v6453_v7 = vor.u32 %v7774_v63, %v6450_v4  ;;  %v6630_v35 = vld [vmem:[%s11317_s1 + $0x2bc] sm:$0xf0] }
  0x4d   : > { %1621 = vmatpush.bf16.msrb.mxu2 %v6473_v10  ;;  %1585 = vmatpush.bf16.msra.mxu3 %v6353_v41  ;;  %v6489_v27 = vor.u32 %v7786_v25, %v6488_v48  ;;  %v7739_v10 = vld [vmem:[%s11317_s1 + $0x2c] sm:$0xf]  ;;  %v6309_v13 = vor.u32 %v7741_v9, %v6308_v6  ;;  %v7822_v41 = vld [vmem:[%s11317_s1 + $0x2c0] sm:$0xf0]  ;;  %v651_v48 = vshrl.u32 %v8336_v1, 16  ;;  %v654_v25 = vshll.u32 %v8336_v1, 16 }
  0x4e   : > { %738 = vrot.lane.b32.xlu1 %v729_v51, %s8236_s22  ;;  %v796_v51 = vrot.slane %v720_v22, 3  ;;  %v774_v55 = vor.u32 %v773_v46, %v770_v39  ;;  %v7736_v22 = vld [vmem:[%s11317_s1 + $0x10] sm:$0xf0]  ;;  %v6556_v1 = vld [vmem:[%s11317_s1 + $0x210] sm:$0xf]  ;;  %v11333_v63 = vmov 0  }
  0x4f   : > { %1518 = vmatpush.bf16.msra.mxu1 %v6489_v27  ;;  %v6289_v24 = vor.u32 %v7736_v22, %v6288_v32  ;;  %v7772_v39 = vld [vmem:[%s11317_s1 + $0x130] sm:$0xf0]  ;;  %v6416_v27 = vld [vmem:[%s11317_s1 + $0xf8] sm:$0xf]  ;;  %8171 = vset.pattern.permute.xlu0 %v11333_v63 }
  0x50   : > { %782 = vrot.lane.b32.xlu2 %v766_v11, %s11379_s30  ;;  %1483 = vmatpush.bf16.msra.mxu0 %v6349_v38  ;;  %v8702_v57 = vsel %vm786_vm4, %v794_v45, %v796_v51  ;;  %v775_v58 = vsel %vm742_vm3, %v8609_v54, %v774_v55  ;;  %v6328_v45 = vld [vmem:[%s11317_s1 + $0x50] sm:$0xf]  ;;  %v7746_v54 = vld [vmem:[%s11317_s1 + $0x60] sm:$0xf0]  ;;  %v6310_v11 = vld [vmem:[%s11317_s1 + $0x3c] sm:$0xf0] }
  0x51   : > { %v6329_v21 = vor.u32 %v7746_v54, %v6328_v45  ;;  %1586 = vmatpush.bf16.msra.mxu3 %v6333_v56  ;;  %v6313_v15 = vor.u32 %v7739_v10, %v6310_v11  ;;  %1622 = vmatpush.bf16.msrb.mxu2 %v6453_v7  ;;  %v6636_v38 = vld [vmem:[%s11317_s1 + $0x2b0] sm:$0xf]  ;;  %v6576_v51 = vld [vmem:[%s11317_s1 + $0x238] sm:$0xf]  ;;  %v7767_v45 = vld [vmem:[%s11317_s1 + $0x108] sm:$0xf0] }
  0x52   : > { %v6637_v18 = vor.u32 %v7822_v41, %v6636_v38  ;;  %v6417_v59 = vor.u32 %v7767_v45, %v6416_v27  ;;  %v653_v56 = vrot.slane %v651_v48, 1  ;;  %8172 = vset.pattern.permute.xlu1 %v11333_v63  ;;  %8173 = vset.pattern.permute.xlu2 %v11333_v63  ;;  %v6376_v41 = vld [vmem:[%s11317_s1 + $0xa8] sm:$0xf]  ;;  %v6610_v48 = vld [vmem:[%s11317_s1 + $0x294] sm:$0xf0] }
  0x53   : > { %713 = vrot.lane.b32.xlu0 %v704_v60, %s8235_s16  ;;  %v6468_v60 = vld [vmem:[%s11317_s1 + $0x168] sm:$0xf]  ;;  %v7817_v27 = vld [vmem:[%s11317_s1 + $0x298] sm:$0xf0] }
  0x54   : > { %1484 = vmatpush.bf16.msra.mxu0 %v6329_v21  ;;  %v6469_v62 = vor.u32 %v7781_v61, %v6468_v60  ;;  %v656_v60 = vrot.slane %v654_v25, 2  ;;  %v7802_v61 = vld [vmem:[%s11317_s1 + $0x220] sm:$0xf0]  ;;  %v6616_v25 = vld [vmem:[%s11317_s1 + $0x288] sm:$0xf] }
  0x55   : > { %1587 = vmatpush.bf16.msra.mxu3 %v6313_v15  ;;  %1757 = vmatpush.bf16.msra.mxu2 %v6637_v18  ;;  %v6557_v4 = vor.u32 %v7802_v61, %v6556_v1  ;;  %v7762_v15 = vld [vmem:[%s11317_s1 + $0xe0] sm:$0xf0] }
  0x56   : > { %610 = vrot.lane.b32.xlu1 %v601_v17, %s8236_s22  ;;  %1519 = vmatpush.bf16.msra.mxu1 %v6469_v62  ;;  %v6596_v17 = vld [vmem:[%s11317_s1 + $0x260] sm:$0xf]  ;;  %v657_v7 = vor.u32 %v656_v60, %v653_v56 }
  0x57   : > { %v6597_v34 = vor.u32 %v7812_v31, %v6596_v17  ;;  %v6536_v17 = vld [vmem:[%s11317_s1 + $0x1e8] sm:$0xf]  ;;  %v7797_v31 = vld [vmem:[%s11317_s1 + $0x1f8] sm:$0xf0] }
  0x58   : > { %639 = vrot.lane.b32.xlu2 %v630_v37, %s11379_s30  ;;  %1485 = vmatpush.bf16.msra.mxu0 %v6309_v13  ;;  %v6436_v37 = vld [vmem:[%s11317_s1 + $0x120] sm:$0xf]  ;;  %v6396_v13 = vld [vmem:[%s11317_s1 + $0xd0] sm:$0xf] }
  0x59   : > { %1588 = vmatpush.bf16.msra.mxu3 %v6293_v29  ;;  %v6437_v46 = vor.u32 %v7772_v39, %v6436_v37  ;;  %v6397_v30 = vor.u32 %v7762_v15, %v6396_v13  ;;  %v7787_v13 = vld [vmem:[%s11317_s1 + $0x1a8] sm:$0xf0] }
  0x5a   : > { %1520 = vmatpush.bf16.msra.mxu1 %v6449_v19 }
  0x5b   : > { %588 = vrot.lane.b32.xlu0 %v579_v42, %s8235_s16  ;;  %v6633_v42 = vor.u32 %v7819_v33, %v6630_v35  ;;  %v660_v33 = vshrl.u32 %v8397_v44, 16  ;;  %v6537_v35 = vor.u32 %v7797_v31, %v6536_v17  ;;  %v486_v17 = vld [vmem:[%s11329_s13 + $0x10] sm:$0xff]  ;;  %v489_v31 = vld [vmem:[%s11329_s13 + $0x28] sm:$0xff] }
  0x5c   : > { %6650 = vmatmul.msk.bf16.gmra.mxu2 %vm798_vm5, %v8702_v57  ;;  %1486 = vmatpush.bf16.msra.mxu0 %v6289_v24 }
  0x5d   : > { %1717 = vmatpush.bf16.msrb.mxu3 %v6597_v34  ;;  %v663_v34 = vshll.u32 %v8397_v44, 16  ;;  %v662_v39 = vrot.slane %v660_v33, 1  ;;  %v6476_v33 = vld [vmem:[%s11317_s1 + $0x170] sm:$0xf] }
  0x5e   : > { %740 = vrot.lane.b32.xlu1 %v731_v52, %s8236_s22  ;;  %1683 = vmatpush.bf16.msrb.mxu1 %v6437_v46  ;;  %v7807_v52 = vld [vmem:[%s11317_s1 + $0x248] sm:$0xf0] }
  0x5f   : > { %v6577_v55 = vor.u32 %v7807_v52, %v6576_v51  ;;  %v665_v46 = vrot.slane %v663_v34, 2  ;;  %v6516_v51 = vld [vmem:[%s11317_s1 + $0x1c0] sm:$0xf]  ;;  %v7792_v52 = vld [vmem:[%s11317_s1 + $0x1d0] sm:$0xf0] }
  0x60   : > { %784 = vrot.lane.b32.xlu2 %v775_v58, %s11379_s30  ;;  %1655 = vmatpush.bf16.msrb.mxu0 %v6633_v42  ;;  %v646_v58 = vshll.u32 %v8333_v0, 16  ;;  %v7757_v42 = vld [vmem:[%s11317_s1 + $0xb8] sm:$0xf0] }
  0x61   : > { %1718 = vmatpush.bf16.msrb.mxu3 %v6577_v55  ;;  %v6377_v37 = vor.u32 %v7757_v42, %v6376_v41  ;;  %v7814_v55 = vld [vmem:[%s11317_s1 + $0x284] sm:$0xf] }
  0x62   : > { %v648_v53 = vrot.slane %v646_v58, 2  ;;  %1684 = vmatpush.bf16.msrb.mxu1 %v6417_v59  ;;  %v6517_v58 = vor.u32 %v7792_v52, %v6516_v51  ;;  %v6617_v59 = vor.u32 %v7817_v27, %v6616_v25  ;;  %v678_v51 = vshrl.u32 %v8501_v40, 16  ;;  %v6456_v25 = vld [vmem:[%s11317_s1 + $0x148] sm:$0xf]  ;;  %v7777_v27 = vld [vmem:[%s11317_s1 + $0x158] sm:$0xf0] }
  0x63   : > { %715 = vrot.lane.b32.xlu0 %v706_v50, %s8235_s16  ;;  %v643_v50 = vshrl.u32 %v8333_v0, 16  ;;  %v484_v0 = vld [vmem:[%s11329_s13] sm:$0xff]  ;;  %v681_v52 = vshll.u32 %v8501_v40, 16 }
  0x64   : > { %1758 = vmatpush.bf16.msra.mxu2 %v6617_v59  ;;  %v6296_v59 = vld [vmem:[%s11317_s1 + $0x8] sm:$0xf] }
  0x65   : > { %v645_v21 = vrot.slane %v643_v50, 1  ;;  %1719 = vmatpush.bf16.msrb.mxu3 %v6557_v4 }
  0x66   : > { %2046 = vperm.xlu1 %8172, %v485_v16   ;;  %1685 = vmatpush.bf16.msrb.mxu1 %v6397_v30 }
  0x67   : > { %v649_v6 = vor.u32 %v648_v53, %v645_v21  ;;  %v6356_v21 = vld [vmem:[%s11317_s1 + $0x80] sm:$0xf]  ;;  %v7752_v53 = vld [vmem:[%s11317_s1 + $0x90] sm:$0xf0] }
  0x68   : > { %2051 = vperm.xlu2 %8173, %v486_v17  }
  0x69   : > { %v658_v11 = vsel %vm641_vm6, %v649_v6, %v657_v7  ;;  %1720 = vmatpush.bf16.msrb.mxu3 %v6537_v35  ;;  %v7782_v35 = vld [vmem:[%s11317_s1 + $0x180] sm:$0xf0] }
  0x6a   : > { %1686 = vmatpush.bf16.msrb.mxu1 %v6377_v37  ;;  %v6477_v41 = vor.u32 %v7782_v35, %v6476_v33  ;;  %v492_v35 = vld [vmem:[%s11329_s13 + $0x40] sm:$0xff] }
  0x6b   : > { %2041 = vperm.xlu0 %8171, %v484_v0   ;;  %v6357_v0 = vor.u32 %v7752_v53, %v6356_v21  ;;  %v488_v21 = vld [vmem:[%s11329_s13 + $0x20] sm:$0xff]  ;;  %v680_v53 = vrot.slane %v678_v51, 1 }
  0x6d   : > { %1721 = vmatpush.bf16.msrb.mxu3 %v6517_v58  ;;  %v7742_v58 = vld [vmem:[%s11317_s1 + $0x40] sm:$0xf0] }
  0x6e   : > { %1687 = vmatpush.bf16.msrb.mxu1 %v6357_v0 }
  0x70   : > { %2061 = vperm.xlu2 %8173, %v488_v21  }
  0x72   : > { %v733_v47 = vpop.permute.xlu2 %732 }
  0x73   : > { %2066 = vperm.xlu0 %8171, %v489_v31  }
  0x7a   : > { %v777_v54 = vpop.permute.xlu2 %776 }
  0x7b   : > { %2081 = vperm.xlu0 %8171, %v492_v35   ;;  %v6538_v35 = vld [vmem:[%s11317_s1 + $0x1fc] sm:$0xf0] }
  0x82   : > { %v8822_v10 = vpop.permute.xlu2 %633 }
  0x88   : > { %v632_v62 = vpop.permute.xlu1 %631 }
  0x8a   : > { %v779_v38 = vpop.permute.xlu2 %778 }
  0x8d   : > { %v581_v9 = vpop.permute.xlu0 %580 }
  0x8e   : > { %v800_v23 = vsel %vm798_vm5, %v8339_v2, %v581_v9  ;;  %v672_v9 = vshll.u32 %v8439_v8, 16 }
  0x90   : > { %v708_v19 = vpop.permute.xlu1 %707  ;;  %v674_v30 = vrot.slane %v672_v9, 2 }
  0x91   : > { %v838_v32 = vsel %vm798_vm5, %v658_v11, %v708_v19 }
  0x92   : > { %v852_v22 = vsel %vm809_vm7, %v838_v32, %v733_v47  ;;  %v666_v47 = vor.u32 %v665_v46, %v662_v39  ;;  %v636_v60 = vpop.permute.xlu2 %635 }
  0x93   : > { %v8839_v24 = vsel %vm820_vm8, %v852_v22, %v777_v54  ;;  %v6613_v54 = vor.u32 %v7814_v55, %v6610_v48  ;;  %v6336_v22 = vld [vmem:[%s11317_s1 + $0x58] sm:$0xf]  ;;  %v490_v48 = vld [vmem:[%s11329_s13 + $0x30] sm:$0xff] }
  0x94   : > { %1521 = vmatmul.bf16.vlgmr.msra.gmra.mxu1 %v8839_v24  ;;  %1623 = vmatmul.bf16.vlgmr.msrb.gmra.mxu2 %v8839_v24  ;;  %v667_v56 = vsel %vm641_vm6, %v657_v7, %v666_v47  ;;  %v669_v7 = vshrl.u32 %v8439_v8, 16 }
  0x95   : > { %v603_v26 = vpop.permute.xlu0 %602  ;;  %1656 = vmatpush.bf16.msrb.mxu0 %v6613_v54  ;;  %v6457_v54 = vor.u32 %v7777_v27, %v6456_v25  ;;  %v7805_v27 = vld [vmem:[%s11317_s1 + $0x23c] sm:$0xf] }
  0x96   : > { %v811_v29 = vsel %vm809_vm7, %v800_v23, %v603_v26  ;;  %v671_v16 = vrot.slane %v669_v7, 1  ;;  %v7747_v23 = vld [vmem:[%s11317_s1 + $0x68] sm:$0xf0] }
  0x97   : > { %v8851_v2 = vsel %vm820_vm8, %v811_v29, %v632_v62  ;;  %v6337_v29 = vor.u32 %v7747_v23, %v6336_v22  ;;  %v6638_v22 = vld [vmem:[%s11317_s1 + $0x2c4] sm:$0xf0]  ;;  %v7770_v23 = vld [vmem:[%s11317_s1 + $0x124] sm:$0xf] }
  0x98   : > { %1487 = vmatmul.bf16.vlgmr.msra.gmra.mxu0 %v8851_v2  ;;  %1589 = vmatmul.bf16.vlgmr.msra.gmra.mxu3 %v8851_v2  ;;  %v605_v18 = vpop.permute.xlu1 %604  ;;  %v675_v26 = vor.u32 %v674_v30, %v671_v16 }
  0x99   : > { %1688 = vmatpush.bf16.msrb.mxu1 %v6337_v29  ;;  %v6444_v29 = vld [vmem:[%s11317_s1 + $0x128] sm:$0xf] }
  0x9a   : > { %v781_v32 = vpop.permute.xlu2 %780  ;;  %v676_v42 = vsel %vm641_vm6, %v666_v47, %v675_v26 }
  0x9d   : > { %v583_v44 = vpop.permute.xlu0 %582 }
  0x9e   : > { %v802_v50 = vsel %vm798_vm5, %v8342_v3, %v583_v44  ;;  %v487_v3 = vld [vmem:[%s11329_s13 + $0x18] sm:$0xff] }
  0x9f   : > { %2056 = vperm.xlu1 %8172, %v487_v3   ;;  %v813_v1 = vsel %vm809_vm7, %v802_v50, %v605_v18  ;;  %v8949_v47 = vpop.f32.mrf.mxu2  ;;  %v6316_v50 = vld [vmem:[%s11317_s1 + $0x30] sm:$0xf]  ;;  %v7737_v3 = vld [vmem:[%s11317_s1 + $0x18] sm:$0xf0] }
  0xa0   : > { %v735_v45 = vpop.permute.xlu1 %734  ;;  %v8897_v4 = vsel %vm820_vm8, %v813_v1, %v8822_v10  ;;  %v6496_v10 = vld [vmem:[%s11317_s1 + $0x198] sm:$0xf]  ;;  %v6317_v40 = vor.u32 %v7742_v58, %v6316_v50  ;;  %v6424_v50 = vld [vmem:[%s11317_s1 + $0x100] sm:$0xf]  ;;  %v7768_v58 = vld [vmem:[%s11317_s1 + $0x110] sm:$0xf0] }
  0xa1   : > { %v6497_v15 = vor.u32 %v7787_v13, %v6496_v10  ;;  %v6425_v25 = vor.u32 %v7768_v58, %v6424_v50  ;;  %v7753_v50 = vld [vmem:[%s11317_s1 + $0x98] sm:$0xf0] }
  0xa2   : > { %v638_v44 = vpop.permute.xlu2 %637  ;;  %1689 = vmatpush.bf16.msrb.mxu1 %v6317_v40 }
  0xa3   : > { %1722 = vmatpush.bf16.msrb.mxu3 %v6497_v15  ;;  %v687_v15 = vshrl.u32 %v8666_v20, 16 }
  0xa5   : > { %v710_v61 = vpop.permute.xlu0 %709  ;;  %v689_v31 = vrot.slane %v687_v15, 1  ;;  %v6404_v15 = vld [vmem:[%s11317_s1 + $0xd8] sm:$0xf] }
  0xa6   : > { %v841_v62 = vsel %vm798_vm5, %v667_v56, %v710_v61  ;;  %v683_v56 = vrot.slane %v681_v52, 2  ;;  %v6418_v52 = vld [vmem:[%s11317_s1 + $0x10c] sm:$0xf0] }
  0xa7   : > { %v854_v6 = vsel %vm809_vm7, %v841_v62, %v735_v45  ;;  %1723 = vmatpush.bf16.msrb.mxu3 %v6477_v41  ;;  %2071 = vperm.xlu1 %8172, %v490_v48   ;;  %v8979_v7 = vpop.f32.mrf.mxu2 }
  0xa8   : > { %v8903_v11 = vsel %vm820_vm8, %v854_v6, %v779_v38  ;;  %1492 = vmatmul.bf16.gmra.mxu0 %v8897_v4  ;;  %1594 = vmatmul.bf16.gmra.mxu3 %v8897_v4  ;;  %v607_v8 = vpop.permute.xlu1 %606  ;;  %v684_v1 = vor.u32 %v683_v56, %v680_v53 }
  0xa9   : > { %1526 = vmatmul.bf16.gmra.mxu1 %v8903_v11  ;;  %1628 = vmatmul.bf16.gmra.mxu2 %v8903_v11 }
  0xaa   : > { %v783_v62 = vpop.permute.xlu2 %782  ;;  %v685_v9 = vsel %vm641_vm6, %v675_v26, %v684_v1  ;;  %v6438_v26 = vld [vmem:[%s11317_s1 + $0x134] sm:$0xf0] }
  0xab   : > { %1724 = vmatpush.bf16.msrb.mxu3 %v6457_v54  ;;  %v6441_v33 = vor.u32 %v7770_v23, %v6438_v26  ;;  %v7755_v26 = vld [vmem:[%s11317_s1 + $0xac] sm:$0xf] }
  0xad   : > { %v585_v19 = vpop.permute.xlu0 %584  ;;  %1785 = vmatpush.bf16.msra.mxu0 %v6441_v33  ;;  %v7758_v33 = vld [vmem:[%s11317_s1 + $0xc0] sm:$0xf0] }
  0xae   : > { %v804_v34 = vsel %vm798_vm5, %v8353_v12, %v585_v19 }
  0xaf   : > { %v815_v18 = vsel %vm809_vm7, %v804_v34, %v607_v8  ;;  %v7773_v34 = vld [vmem:[%s11317_s1 + $0x138] sm:$0xf0] }
  0xb0   : > { %v737_v38 = vpop.permute.xlu1 %736  ;;  %v8939_v46 = vsel %vm820_vm8, %v815_v18, %v636_v60  ;;  %v6297_v60 = vor.u32 %v7737_v3, %v6296_v59  ;;  %v6445_v18 = vor.u32 %v7773_v34, %v6444_v29  ;;  %v6378_v29 = vld [vmem:[%s11317_s1 + $0xbc] sm:$0xf0]  ;;  %v7795_v34 = vld [vmem:[%s11317_s1 + $0x1ec] sm:$0xf] }
  0xb2   : > { %1690 = vmatpush.bf16.msrb.mxu1 %v6297_v60  ;;  %v640_v41 = vpop.permute.xlu2 %639  ;;  %1887 = vmatpush.bf16.msrb.mxu2 %v6445_v18  ;;  %v7815_v18 = vld [vmem:[%s11317_s1 + $0x28c] sm:$0xf] }
  0xb5   : > { %v712_v37 = vpop.permute.xlu0 %711 }
  0xb6   : > { %v844_v39 = vsel %vm798_vm5, %v676_v42, %v712_v37  ;;  %v6598_v37 = vld [vmem:[%s11317_s1 + $0x274] sm:$0xf0]  ;;  %1888 = vmatpush.bf16.msrb.mxu2 %v6425_v25 }
  0xb7   : > { %v856_v12 = vsel %vm809_vm7, %v844_v39, %v737_v38  ;;  %v7810_v38 = vld [vmem:[%s11317_s1 + $0x264] sm:$0xf]  ;;  %v493_v39 = vld [vmem:[%s11329_s13 + $0x48] sm:$0xff]  ;;  %v6518_v25 = vld [vmem:[%s11317_s1 + $0x1d4] sm:$0xf0] }
  0xb8   : > { %v8945_v55 = vsel %vm820_vm8, %v856_v12, %v781_v32  ;;  %1497 = vmatmul.bf16.gmra.mxu0 %v8939_v46  ;;  %1599 = vmatmul.bf16.gmra.mxu3 %v8939_v46  ;;  %v609_v45 = vpop.permute.xlu1 %608  ;;  %v7820_v32 = vld [vmem:[%s11317_s1 + $0x2b4] sm:$0xf]  ;;  %v7765_v12 = vld [vmem:[%s11317_s1 + $0xfc] sm:$0xf]  ;;  %v6601_v51 = vor.u32 %v7810_v38, %v6598_v37  ;;  %v6618_v37 = vld [vmem:[%s11317_s1 + $0x29c] sm:$0xf0] }
  0xb9   : > { %1531 = vmatmul.bf16.gmra.mxu1 %v8945_v55  ;;  %1633 = vmatmul.bf16.gmra.mxu2 %v8945_v55  ;;  %v6421_v48 = vor.u32 %v7765_v12, %v6418_v52  ;;  %v6621_v12 = vor.u32 %v7815_v18, %v6618_v37  ;;  %v6364_v52 = vld [vmem:[%s11317_s1 + $0x88] sm:$0xf] }
  0xba   : > { %2086 = vperm.xlu1 %8172, %v493_v39   ;;  %1819 = vmatpush.bf16.msra.mxu1 %v6601_v51  ;;  %v7750_v39 = vld [vmem:[%s11317_s1 + $0x84] sm:$0xf]  ;;  %v6358_v51 = vld [vmem:[%s11317_s1 + $0x94] sm:$0xf0] }
  0xbb   : > { %1786 = vmatpush.bf16.msra.mxu0 %v6421_v48  ;;  %v6361_v58 = vor.u32 %v7750_v39, %v6358_v51  ;;  %v7790_v48 = vld [vmem:[%s11317_s1 + $0x1c4] sm:$0xf]  ;;  %v6458_v39 = vld [vmem:[%s11317_s1 + $0x15c] sm:$0xf0] }
  0xbd   : > { %v587_v0 = vpop.permute.xlu0 %586 }
  0xbe   : > { %v806_v61 = vsel %vm798_vm5, %v8408_v49, %v587_v0  ;;  %v690_v49 = vshll.u32 %v8666_v20, 16  ;;  %v6641_v20 = vor.u32 %v7820_v32, %v6638_v22  ;;  %v785_v0 = vpop.permute.xlu2 %784  ;;  %v6558_v22 = vld [vmem:[%s11317_s1 + $0x224] sm:$0xf0] }
  0xbf   : > { %v817_v10 = vsel %vm809_vm7, %v806_v61, %v609_v45  ;;  %v6578_v45 = vld [vmem:[%s11317_s1 + $0x24c] sm:$0xf0] }
  0xc0   : > { %v739_v6 = vpop.permute.xlu1 %738  ;;  %v8986_v16 = vsel %vm820_vm8, %v817_v10, %v638_v44  ;;  %v692_v42 = vrot.slane %v690_v49, 2  ;;  %1859 = vmatpush.bf16.msra.mxu3 %v6641_v20  ;;  %v9030_v44 = vpop.f32.mrf.mxu2  ;;  %v6581_v54 = vor.u32 %v7805_v27, %v6578_v45  ;;  %v7760_v10 = vld [vmem:[%s11317_s1 + $0xd4] sm:$0xf]  ;;  %v6521_v45 = vor.u32 %v7790_v48, %v6518_v25 }
  0xc1   : > { %v7800_v49 = vld [vmem:[%s11317_s1 + $0x214] sm:$0xf] }
  0xc2   : > { %v693_v59 = vor.u32 %v692_v42, %v689_v31  ;;  %1820 = vmatpush.bf16.msra.mxu1 %v6581_v54  ;;  %v6561_v20 = vor.u32 %v7800_v49, %v6558_v22  ;;  %v6381_v31 = vor.u32 %v7755_v26, %v6378_v29  ;;  %v6541_v42 = vor.u32 %v7795_v34, %v6538_v35  ;;  %v7745_v54 = vld [vmem:[%s11317_s1 + $0x5c] sm:$0xf]  ;;  %v7780_v49 = vld [vmem:[%s11317_s1 + $0x174] sm:$0xf]  ;;  %v9195_v26 = vld [vmem:[%s11318_s2] sm:$0x1f] }
  0xc3   : > { %v6304_v35 = vld [vmem:[%s11317_s1 + $0x10] sm:$0xf] }
  0xc4   : > { %v694_v21 = vsel %vm641_vm6, %v684_v1, %v693_v59  ;;  %v491_v1 = vld [vmem:[%s11329_s13 + $0x38] sm:$0xff]  ;;  %1860 = vmatpush.bf16.msra.mxu3 %v6621_v12  ;;  %v6338_v59 = vld [vmem:[%s11317_s1 + $0x6c] sm:$0xf0] }
  0xc5   : > { %v714_v13 = vpop.permute.xlu0 %713  ;;  %2076 = vperm.xlu2 %8173, %v491_v1  }
  0xc6   : > { %v847_v8 = vsel %vm798_vm5, %v685_v9, %v714_v13  ;;  %v6398_v13 = vld [vmem:[%s11317_s1 + $0xe4] sm:$0xf0]  ;;  %1821 = vmatpush.bf16.msra.mxu1 %v6561_v20 }
  0xc7   : > { %v858_v30 = vsel %vm809_vm7, %v847_v8, %v739_v6  ;;  %v6401_v8 = vor.u32 %v7760_v10, %v6398_v13  ;;  %v7740_v10 = vld [vmem:[%s11317_s1 + $0x34] sm:$0xf]  ;;  %v6318_v13 = vld [vmem:[%s11317_s1 + $0x44] sm:$0xf0] }
  0xc8   : > { %v8991_v19 = vsel %vm820_vm8, %v858_v30, %v783_v62  ;;  %1502 = vmatmul.bf16.gmra.mxu0 %v8986_v16  ;;  %1604 = vmatmul.bf16.gmra.mxu3 %v8986_v16  ;;  %v611_v17 = vpop.permute.xlu1 %610  ;;  %v9052_v62 = vpop.f32.mrf.mxu2  ;;  %v7763_v30 = vld [vmem:[%s11317_s1 + $0xe8] sm:$0xf0] }
  0xc9   : > { %1536 = vmatmul.bf16.gmra.mxu1 %v8991_v19  ;;  %1638 = vmatmul.bf16.gmra.mxu2 %v8991_v19  ;;  %v6405_v32 = vor.u32 %v7763_v30, %v6404_v15  ;;  %v6321_v15 = vor.u32 %v7740_v10, %v6318_v13  ;;  %v7743_v30 = vld [vmem:[%s11317_s1 + $0x48] sm:$0xf0] }
  0xca   : > { %1787 = vmatpush.bf16.msra.mxu0 %v6401_v8  ;;  %1822 = vmatpush.bf16.msra.mxu1 %v6541_v42  ;;  %v6324_v8 = vld [vmem:[%s11317_s1 + $0x38] sm:$0xf]  ;;  %v7775_v42 = vld [vmem:[%s11317_s1 + $0x14c] sm:$0xf] }
  0xcb   : > { %1889 = vmatpush.bf16.msrb.mxu2 %v6405_v32  ;;  %v6478_v32 = vld [vmem:[%s11317_s1 + $0x184] sm:$0xf0]  ;;  %v6325_v22 = vor.u32 %v7743_v30, %v6324_v8  ;;  %v6461_v51 = vor.u32 %v7775_v42, %v6458_v39 }
  0xcc   : > { %v6481_v20 = vor.u32 %v7780_v49, %v6478_v32  ;;  %v7830_v32 = vld [vmem:[#allocation2 + $0x30] sm:$0xff] }
  0xcd   : > { %v589_v40 = vpop.permute.xlu0 %588 }
  0xce   : > { %v808_v3 = vsel %vm798_vm5, %v8452_v14, %v589_v40  ;;  %1788 = vmatpush.bf16.msra.mxu0 %v6381_v31  ;;  %v6365_v40 = vor.u32 %v7753_v50, %v6364_v52  ;;  %1823 = vmatpush.bf16.msra.mxu1 %v6521_v45  ;;  %v7735_v31 = vld [vmem:[%s11317_s1 + $0xc] sm:$0xf]  ;;  %v7831_v45 = vld [vmem:[#allocation2 + $0x38] sm:$0xff] }
  0xcf   : > { %v819_v53 = vsel %vm809_vm7, %v808_v3, %v611_v17  ;;  %v6384_v17 = vld [vmem:[%s11317_s1 + $0xb0] sm:$0xf]  ;;  %v6344_v3 = vld [vmem:[%s11317_s1 + $0x60] sm:$0xf] }
  0xd0   : > { %v741_v56 = vpop.permute.xlu1 %740  ;;  %v9055_v6 = vsel %vm820_vm8, %v819_v53, %v640_v41  ;;  %v9086_v23 = vpop.f32.mrf.mxu2  ;;  %v6385_v41 = vor.u32 %v7758_v33, %v6384_v17  ;;  %v7748_v53 = vld [vmem:[%s11317_s1 + $0x70] sm:$0xf0]  ;;  %v9200_v17 = vperm.slane %v9195_v26, 0  ;;  %v6298_v33 = vld [vmem:[%s11317_s1 + $0x1c] sm:$0xf0] }
  0xd1   : > { %v6301_v34 = vor.u32 %v7735_v31, %v6298_v33  ;;  %v6584_v33 = vld [vmem:[%s11317_s1 + $0x240] sm:$0xf] }
  0xd2   : > { %1890 = vmatpush.bf16.msrb.mxu2 %v6385_v41  ;;  %1789 = vmatpush.bf16.msra.mxu0 %v6361_v58  ;;  %v7738_v41 = vld [vmem:[%s11317_s1 + $0x20] sm:$0xf0]  ;;  %v9227_v58 = vperm.slane %v9195_v26, 1 }
  0xd3   : > { %v6305_v37 = vor.u32 %v7738_v41, %v6304_v35  ;;  %v7838_v35 = vld [vmem:[#allocation2 + $0x70] sm:$0xff] }
  0xd5   : > { %v716_v60 = vpop.permute.xlu0 %715 }
  0xd6   : > { %v850_v61 = vsel %vm798_vm5, %v694_v21, %v716_v60  ;;  %1891 = vmatpush.bf16.msrb.mxu2 %v6365_v40  ;;  %v6341_v21 = vor.u32 %v7745_v54, %v6338_v59  ;;  %v6345_v60 = vor.u32 %v7748_v53, %v6344_v3  ;;  %v6604_v54 = vld [vmem:[%s11317_s1 + $0x268] sm:$0xf]  ;;  %v7813_v59 = vld [vmem:[%s11317_s1 + $0x278] sm:$0xf0] }
  0xd7   : > { %v860_v9 = vsel %vm809_vm7, %v850_v61, %v741_v56  ;;  %v6498_v61 = vld [vmem:[%s11317_s1 + $0x1ac] sm:$0xf0]  ;;  %v7839_v53 = vld [vmem:[#allocation2 + $0x78] sm:$0xff] }
  0xd8   : > { %v9059_v14 = vsel %vm820_vm8, %v860_v9, %v785_v0  ;;  %1507 = vmatmul.bf16.gmra.mxu0 %v9055_v6  ;;  %1609 = vmatmul.bf16.gmra.mxu3 %v9055_v6  ;;  %v9112_v38 = vpop.f32.mrf.mxu2  ;;  %v7785_v0 = vld [vmem:[%s11317_s1 + $0x19c] sm:$0xf] }
  0xd9   : > { %1541 = vmatmul.bf16.gmra.mxu1 %v9059_v14  ;;  %1643 = vmatmul.bf16.gmra.mxu2 %v9059_v14  ;;  %v6501_v9 = vor.u32 %v7785_v0, %v6498_v61  ;;  %v6644_v61 = vld [vmem:[%s11317_s1 + $0x2b8] sm:$0xf] }
  0xda   : > { %1790 = vmatpush.bf16.msra.mxu0 %v6341_v21  ;;  %1892 = vmatpush.bf16.msrb.mxu2 %v6345_v60  ;;  %v6605_v21 = vor.u32 %v7813_v59, %v6604_v54 }
  0xdb   : > { %1824 = vmatpush.bf16.msra.mxu1 %v6501_v9  ;;  %v7823_v9 = vld [vmem:[%s11317_s1 + $0x2c8] sm:$0xf0] }
  0xdc   : > { %v6645_v13 = vor.u32 %v7823_v9, %v6644_v61 }
  0xde   : > { %1791 = vmatpush.bf16.msra.mxu0 %v6321_v15  ;;  %1893 = vmatpush.bf16.msrb.mxu2 %v6325_v22 }
  0xdf   : > { %1825 = vmatpush.bf16.msra.mxu1 %v6481_v20 }
  0xe0   : > { %v9138_v27 = vpop.f32.mrf.mxu2 }
  0xe2   : > { %1792 = vmatpush.bf16.msra.mxu0 %v6301_v34  ;;  %1894 = vmatpush.bf16.msrb.mxu2 %v6305_v37  ;;  %v7808_v34 = vld [vmem:[%s11317_s1 + $0x250] sm:$0xf0] }
  0xe3   : > { %1826 = vmatpush.bf16.msra.mxu1 %v6461_v51  ;;  %v6585_v42 = vor.u32 %v7808_v34, %v6584_v33  ;;  %v7798_v33 = vld [vmem:[%s11317_s1 + $0x200] sm:$0xf0] }
  0xe8   : > { %6651 = vmatmul.msk.bf16.vlgmr.msrb.gmra.mxu0 %vm798_vm5, %v8393_v43  ;;  %1725 = vmatmul.bf16.vlgmr.msrb.gmra.mxu3 %v8839_v24  ;;  %v9158_v56 = vpop.f32.mrf.mxu2 }
  0xe9   : > { %1691 = vmatmul.bf16.vlgmr.msrb.gmra.mxu1 %v8851_v2  ;;  %6656 = vmatmul.msk.bf16.vlgmr.msra.gmra.mxu2 %vm798_vm5, %v8393_v43 }
  0xea   : > { %3883 = vmatpush.bf16.msrb.mxu3 %v7831_v45  ;;  %1921 = vmatpush.bf16.msrb.mxu0 %v6605_v21  ;;  %v6564_v21 = vld [vmem:[%s11317_s1 + $0x218] sm:$0xf] }
  0xeb   : > { %3917 = vmatpush.bf16.msra.mxu2 %v7839_v53  ;;  %1961 = vmatpush.bf16.msrb.mxu1 %v6645_v13  ;;  %v7803_v53 = vld [vmem:[%s11317_s1 + $0x228] sm:$0xf0] }
  0xec   : > { %v6565_v61 = vor.u32 %v7803_v53, %v6564_v21  ;;  %v7835_v53 = vld [vmem:[#allocation2 + $0x58] sm:$0xff] }
  0xee   : > { %3884 = vmatpush.bf16.msrb.mxu3 %v7830_v32  ;;  %1922 = vmatpush.bf16.msrb.mxu0 %v6585_v42  ;;  %v7836_v42 = vld [vmem:[#allocation2 + $0x60] sm:$0xff] }
  0xef   : > { %3918 = vmatpush.bf16.msra.mxu2 %v7838_v35 }
  0xf0   : > { %v9166_v1 = vpop.f32.mrf.mxu2 }
  0xf2   : > { %1923 = vmatpush.bf16.msrb.mxu0 %v6565_v61 }
  0xf8   : > { %6652 = vmatmul.msk.bf16.gmra.mxu0 %vm798_vm5, %v8433_v5  ;;  %1730 = vmatmul.bf16.gmra.mxu3 %v8903_v11  ;;  %v9197_v29 = vpop.f32.mrf.mxu2 }
  0xf9   : > { %1696 = vmatmul.bf16.gmra.mxu1 %v8897_v4  ;;  %6657 = vmatmul.msk.bf16.gmra.mxu2 %vm798_vm5, %v8433_v5 }
 0x108   : > { %6653 = vmatmul.msk.bf16.gmra.mxu0 %vm798_vm5, %v8494_v36  ;;  %1735 = vmatmul.bf16.gmra.mxu3 %v8945_v55 }
 0x109   : > { %1701 = vmatmul.bf16.gmra.mxu1 %v8939_v46  ;;  %6658 = vmatmul.msk.bf16.gmra.mxu2 %vm798_vm5, %v8494_v36 }
 0x111   : > { %v1522_v18 = vpop.f32.mrf.mxu1 }
 0x115   : > { %v1488_v12 = vpop.f32.mrf.mxu0 }
 0x116   : > { %v1489_v52 = vadd.f32 %v1488_v12, %v9200_v17 }
 0x117   : > { %v1624_v40 = vpop.f32.mrf.mxu2 }
 0x118   : > { %v9221_v50 = vadd.f32 %v1522_v18, %v1489_v52  ;;  %6654 = vmatmul.msk.bf16.gmra.mxu0 %vm798_vm5, %v8648_v28  ;;  %1740 = vmatmul.bf16.gmra.mxu3 %v8991_v19 }
 0x119   : > { %1706 = vmatmul.bf16.gmra.mxu1 %v8986_v16  ;;  %6659 = vmatmul.msk.bf16.gmra.mxu2 %vm798_vm5, %v8648_v28  ;;  %v1524_v60 = vpop.f32.mrf.mxu1 }
 0x11b   : > { %v1590_v48 = vpop.f32.mrf.mxu3 }
 0x11c   : > { %v1591_v25 = vadd.f32 %v1590_v48, %v9227_v58 }
 0x11d   : > { %v1490_v3 = vpop.f32.mrf.mxu0 }
 0x11e   : > { %v1491_v0 = vadd.f32 %v1490_v3, %v9200_v17  ;;  %v9246_v10 = vadd.f32 %v1624_v40, %v1591_v25  ;;  %v7829_v25 = vld [vmem:[#allocation2 + $0x28] sm:$0xff] }
 0x11f   : > { %v1626_v30 = vpop.f32.mrf.mxu2  ;;  %3885 = vmatpush.bf16.msrb.mxu3 %v7829_v25  ;;  %v7827_v25 = vld [vmem:[#allocation2 + $0x18] sm:$0xff] }
 0x120   : > { %v9248_v8 = vadd.f32 %v1524_v60, %v1491_v0  ;;  %v7837_v60 = vld [vmem:[#allocation2 + $0x68] sm:$0xff] }
 0x121   : > { %3919 = vmatpush.bf16.msra.mxu2 %v7837_v60 }
 0x123   : > { %v1592_v15 = vpop.f32.mrf.mxu3 }
 0x124   : > { %v1593_v49 = vadd.f32 %v1592_v15, %v9227_v58 }
 0x125   : > { %v1493_v22 = vpop.f32.mrf.mxu0  ;;  %3920 = vmatpush.bf16.msra.mxu2 %v7836_v42 }
 0x126   : > { %v1494_v20 = vadd.f32 %v1493_v22, %v9200_v17  ;;  %v1527_v31 = vpop.f32.mrf.mxu1  ;;  %v9258_v41 = vadd.f32 %v1626_v30, %v1593_v49 }
 0x128   : > { %v9260_v18 = vadd.f32 %v1527_v31, %v1494_v20  ;;  %6655 = vmatmul.msk.bf16.gmra.mxu0 %vm798_vm5, %v8702_v57  ;;  %1745 = vmatmul.bf16.gmra.mxu3 %v9059_v14  ;;  %v7828_v20 = vld [vmem:[#allocation2 + $0x20] sm:$0xff]  ;;  %v6544_v31 = vld [vmem:[%s11317_s1 + $0x1f0] sm:$0xf] }
 0x129   : > { %1711 = vmatmul.bf16.gmra.mxu1 %v9055_v6  ;;  %6660 = vmatmul.msk.bf16.gmra.mxu2 %vm798_vm5, %v8702_v57  ;;  %v6545_v35 = vor.u32 %v7798_v33, %v6544_v31 }
 0x12a   : > { %3886 = vmatpush.bf16.msrb.mxu3 %v7828_v20  ;;  %3921 = vmatpush.bf16.msra.mxu2 %v7835_v53 }
 0x12b   : > { %v1595_v37 = vpop.f32.mrf.mxu3  ;;  %1924 = vmatpush.bf16.msrb.mxu0 %v6545_v35 }
 0x12c   : > { %v1596_v39 = vadd.f32 %v1595_v37, %v9227_v58  ;;  %v1629_v12 = vpop.f32.mrf.mxu2 }
 0x12d   : > { %v1495_v51 = vpop.f32.mrf.mxu0 }
 0x12e   : > { %v9269_v52 = vadd.f32 %v1629_v12, %v1596_v39  ;;  %v1496_v40 = vadd.f32 %v1495_v51, %v9200_v17  ;;  %v1529_v48 = vpop.f32.mrf.mxu1  ;;  %3887 = vmatpush.bf16.msrb.mxu3 %v7827_v25 }
 0x130   : > { %v9272_v45 = vadd.f32 %v1529_v48, %v1496_v40 }
 0x133   : > { %v1597_v54 = vpop.f32.mrf.mxu3 }
 0x134   : > { %v1598_v59 = vadd.f32 %v1597_v54, %v9227_v58  ;;  %v1631_v3 = vpop.f32.mrf.mxu2  ;;  %v6524_v54 = vld [vmem:[%s11317_s1 + $0x1c8] sm:$0xf] }
 0x135   : > { %v1498_v0 = vpop.f32.mrf.mxu0 }
 0x136   : > { %v9281_v9 = vadd.f32 %v1631_v3, %v1598_v59  ;;  %v1499_v13 = vadd.f32 %v1498_v0, %v9200_v17  ;;  %v1532_v15 = vpop.f32.mrf.mxu1  ;;  %v7793_v59 = vld [vmem:[%s11317_s1 + $0x1d8] sm:$0xf0] }
 0x137   : > { %v6525_v21 = vor.u32 %v7793_v59, %v6524_v54 }
 0x138   : > { %v9284_v30 = vadd.f32 %v1532_v15, %v1499_v13  ;;  %1793 = vmatmul.bf16.vlgmr.msra.gmra.mxu0 %v8851_v2  ;;  %6661 = vmatmul.msk.bf16.vlgmr.msra.gmra.mxu3 %vm798_vm5, %v8393_v43  ;;  %v6624_v13 = vld [vmem:[%s11317_s1 + $0x290] sm:$0xf]  ;;  %v7818_v15 = vld [vmem:[%s11317_s1 + $0x2a0] sm:$0xf0] }
 0x139   : > { %1827 = vmatmul.bf16.vlgmr.msra.gmra.mxu1 %v8839_v24  ;;  %1895 = vmatmul.bf16.vlgmr.msrb.gmra.mxu2 %v8851_v2 }
 0x13a   : > { %1925 = vmatpush.bf16.msrb.mxu0 %v6525_v21 }
 0x13b   : > { %v1600_v49 = vpop.f32.mrf.mxu3 }
 0x13c   : > { %v1601_v32 = vadd.f32 %v1600_v49, %v9227_v58  ;;  %v1634_v22 = vpop.f32.mrf.mxu2  ;;  %v6625_v49 = vor.u32 %v7818_v15, %v6624_v13 }
 0x13d   : > { %v1500_v34 = vpop.f32.mrf.mxu0 }
 0x13e   : > { %v9298_v37 = vadd.f32 %v1634_v22, %v1601_v32  ;;  %v1501_v2 = vadd.f32 %v1500_v34, %v9200_v17  ;;  %v1534_v39 = vpop.f32.mrf.mxu1  ;;  %1962 = vmatpush.bf16.msrb.mxu1 %v6625_v49 }
 0x140   : > { %v9301_v12 = vadd.f32 %v1534_v39, %v1501_v2  ;;  %v7826_v2 = vld [vmem:[#allocation2 + $0x10] sm:$0xff] }
 0x141   : > { %3888 = vmatpush.bf16.msrb.mxu3 %v7826_v2  ;;  %v7833_v2 = vld [vmem:[#allocation2 + $0x48] sm:$0xff] }
 0x143   : > { %v1602_v51 = vpop.f32.mrf.mxu3 }
 0x144   : > { %v1603_v40 = vadd.f32 %v1602_v51, %v9227_v58  ;;  %v1636_v48 = vpop.f32.mrf.mxu2  ;;  %v6504_v51 = vld [vmem:[%s11317_s1 + $0x1a0] sm:$0xf] }
 0x145   : > { %v1503_v3 = vpop.f32.mrf.mxu0 }
 0x146   : > { %v9310_v60 = vadd.f32 %v1636_v48, %v1603_v40  ;;  %v1504_v0 = vadd.f32 %v1503_v3, %v9200_v17  ;;  %v1537_v61 = vpop.f32.mrf.mxu1  ;;  %v7834_v40 = vld [vmem:[#allocation2 + $0x50] sm:$0xff] }
 0x147   : > { %3922 = vmatpush.bf16.msra.mxu2 %v7834_v40  ;;  %v1557_v40 = vadd.f32 %v8949_v47, %v9221_v50  ;;  %v9374_v50 = vperm.slane %v9195_v26, 2 }
 0x148   : > { %v9319_v32 = vadd.f32 %v1537_v61, %v1504_v0  ;;  %1798 = vmatmul.bf16.gmra.mxu0 %v8897_v4  ;;  %6662 = vmatmul.msk.bf16.gmra.mxu3 %vm798_vm5, %v8433_v5 }
 0x149   : > { %1832 = vmatmul.bf16.gmra.mxu1 %v8903_v11  ;;  %1900 = vmatmul.bf16.gmra.mxu2 %v8897_v4  ;;  %v7788_v4 = vld [vmem:[%s11317_s1 + $0x1b0] sm:$0xf0] }
 0x14a   : > { %v6505_v25 = vor.u32 %v7788_v4, %v6504_v51 }
 0x14b   : > { %v1605_v22 = vpop.f32.mrf.mxu3  ;;  %3923 = vmatpush.bf16.msra.mxu2 %v7833_v2 }
 0x14c   : > { %v1606_v20 = vadd.f32 %v1605_v22, %v9227_v58  ;;  %v1639_v31 = vpop.f32.mrf.mxu2  ;;  %1926 = vmatpush.bf16.msrb.mxu0 %v6505_v25  ;;  %v7778_v25 = vld [vmem:[%s11317_s1 + $0x160] sm:$0xf0] }
 0x14d   : > { %v1505_v33 = vpop.f32.mrf.mxu0 }
 0x14e   : > { %v9327_v34 = vadd.f32 %v1639_v31, %v1606_v20  ;;  %v1506_v35 = vadd.f32 %v1505_v33, %v9200_v17  ;;  %v1539_v42 = vpop.f32.mrf.mxu1  ;;  %v7825_v20 = vld [vmem:[#allocation2 + $0x8] sm:$0xff] }
 0x14f   : > { %3889 = vmatpush.bf16.msrb.mxu3 %v7825_v20  ;;  %v9376_v20 = vpop.permute.xlu0 %2041 }
 0x150   : > { %v9330_v39 = vadd.f32 %v1539_v42, %v1506_v35  ;;  %v6484_v42 = vld [vmem:[%s11317_s1 + $0x178] sm:$0xf]  ;;  %11380 = vst [vmem:[#allocation5_spill] sm:$0xff] %v9376_v20 }
 0x153   : > { %v1607_v48 = vpop.f32.mrf.mxu3 }
 0x154   : > { %v1608_v54 = vadd.f32 %v1607_v48, %v9227_v58  ;;  %v1641_v59 = vpop.f32.mrf.mxu2  ;;  %v6464_v48 = vld [vmem:[%s11317_s1 + $0x150] sm:$0xf] }
 0x155   : > { %v1508_v3 = vpop.f32.mrf.mxu0 }
 0x156   : > { %v9339_v21 = vadd.f32 %v1641_v59, %v1608_v54  ;;  %v1509_v53 = vadd.f32 %v1508_v3, %v9200_v17  ;;  %v1542_v0 = vpop.f32.mrf.mxu1  ;;  %v7824_v3 = vld [vmem:[#allocation2] sm:$0xff] }
 0x157   : > { %3890 = vmatpush.bf16.msrb.mxu3 %v7824_v3 }
 0x158   : > { %v9342_v61 = vadd.f32 %v1542_v0, %v1509_v53  ;;  %1803 = vmatmul.bf16.gmra.mxu0 %v8939_v46  ;;  %6663 = vmatmul.msk.bf16.gmra.mxu3 %vm798_vm5, %v8494_v36  ;;  %v6465_v53 = vor.u32 %v7778_v25, %v6464_v48 }
 0x159   : > { %1837 = vmatmul.bf16.gmra.mxu1 %v8945_v55  ;;  %1905 = vmatmul.bf16.gmra.mxu2 %v8939_v46  ;;  %v7783_v46 = vld [vmem:[%s11317_s1 + $0x188] sm:$0xf0] }
 0x15a   : > { %v6485_v4 = vor.u32 %v7783_v46, %v6484_v42 }
 0x15b   : > { %v1610_v13 = vpop.f32.mrf.mxu3 }
 0x15c   : > { %v1611_v15 = vadd.f32 %v1610_v13, %v9227_v58  ;;  %v1644_v49 = vpop.f32.mrf.mxu2  ;;  %1927 = vmatpush.bf16.msrb.mxu0 %v6485_v4  ;;  %v7832_v13 = vld [vmem:[#allocation2 + $0x40] sm:$0xff] }
 0x15d   : > { %v1510_v22 = vpop.f32.mrf.mxu0  ;;  %3924 = vmatpush.bf16.msra.mxu2 %v7832_v13 }
 0x15e   : > { %v9350_v31 = vadd.f32 %v1644_v49, %v1611_v15  ;;  %v1511_v33 = vadd.f32 %v1510_v22, %v9200_v17  ;;  %v1544_v35 = vpop.f32.mrf.mxu1  ;;  %v1989_v15 = vmax.f32 %v1557_v40, 0.0 }
 0x160   : > { %v9359_v51 = vadd.f32 %v1544_v35, %v1511_v33  ;;  %1928 = vmatpush.bf16.msrb.mxu0 %v6465_v53  ;;  %v2170_v33 = vmul.f32 %v9376_v20, %v1989_v15  ;;  %v7871_v53 = vld [vmem:[#allocation2 + $0x178] sm:$0xff] }
 0x161   : > { %4053 = vmatpush.bf16.msrb.mxu2 %v7871_v53 }
 0x163   : > { %v1612_v17 = vpop.f32.mrf.mxu3 }
 0x164   : > { %v1613_v54 = vadd.f32 %v1612_v17, %v9227_v58  ;;  %v1646_v59 = vpop.f32.mrf.mxu2 }
 0x165   : > { %v1658_v0 = vpop.f32.mrf.mxu0 }
 0x166   : > { %v9370_v49 = vadd.f32 %v1646_v59, %v1613_v54  ;;  %v1659_v47 = vadd.f32 %v1658_v0, %v9246_v10  ;;  %v1692_v22 = vpop.f32.mrf.mxu1  ;;  %v1559_v10 = vadd.f32 %v8979_v7, %v9248_v8  ;;  %v7863_v7 = vld [vmem:[#allocation2 + $0x138] sm:$0xff] }
 0x167   : > { %v1693_v42 = vadd.f32 %v1692_v22, %v9374_v50  ;;  %v7847_v8 = vld [vmem:[#allocation2 + $0xb8] sm:$0xff]  ;;  %4019 = vmatpush.bf16.msra.mxu3 %v7863_v7  ;;  %v9397_v7 = vpop.permute.xlu2 %2051 }
 0x168   : > { %v1990_v58 = vmax.f32 %v1659_v47, 0.0  ;;  %1808 = vmatmul.bf16.gmra.mxu0 %v8986_v16  ;;  %6664 = vmatmul.msk.bf16.gmra.mxu3 %vm798_vm5, %v8648_v28  ;;  %v1994_v48 = vmax.f32 %v1559_v10, 0.0  ;;  %v1562_v47 = vadd.f32 %v9030_v44, %v9260_v18  ;;  %11382 = vst [vmem:[#allocation7_spill] sm:$0xff] %v9397_v7 }
 0x169   : > { %1842 = vmatmul.bf16.gmra.mxu1 %v8991_v19  ;;  %1910 = vmatmul.bf16.gmra.mxu2 %v8986_v16  ;;  %v9389_v16 = vpop.permute.xlu1 %2046 }
 0x16a   : > { %v2171_v35 = vmul.f32 %v9376_v20, %v1990_v58  ;;  %11381 = vst [vmem:[#allocation6_spill] sm:$0xff] %v9389_v16  ;;  %v2172_v0 = vmul.f32 %v9389_v16, %v1994_v48  ;;  %3951 = vmatpush.bf16.msra.mxu0 %v7847_v8 }
 0x16b   : > { %v1726_v46 = vpop.f32.mrf.mxu3 }
 0x16c   : > { %v2190_v2 = vpack.c.bf16 %v2171_v35, %v2170_v33  ;;  %v1727_v4 = vadd.f32 %v1726_v46, %v1693_v42  ;;  %v1760_v40 = vpop.f32.mrf.mxu2  ;;  %v7855_v46 = vld [vmem:[#allocation2 + $0xf8] sm:$0xff] }
 0x16d   : > { %v1660_v17 = vpop.f32.mrf.mxu0  ;;  %3985 = vmatpush.bf16.msra.mxu1 %v7855_v46 }
 0x16e   : > { %v1761_v25 = vadd.f32 %v1760_v40, %v1727_v4  ;;  %v1661_v54 = vadd.f32 %v1660_v17, %v9258_v41  ;;  %v1694_v59 = vpop.f32.mrf.mxu1  ;;  %v2210_v33 = vunpack.c.l.b16 %v2190_v2  ;;  %v2211_v35 = vunpack.c.h.b16 %v2190_v2 }
 0x16f   : > { %v1695_v15 = vadd.f32 %v1694_v59, %v9374_v50  ;;  %v1999_v59 = vmax.f32 %v1562_v47, 0.0  ;;  %v1564_v2 = vadd.f32 %v9052_v62, %v9272_v45 }
 0x170   : > { %v1995_v3 = vmax.f32 %v1661_v54, 0.0 }
 0x171   : > { %v2004_v46 = vmax.f32 %v1564_v2, 0.0  ;;  %v7870_v2 = vld [vmem:[#allocation2 + $0x170] sm:$0xff] }
 0x172   : > { %v2173_v13 = vmul.f32 %v9389_v16, %v1995_v3  ;;  %v1991_v3 = vmax.f32 %v1761_v25, 0.0  ;;  %4054 = vmatpush.bf16.msrb.mxu2 %v7870_v2 }
 0x173   : > { %v1728_v22 = vpop.f32.mrf.mxu3 }
 0x174   : > { %v2191_v41 = vpack.c.bf16 %v2173_v13, %v2172_v0  ;;  %v1729_v58 = vadd.f32 %v1728_v22, %v1695_v15  ;;  %v1762_v10 = vpop.f32.mrf.mxu2  ;;  %v2089_v47 = vmul.f32 %v9376_v20, %v1991_v3 }
 0x175   : > { %v1663_v42 = vpop.f32.mrf.mxu0 }
 0x176   : > { %v2212_v4 = vunpack.c.l.b16 %v2191_v41  ;;  %v2213_v40 = vunpack.c.h.b16 %v2191_v41  ;;  %v1763_v17 = vadd.f32 %v1762_v10, %v1729_v58  ;;  %v1664_v48 = vadd.f32 %v1663_v42, %v9269_v52  ;;  %v1697_v54 = vpop.f32.mrf.mxu1 }
 0x177   : > { %v1698_v52 = vadd.f32 %v1697_v54, %v9374_v50  ;;  %v2174_v41 = vmul.f32 %v9397_v7, %v1999_v59  ;;  %v9417_v54 = vpop.permute.xlu1 %2056 }
 0x178   : > { %v2230_v44 = vpack.c.b16 %v2212_v4, %v2210_v33  ;;  %v2231_v18 = vpack.c.b16 %v2213_v40, %v2211_v35  ;;  %v1996_v8 = vmax.f32 %v1763_v17, 0.0  ;;  %v2000_v53 = vmax.f32 %v1664_v48, 0.0  ;;  %1813 = vmatmul.bf16.gmra.mxu0 %v9055_v6  ;;  %6665 = vmatmul.msk.bf16.gmra.mxu3 %vm798_vm5, %v8702_v57  ;;  %11386 = vst [vmem:[#allocation9_spill] sm:$0xff] %v9417_v54 }
 0x179   : > { %1847 = vmatmul.bf16.gmra.mxu1 %v9059_v14  ;;  %1915 = vmatmul.bf16.gmra.mxu2 %v9055_v6  ;;  %v11383_v17 = vmov 0 }
 0x17a   : > { %v2241_v25 = vshrl.u32 %v2230_v44, 16  ;;  %v2244_v0 = vshll.u32 %v2230_v44, 16  ;;  %v2249_v13 = vshrl.u32 %v2231_v18, 16  ;;  %v2252_v15 = vshll.u32 %v2231_v18, 16 }
 0x17b   : > { %v2092_v22 = vmul.f32 %v9389_v16, %v1996_v8  ;;  %v2175_v58 = vmul.f32 %v9397_v7, %v2000_v53  ;;  %v1731_v10 = vpop.f32.mrf.mxu3  ;;  %v11384_v17 = vsel %vm9413_vm9, 4294967295, %v11383_v17  ;;  %v7862_v8 = vld [vmem:[#allocation2 + $0x130] sm:$0xff] }
 0x17c   : > { %v1732_v62 = vadd.f32 %v1731_v10, %v1698_v52  ;;  %v1765_v45 = vpop.f32.mrf.mxu2  ;;  %v2243_v33 = vrot.slane %v2241_v25, 2  ;;  %v2246_v35 = vrot.slane %v2244_v0, 3  ;;  %v2251_v42 = vrot.slane %v2249_v13, 2  ;;  %11385 = vst [vmem:[#allocation8_spill] sm:$0xff] %v11384_v17  ;;  %v7846_v53 = vld [vmem:[#allocation2 + $0xb0] sm:$0xff]  ;;  %4020 = vmatpush.bf16.msra.mxu3 %v7862_v8 }
 0x17d   : > { %v2119_v6 = vadd.f32 %v2092_v22, %v2089_v47  ;;  %v2192_v4 = vpack.c.bf16 %v2175_v58, %v2174_v41  ;;  %v1665_v40 = vpop.f32.mrf.mxu0  ;;  %v2254_v48 = vrot.slane %v2252_v15, 3  ;;  %v7854_v25 = vld [vmem:[#allocation2 + $0xf0] sm:$0xff]  ;;  %3952 = vmatpush.bf16.msra.mxu0 %v7846_v53 }
 0x17e   : > { %v1766_v59 = vadd.f32 %v1765_v45, %v1732_v62  ;;  %v1666_v3 = vadd.f32 %v1665_v40, %v9281_v9  ;;  %v1699_v44 = vpop.f32.mrf.mxu1  ;;  %v9420_v18 = vor.u32 %v2246_v35, %v2243_v33  ;;  %v2176_v9 = vmul.f32 %v9417_v54, %v2004_v46  ;;  %3986 = vmatpush.bf16.msra.mxu1 %v7854_v25 }
 0x17f   : > { %v9422_v52 = vor.u32 %v2254_v48, %v2251_v42  ;;  %v1700_v62 = vadd.f32 %v1699_v44, %v9374_v50  ;;  %v1567_v33 = vadd.f32 %v9086_v23, %v9284_v30  ;;  %v2214_v8 = vunpack.c.l.b16 %v2192_v4  ;;  %v7861_v44 = vld [vmem:[#allocation2 + $0x128] sm:$0xff] }
 0x180   : > { %v2001_v0 = vmax.f32 %v1766_v59, 0.0  ;;  %v2005_v13 = vmax.f32 %v1666_v3, 0.0  ;;  %v9427_v15 = vsel %vm9413_vm9, 0, %v9420_v18  ;;  %v2215_v53 = vunpack.c.h.b16 %v2192_v4  ;;  %4021 = vmatpush.bf16.msra.mxu3 %v7861_v44 }
 0x181   : > { %v9433_v47 = vsel %vm9413_vm9, 0, %v9422_v52  ;;  %v11336_v22 = vshrl.u32 %v9427_v15, 16  ;;  %v11338_v41 = vshll.u32 %v9427_v15, 16 }
 0x182   : > { %v2095_v58 = vmul.f32 %v9397_v7, %v2001_v0  ;;  %v2177_v10 = vmul.f32 %v9417_v54, %v2005_v13  ;;  %v11335_v45 = vshrl.u32 %v9433_v47, 16  ;;  %v11337_v42 = vshll.u32 %v9433_v47, 16 }
 0x183   : > { %v1733_v35 = vpop.f32.mrf.mxu3  ;;  %v9446_v46 = vrot.slane %v11336_v22, 5  ;;  %v9450_v25 = vrot.slane %v11338_v41, 6  ;;  %v7845_v41 = vld [vmem:[#allocation2 + $0xa8] sm:$0xff] }
 0x184   : > { %v2120_v40 = vadd.f32 %v2119_v6, %v2095_v58  ;;  %v2193_v48 = vpack.c.bf16 %v2177_v10, %v2176_v9  ;;  %v1734_v59 = vadd.f32 %v1733_v35, %v1700_v62  ;;  %v1767_v3 = vpop.f32.mrf.mxu2  ;;  %v9454_v23 = vrot.slane %v11335_v45, 5  ;;  %v9463_v62 = vpop.permute.xlu2 %2061  ;;  %3953 = vmatpush.bf16.msra.mxu0 %v7845_v41 }
 0x185   : > { %11387 = vst [vmem:[#allocation10_spill] sm:$0xff] %v9446_v46  ;;  %v1668_v2 = vpop.f32.mrf.mxu0  ;;  %v2009_v58 = vmax.f32 %v1567_v33, 0.0  ;;  %v9461_v10 = vrot.slane %v11337_v42, 6 }
 0x186   : > { %11388 = vst [vmem:[#allocation11_spill] sm:$0xff] %v9450_v25  ;;  %v2216_v30 = vunpack.c.l.b16 %v2193_v48  ;;  %v2217_v0 = vunpack.c.h.b16 %v2193_v48  ;;  %v1768_v13 = vadd.f32 %v1767_v3, %v1734_v59  ;;  %v1669_v6 = vadd.f32 %v1668_v2, %v9298_v37  ;;  %v1702_v9 = vpop.f32.mrf.mxu1 }
 0x187   : > { %11389 = vst [vmem:[#allocation12_spill] sm:$0xff] %v9454_v23  ;;  %v1569_v37 = vadd.f32 %v9112_v38, %v9301_v12  ;;  %v1703_v38 = vadd.f32 %v1702_v9, %v9374_v50  ;;  %v7869_v9 = vld [vmem:[#allocation2 + $0x168] sm:$0xff] }
 0x188   : > { %11390 = vst [vmem:[#allocation13_spill] sm:$0xff] %v9461_v10  ;;  %v2232_v35 = vpack.c.b16 %v2216_v30, %v2214_v8  ;;  %v2233_v63 = vpack.c.b16 %v2217_v0, %v2215_v53  ;;  %v2006_v45 = vmax.f32 %v1768_v13, 0.0  ;;  %v2010_v22 = vmax.f32 %v1669_v6, 0.0  ;;  %1929 = vmatmul.bf16.vlgmr.msrb.gmra.mxu0 %v8839_v24  ;;  %3891 = vmatmul.bf16.vlgmr.msrb.gmra.mxu3 %v9427_v15  ;;  %v7853_v23 = vld [vmem:[#allocation2 + $0xe8] sm:$0xff] }
 0x189   : > { %6666 = vmatmul.msk.bf16.vlgmr.msrb.gmra.mxu1 %vm798_vm5, %v8393_v43  ;;  %3925 = vmatmul.bf16.vlgmr.msra.gmra.mxu2 %v9433_v47  ;;  %v2178_v24 = vmul.f32 %v9463_v62, %v2009_v58  ;;  %v2014_v42 = vmax.f32 %v1569_v37, 0.0 }
 0x18a   : > { %v2257_v48 = vshrl.u32 %v2232_v35, 16  ;;  %v2260_v59 = vshll.u32 %v2232_v35, 16  ;;  %v2266_v3 = vshrl.u32 %v2233_v63, 16  ;;  %v2269_v8 = vshll.u32 %v2233_v63, 16  ;;  %4055 = vmatpush.bf16.msrb.mxu2 %v7869_v9  ;;  %3987 = vmatpush.bf16.msra.mxu1 %v7853_v23 }
 0x18b   : > { %v2098_v53 = vmul.f32 %v9417_v54, %v2006_v45  ;;  %v2179_v2 = vmul.f32 %v9463_v62, %v2010_v22  ;;  %v1736_v12 = vpop.f32.mrf.mxu3 }
 0x18c   : > { %v2259_v44 = vrot.slane %v2257_v48, 2  ;;  %v2262_v43 = vrot.slane %v2260_v59, 3  ;;  %v2268_v30 = vrot.slane %v2266_v3, 2  ;;  %v2271_v0 = vrot.slane %v2269_v8, 3  ;;  %v1770_v13 = vpop.f32.mrf.mxu2  ;;  %v9483_v48 = vpop.permute.xlu0 %2066  ;;  %v7860_v3 = vld [vmem:[#allocation2 + $0x120] sm:$0xff] }
 0x18d   : > { %v2121_v6 = vadd.f32 %v2120_v40, %v2098_v53  ;;  %v2194_v33 = vpack.c.bf16 %v2179_v2, %v2178_v24  ;;  %v1737_v4 = vadd.f32 %v1736_v12, %v1703_v38  ;;  %v1670_v35 = vpop.f32.mrf.mxu0  ;;  %v7868_v53 = vld [vmem:[#allocation2 + $0x160] sm:$0xff]  ;;  %v1572_v24 = vadd.f32 %v9138_v27, %v9319_v32  ;;  %4022 = vmatpush.bf16.msra.mxu3 %v7860_v3 }
 0x18e   : > { %v9478_v63 = vor.u32 %v2262_v43, %v2259_v44  ;;  %v9480_v45 = vor.u32 %v2271_v0, %v2268_v30  ;;  %v1671_v58 = vadd.f32 %v1670_v35, %v9310_v60  ;;  %v1704_v22 = vpop.f32.mrf.mxu1  ;;  %v7844_v60 = vld [vmem:[#allocation2 + $0xa0] sm:$0xff]  ;;  %4056 = vmatpush.bf16.msrb.mxu2 %v7868_v53  ;;  %v9501_v35 = vpop.permute.xlu1 %2071 }
 0x18f   : > { %v1771_v59 = vadd.f32 %v1770_v13, %v1737_v4  ;;  %v7852_v2 = vld [vmem:[#allocation2 + $0xe0] sm:$0xff]  ;;  %v1705_v12 = vadd.f32 %v1704_v22, %v9374_v50  ;;  %3954 = vmatpush.bf16.msra.mxu0 %v7844_v60  ;;  %v2019_v0 = vmax.f32 %v1572_v24, 0.0  ;;  %v2218_v27 = vunpack.c.l.b16 %v2194_v33 }
 0x190   : > { %v9488_v40 = vsel %vm742_vm3, %v9420_v18, %v9478_v63  ;;  %v9493_v37 = vsel %vm742_vm3, %v9422_v52, %v9480_v45  ;;  %v2015_v8 = vmax.f32 %v1671_v58, 0.0  ;;  %v2180_v18 = vmul.f32 %v9483_v48, %v2014_v42  ;;  %3988 = vmatpush.bf16.msra.mxu1 %v7852_v2 }
 0x191   : > { %v2011_v4 = vmax.f32 %v1771_v59, 0.0  ;;  %v2219_v32 = vunpack.c.h.b16 %v2194_v33  ;;  %v1574_v33 = vadd.f32 %v9158_v56, %v9330_v39  ;;  %v2182_v60 = vmul.f32 %v9501_v35, %v2019_v0 }
 0x192   : > { %v2181_v38 = vmul.f32 %v9483_v48, %v2015_v8 }
 0x193   : > { %v2101_v52 = vmul.f32 %v9463_v62, %v2011_v4  ;;  %v1738_v44 = vpop.f32.mrf.mxu3 }
 0x194   : > { %v2195_v41 = vpack.c.bf16 %v2181_v38, %v2180_v18  ;;  %v1739_v43 = vadd.f32 %v1738_v44, %v1705_v12  ;;  %v1772_v30 = vpop.f32.mrf.mxu2 }
 0x195   : > { %v2122_v23 = vadd.f32 %v2121_v6, %v2101_v52  ;;  %v1673_v13 = vpop.f32.mrf.mxu0  ;;  %v1577_v6 = vadd.f32 %v9166_v1, %v9342_v61 }
 0x196   : > { %v2220_v42 = vunpack.c.l.b16 %v2195_v41  ;;  %v2221_v58 = vunpack.c.h.b16 %v2195_v41  ;;  %v1773_v9 = vadd.f32 %v1772_v30, %v1739_v43  ;;  %v1674_v22 = vadd.f32 %v1673_v13, %v9327_v34  ;;  %v1707_v59 = vpop.f32.mrf.mxu1 }
 0x197   : > { %v1708_v1 = vadd.f32 %v1707_v59, %v9374_v50 }
 0x198   : > { %v2234_v3 = vpack.c.b16 %v2220_v42, %v2218_v27  ;;  %v2235_v8 = vpack.c.b16 %v2221_v58, %v2219_v32  ;;  %v2016_v4 = vmax.f32 %v1773_v9, 0.0  ;;  %v2020_v18 = vmax.f32 %v1674_v22, 0.0  ;;  %1934 = vmatmul.bf16.gmra.mxu0 %v8903_v11  ;;  %3896 = vmatmul.bf16.gmra.mxu3 %v9488_v40  ;;  %v9524_v42 = vpop.permute.xlu2 %2076  ;;  %v9526_v22 = vpop.permute.xlu0 %2081 }
 0x199   : > { %6667 = vmatmul.msk.bf16.gmra.mxu1 %vm798_vm5, %v8433_v5  ;;  %3930 = vmatmul.bf16.gmra.mxu2 %v9493_v37  ;;  %v1579_v11 = vadd.f32 %v9197_v29, %v9359_v51  ;;  %v2024_v27 = vmax.f32 %v1574_v33, 0.0  ;;  %v2029_v58 = vmax.f32 %v1577_v6, 0.0  ;;  %11391 = vst [vmem:[#allocation14_spill] sm:$0xff] %v9526_v22  ;;  %v9538_v33 = vpop.permute.xlu1 %2086 }
 0x19a   : > { %v2275_v34 = vshrl.u32 %v2234_v3, 16  ;;  %v2278_v53 = vshll.u32 %v2234_v3, 16  ;;  %v2284_v24 = vshrl.u32 %v2235_v8, 16  ;;  %v2287_v2 = vshll.u32 %v2235_v8, 16  ;;  %11392 = vst [vmem:[#allocation15_spill] sm:$0xff] %v9538_v33 }
 0x19b   : > { %v2104_v38 = vmul.f32 %v9483_v48, %v2016_v4  ;;  %v2183_v56 = vmul.f32 %v9501_v35, %v2020_v18  ;;  %v1741_v39 = vpop.f32.mrf.mxu3  ;;  %v2034_v59 = vmax.f32 %v1579_v11, 0.0  ;;  %v7843_v4 = vld [vmem:[#allocation2 + $0x98] sm:$0xff] }
 0x19c   : > { %v2277_v61 = vrot.slane %v2275_v34, 2  ;;  %v2280_v12 = vrot.slane %v2278_v53, 3  ;;  %v2286_v52 = vrot.slane %v2284_v24, 2  ;;  %v2289_v5 = vrot.slane %v2287_v2, 3  ;;  %v1775_v44 = vpop.f32.mrf.mxu2  ;;  %v7867_v18 = vld [vmem:[#allocation2 + $0x158] sm:$0xff]  ;;  %3955 = vmatpush.bf16.msra.mxu0 %v7843_v4 }
 0x19d   : > { %v2123_v41 = vadd.f32 %v2122_v23, %v2104_v38  ;;  %v2196_v43 = vpack.c.bf16 %v2183_v56, %v2182_v60  ;;  %v1742_v30 = vadd.f32 %v1741_v39, %v1708_v1  ;;  %v1675_v0 = vpop.f32.mrf.mxu0  ;;  %v2184_v34 = vmul.f32 %v9524_v42, %v2024_v27  ;;  %4057 = vmatpush.bf16.msrb.mxu2 %v7867_v18 }
 0x19e   : > { %v9519_v32 = vor.u32 %v2280_v12, %v2277_v61  ;;  %v9521_v29 = vor.u32 %v2289_v5, %v2286_v52  ;;  %v1676_v51 = vadd.f32 %v1675_v0, %v9339_v21  ;;  %v1709_v13 = vpop.f32.mrf.mxu1  ;;  %v7859_v21 = vld [vmem:[#allocation2 + $0x118] sm:$0xff]  ;;  %v2186_v2 = vmul.f32 %v9526_v22, %v2029_v58 }
 0x19f   : > { %v1776_v9 = vadd.f32 %v1775_v44, %v1742_v30  ;;  %4023 = vmatpush.bf16.msra.mxu3 %v7859_v21  ;;  %v2222_v38 = vunpack.c.l.b16 %v2196_v43  ;;  %v9552_v61 = vmul.f32 %v9538_v33, %v2034_v59  ;;  %v2223_v12 = vunpack.c.h.b16 %v2196_v43 }
 0x1a0   : > { %v2025_v3 = vmax.f32 %v1676_v51, 0.0  ;;  %v9531_v23 = vsel %vm742_vm3, %v9478_v63, %v9519_v32  ;;  %v9536_v8 = vsel %vm742_vm3, %v9480_v45, %v9521_v29  ;;  %v1710_v63 = vadd.f32 %v1709_v13, %v9374_v50 }
 0x1a1   : > { %v2021_v6 = vmax.f32 %v1776_v9, 0.0  ;;  %v9541_v60 = vshll.u32 %v9531_v23, 16  ;;  %v9549_v11 = vshll.u32 %v9536_v8, 16  ;;  %v9556_v30 = vshrl.u32 %v9531_v23, 16 }
 0x1a2   : > { %v2185_v53 = vmul.f32 %v9524_v42, %v2025_v3  ;;  %v9560_v9 = vperm.slane %v9195_v26, 3  ;;  %v7851_v26 = vld [vmem:[#allocation2 + $0xd8] sm:$0xff] }
 0x1a3   : > { %v2107_v45 = vmul.f32 %v9501_v35, %v2021_v6  ;;  %v1743_v24 = vpop.f32.mrf.mxu3  ;;  %v11340_v44 = vrot.slane %v9541_v60, 1  ;;  %v11342_v43 = vrot.slane %v9549_v11, 1  ;;  %v7858_v6 = vld [vmem:[#allocation2 + $0x110] sm:$0xff]  ;;  %3989 = vmatpush.bf16.msra.mxu1 %v7851_v26 }
 0x1a4   : > { %v2197_v56 = vpack.c.bf16 %v2185_v53, %v2184_v34  ;;  %v1744_v1 = vadd.f32 %v1743_v24, %v1710_v63  ;;  %v1777_v39 = vpop.f32.mrf.mxu2  ;;  %v7842_v34 = vld [vmem:[#allocation2 + $0x90] sm:$0xff]  ;;  %v2527_v63 = vrot.slane %v9556_v30, 5  ;;  %4024 = vmatpush.bf16.msra.mxu3 %v7858_v6 }
 0x1a5   : > { %v2124_v52 = vadd.f32 %v2123_v41, %v2107_v45  ;;  %v1678_v5 = vpop.f32.mrf.mxu0  ;;  %v9574_v53 = vor.u32 %v9556_v30, %v11340_v44  ;;  %3956 = vmatpush.bf16.msra.mxu0 %v7842_v34  ;;  %v7865_v41 = vld [vmem:[#allocation2 + $0x148] sm:$0xff] }
 0x1a6   : > { %v2224_v0 = vunpack.c.l.b16 %v2197_v56  ;;  %v2225_v27 = vunpack.c.h.b16 %v2197_v56  ;;  %v1778_v51 = vadd.f32 %v1777_v39, %v1744_v1  ;;  %v1679_v13 = vadd.f32 %v1678_v5, %v9350_v31  ;;  %v1712_v58 = vpop.f32.mrf.mxu1  ;;  %v7866_v1 = vld [vmem:[#allocation2 + $0x150] sm:$0xff] }
 0x1a7   : > { %v1713_v31 = vadd.f32 %v1712_v58, %v9374_v50  ;;  %v7850_v5 = vld [vmem:[#allocation2 + $0xd0] sm:$0xff]  ;;  %4058 = vmatpush.bf16.msrb.mxu2 %v7866_v1 }
 0x1a8   : > { %v2236_v3 = vpack.c.b16 %v2224_v0, %v2222_v38  ;;  %v2237_v21 = vpack.c.b16 %v2225_v27, %v2223_v12  ;;  %v2026_v4 = vmax.f32 %v1778_v51, 0.0  ;;  %v2030_v18 = vmax.f32 %v1679_v13, 0.0  ;;  %1939 = vmatmul.bf16.gmra.mxu0 %v8945_v55  ;;  %3901 = vmatmul.bf16.gmra.mxu3 %v9531_v23  ;;  %v7857_v0 = vld [vmem:[#allocation2 + $0x108] sm:$0xff] }
 0x1a9   : > { %6668 = vmatmul.msk.bf16.gmra.mxu1 %vm798_vm5, %v8494_v36  ;;  %3935 = vmatmul.bf16.gmra.mxu2 %v9536_v8  ;;  %v2528_v55 = vrot.slane %v9541_v60, 6  ;;  %v9581_v27 = vshrl.u32 %v9536_v8, 16 }
 0x1aa   : > { %v2293_v45 = vshrl.u32 %v2236_v3, 16  ;;  %v2296_v24 = vshll.u32 %v2236_v3, 16  ;;  %v2302_v38 = vshrl.u32 %v2237_v21, 16  ;;  %v2305_v56 = vshll.u32 %v2237_v21, 16  ;;  %3990 = vmatpush.bf16.msra.mxu1 %v7850_v5  ;;  %4025 = vmatpush.bf16.msra.mxu3 %v7857_v0  ;;  %v7840_v0 = vld [vmem:[#allocation2 + $0x80] sm:$0xff] }
 0x1ab   : > { %v2110_v36 = vmul.f32 %v9524_v42, %v2026_v4  ;;  %v2187_v39 = vmul.f32 %v9526_v22, %v2030_v18  ;;  %v1746_v12 = vpop.f32.mrf.mxu3  ;;  %v9583_v51 = vor.u32 %v2528_v55, %v2527_v63  ;;  %v7841_v4 = vld [vmem:[#allocation2 + $0x88] sm:$0xff]  ;;  %v2395_v10 = vor.u32 %v9581_v27, %v11342_v43  ;;  %4059 = vmatpush.bf16.msrb.mxu2 %v7865_v41 }
 0x1ac   : > { %v2295_v13 = vrot.slane %v2293_v45, 2  ;;  %v2298_v58 = vrot.slane %v2296_v24, 3  ;;  %v2304_v3 = vrot.slane %v2302_v38, 2  ;;  %v2307_v44 = vrot.slane %v2305_v56, 3  ;;  %v1780_v21 = vpop.f32.mrf.mxu2  ;;  %v7849_v38 = vld [vmem:[#allocation2 + $0xc8] sm:$0xff]  ;;  %3957 = vmatpush.bf16.msra.mxu0 %v7841_v4  ;;  %v7848_v4 = vld [vmem:[#allocation2 + $0xc0] sm:$0xff] }
 0x1ad   : > { %11393 = vst [vmem:[#allocation16_spill] sm:$0xff] %v9583_v51  ;;  %v2125_v18 = vadd.f32 %v2124_v52, %v2110_v36  ;;  %v9585_v59 = vpack.c.bf16 %v2187_v39, %v2186_v2  ;;  %v1747_v26 = vadd.f32 %v1746_v12, %v1713_v31  ;;  %v1680_v6 = vpop.f32.mrf.mxu0  ;;  %v2531_v56 = vrot.slane %v9581_v27, 5 }
 0x1ae   : > { %v9590_v63 = vor.u32 %v2298_v58, %v2295_v13  ;;  %v9592_v55 = vor.u32 %v2307_v44, %v2304_v3  ;;  %v1681_v45 = vadd.f32 %v1680_v6, %v9370_v49  ;;  %v1714_v24 = vpop.f32.mrf.mxu1  ;;  %v7864_v13 = vld [vmem:[#allocation2 + $0x140] sm:$0xff]  ;;  %v2532_v41 = vrot.slane %v9549_v11, 6  ;;  %3991 = vmatpush.bf16.msra.mxu1 %v7849_v38 }
 0x1af   : > { %v2226_v52 = vunpack.c.l.b16 %v9585_v59  ;;  %v2227_v2 = vunpack.c.h.b16 %v9585_v59  ;;  %v1781_v31 = vadd.f32 %v1780_v21, %v1747_v26  ;;  %v1715_v44 = vadd.f32 %v1714_v24, %v9374_v50  ;;  %4060 = vmatpush.bf16.msrb.mxu2 %v7864_v13 }
 0x1b0   : > { %v2035_v1 = vmax.f32 %v1681_v45, 0.0  ;;  %v9603_v49 = vsel %vm742_vm3, %v9519_v32, %v9590_v63  ;;  %v9608_v36 = vsel %vm742_vm3, %v9521_v29, %v9592_v55  ;;  %v7856_v32 = vld [vmem:[#allocation2 + $0x100] sm:$0xff]  ;;  %v11394_v6 = vrot.slane %v9531_v23, 1  ;;  %3958 = vmatpush.bf16.msra.mxu0 %v7840_v0 }
 0x1b1   : > { %v2031_v59 = vmax.f32 %v1781_v31, 0.0  ;;  %v9611_v39 = vshll.u32 %v9603_v49, 16  ;;  %v11343_v12 = vrot.slane %v9603_v49, 1  ;;  %v9615_v50 = vshll.u32 %v9608_v36, 16  ;;  %4026 = vmatpush.bf16.msra.mxu3 %v7856_v32 }
 0x1b2   : > { %v2189_v5 = vmul.f32 %v9538_v33, %v2035_v1  ;;  %v11344_v58 = vrot.slane %v9608_v36, 1  ;;  %v9620_v29 = vshrl.u32 %v9603_v49, 16  ;;  %v11395_v38 = vrot.slane %v9536_v8, 1  ;;  %3992 = vmatpush.bf16.msra.mxu1 %v7848_v4 }
 0x1b3   : > { %v2113_v3 = vmul.f32 %v9526_v22, %v2031_v59  ;;  %v1748_v21 = vpop.f32.mrf.mxu3  ;;  %v9630_v45 = vsel %vm590_vm0, %v11394_v6, %v11343_v12  ;;  %v11346_v24 = vrot.slane %v9615_v50, 1  ;;  %v11345_v34 = vrot.slane %v9603_v49, 5 }
 0x1b4   : > { %v2199_v31 = vpack.c.bf16 %v2189_v5, %v9552_v61  ;;  %v1749_v1 = vadd.f32 %v1748_v21, %v1715_v44  ;;  %v1782_v43 = vpop.f32.mrf.mxu2  ;;  %v9639_v59 = vsel %vm590_vm0, %v11395_v38, %v11344_v58  ;;  %v11396_v12 = vrot.slane %v9611_v39, 1 }
 0x1b5   : > { %v2126_v26 = vadd.f32 %v2125_v18, %v2113_v3  ;;  %v1794_v6 = vpop.f32.mrf.mxu0  ;;  %v9651_v44 = vsel %vm535_vm1, %v2395_v10, %v11346_v24  ;;  %v9654_v5 = vshrl.u32 %v9608_v36, 16  ;;  %v9657_v3 = vor.u32 %v2532_v41, %v2531_v56 }
 0x1b6   : > { %v9646_v61 = vsel %vm535_vm1, %v9574_v53, %v11396_v12  ;;  %v2228_v32 = vunpack.c.l.b16 %v2199_v31  ;;  %v2229_v0 = vunpack.c.h.b16 %v2199_v31  ;;  %v1783_v21 = vadd.f32 %v1782_v43, %v1749_v1  ;;  %v1828_v13 = vpop.f32.mrf.mxu1 }
 0x1b7   : > { %v1795_v18 = vadd.f32 %v1794_v6, %v9560_v9  ;;  %11397 = vst [vmem:[#allocation17_spill] sm:$0xff] %v9657_v3  ;;  %v11398_v53 = vrot.slane %v9531_v23, 5  ;;  %v2535_v12 = vrot.slane %v9620_v29, 5  ;;  %v11348_v56 = vrot.slane %v9536_v8, 5 }
 0x1b8   : > { %v2238_v38 = vpack.c.b16 %v2228_v32, %v2226_v52  ;;  %v2239_v58 = vpack.c.b16 %v2229_v0, %v2227_v2  ;;  %v2036_v31 = vmax.f32 %v1783_v21, 0.0  ;;  %1944 = vmatmul.bf16.gmra.mxu0 %v8991_v19  ;;  %3906 = vmatmul.bf16.gmra.mxu3 %v9603_v49  ;;  %v2536_v41 = vrot.slane %v9611_v39, 6  ;;  %v7895_v19 = vld [vmem:[#allocation2 + $0x238] sm:$0xff] }
 0x1b9   : > { %v9664_v10 = vsel %vm2479_vm10, %v11398_v53, %v11345_v34  ;;  %v1829_v43 = vadd.f32 %v1828_v13, %v1795_v18  ;;  %6669 = vmatmul.msk.bf16.gmra.mxu1 %vm798_vm5, %v8648_v28  ;;  %3940 = vmatmul.bf16.gmra.mxu2 %v9608_v36  ;;  %v11349_v4 = vrot.slane %v9608_v36, 5  ;;  %v2539_v52 = vrot.slane %v9654_v5, 5  ;;  %v7879_v0 = vld [vmem:[#allocation2 + $0x1b8] sm:$0xff] }
 0x1ba   : > { %11399 = vst [vmem:[#allocation18_spill] sm:$0xff] %v9664_v10  ;;  %v2311_v2 = vshrl.u32 %v2238_v38, 16  ;;  %v2314_v1 = vshll.u32 %v2238_v38, 16  ;;  %v2320_v6 = vshrl.u32 %v2239_v58, 16  ;;  %v2323_v32 = vshll.u32 %v2239_v58, 16  ;;  %v7903_v28 = vld [vmem:[#allocation2 + $0x278] sm:$0xff]  ;;  %4155 = vmatpush.bf16.msrb.mxu3 %v7895_v19  ;;  %4087 = vmatpush.bf16.msrb.mxu0 %v7879_v0 }
 0x1bb   : > { %v2116_v21 = vmul.f32 %v9538_v33, %v2036_v31  ;;  %v1862_v18 = vpop.f32.mrf.mxu3  ;;  %v9677_v13 = vor.u32 %v2536_v41, %v2535_v12  ;;  %v9684_v53 = vsel %vm2479_vm10, %v11348_v56, %v11349_v4  ;;  %v2540_v34 = vrot.slane %v9615_v50, 6  ;;  %4189 = vmatpush.bf16.msra.mxu2 %v7903_v28 }
 0x1bc   : > { %11400 = vst [vmem:[#allocation19_spill] sm:$0xff] %v9684_v53  ;;  %v2313_v38 = vrot.slane %v2311_v2, 2  ;;  %v2316_v24 = vrot.slane %v2314_v1, 3  ;;  %v2322_v58 = vrot.slane %v2320_v6, 2  ;;  %v2325_v10 = vrot.slane %v2323_v32, 3  ;;  %v9687_v46 = vpop.f32.mrf.mxu2 }
 0x1bd   : > { %11401 = vst [vmem:[#allocation20_spill] sm:$0xff] %v9687_v46  ;;  %v9689_v31 = vadd.f32 %v2126_v26, %v2116_v21  ;;  %v1863_v12 = vadd.f32 %v1862_v18, %v1829_v43  ;;  %v1796_v41 = vpop.f32.mrf.mxu0  ;;  %v9694_v56 = vsel %vm2512_vm11, %v9583_v51, %v9677_v13  ;;  %v9697_v6 = vor.u32 %v2540_v34, %v2539_v52  ;;  %v7894_v18 = vld [vmem:[#allocation2 + $0x230] sm:$0xff] }
 0x1be   : > { %11403 = vst [vmem:[#allocation22_spill] sm:$0xff] %v9694_v56  ;;  %v2317_v4 = vor.u32 %v2316_v24, %v2313_v38  ;;  %v2326_v53 = vor.u32 %v2325_v10, %v2322_v58  ;;  %v1797_v2 = vadd.f32 %v1796_v41, %v9560_v9  ;;  %v1830_v1 = vpop.f32.mrf.mxu1  ;;  %v11404_v19 = vrot.slane %v9611_v39, 1  ;;  %4156 = vmatpush.bf16.msrb.mxu3 %v7894_v18 }
 0x1bf   : > { %11402 = vst [vmem:[#allocation21_spill] sm:$0xff] %v9689_v31  ;;  %v1992_v24 = vmax.f32 %v1863_v12, 0.0  ;;  %v11405_v52 = vrot.slane %v9615_v50, 1  ;;  %v11409_v56 = vrot.slane %v9608_v36, 1  ;;  %v11411_v33 = vshll.u32 %v9427_v15, 16 }
 0x1c0   : > { %v9701_v32 = vsel %vm9413_vm9, %v2317_v4, 0  ;;  %v1831_v26 = vadd.f32 %v1830_v1, %v1797_v2  ;;  %v9705_v43 = vsel %vm742_vm3, %v9590_v63, %v2317_v4  ;;  %v2403_v0 = vor.u32 %v9620_v29, %v11404_v19  ;;  %v7887_v4 = vld [vmem:[#allocation2 + $0x1f8] sm:$0xff] }
 0x1c1   : > { %v9712_v10 = vsel %vm742_vm3, %v9592_v55, %v2326_v53  ;;  %v9715_v34 = vshll.u32 %v9705_v43, 16  ;;  %v2411_v21 = vor.u32 %v9654_v5, %v11405_v52  ;;  %v9722_v63 = vsel %vm9413_vm9, %v2326_v53, 0  ;;  %4121 = vmatpush.bf16.msrb.mxu1 %v7887_v4 }
 0x1c2   : > { %v2461_v28 = vrot.slane %v9705_v43, 1  ;;  %v9726_v38 = vshll.u32 %v9712_v10, 16  ;;  %v2463_v55 = vrot.slane %v9712_v10, 1  ;;  %v9731_v41 = vshrl.u32 %v9705_v43, 16 }
 0x1c3   : > { %v1864_v58 = vpop.f32.mrf.mxu3  ;;  %v2407_v12 = vrot.slane %v9715_v34, 1  ;;  %v9734_v2 = vshll.u32 %v9701_v32, 16  ;;  %v2465_v53 = vrot.slane %v9701_v32, 1  ;;  %v11407_v52 = vrot.slane %v9603_v49, 1 }
 0x1c4   : > { %v1865_v1 = vadd.f32 %v1864_v58, %v1831_v26  ;;  %v9737_v19 = vpop.f32.mrf.mxu2  ;;  %v2415_v17 = vrot.slane %v9726_v38, 1  ;;  %v9748_v51 = vsel %vm590_vm0, %v11409_v56, %v2463_v55  ;;  %v9752_v26 = vrot.slane %v11411_v33, 1 }
 0x1c5   : > { %11406 = vst [vmem:[#allocation23_spill] sm:$0xff] %v9737_v19  ;;  %v9742_v31 = vsel %vm590_vm0, %v11407_v52, %v2461_v28  ;;  %v1799_v25 = vpop.f32.mrf.mxu0  ;;  %v11412_v4 = vshll.u32 %v9433_v47, 16  ;;  %v9759_v58 = vsel %vm535_vm1, %v2403_v0, %v2407_v12  ;;  %v2419_v52 = vor.u32 %v9731_v41, %v2407_v12 }
 0x1c6   : > { %11408 = vst [vmem:[#allocation24_spill] sm:$0xff] %v9742_v31  ;;  %v1997_v19 = vmax.f32 %v1865_v1, 0.0  ;;  %v1800_v31 = vadd.f32 %v1799_v25, %v9560_v9  ;;  %v1833_v46 = vpop.f32.mrf.mxu1  ;;  %v9764_v56 = vsel %vm535_vm1, %v2411_v21, %v2415_v17  ;;  %v2090_v33 = vmul.f32 %v9376_v20, %v1992_v24  ;;  %v7902_v1 = vld [vmem:[#allocation2 + $0x270] sm:$0xff] }
 0x1c7   : > { %11410 = vst [vmem:[#allocation25_spill] sm:$0xff] %v9748_v51  ;;  %v9756_v18 = vrot.slane %v11412_v4, 1  ;;  %v2423_v51 = vrot.slane %v9734_v2, 1  ;;  %v9769_v22 = vsel %vm590_vm0, %v2461_v28, %v2465_v53  ;;  %v9772_v4 = vshrl.u32 %v9712_v10, 16  ;;  %4190 = vmatpush.bf16.msra.mxu2 %v7902_v1 }
 0x1c8   : > { %11413 = vst [vmem:[#allocation26_spill] sm:$0xff] %v9759_v58  ;;  %v9775_v0 = vshll.u32 %v9722_v63, 16  ;;  %v2093_v12 = vmul.f32 %v9389_v16, %v1997_v19  ;;  %v1834_v25 = vadd.f32 %v1833_v46, %v1800_v31  ;;  %1949 = vmatmul.bf16.gmra.mxu0 %v9059_v14  ;;  %3911 = vmatmul.bf16.gmra.mxu3 %v9705_v43  ;;  %v2467_v24 = vrot.slane %v9722_v63, 1  ;;  %v7878_v31 = vld [vmem:[#allocation2 + $0x1b0] sm:$0xff] }
 0x1c9   : > { %11414 = vst [vmem:[#allocation27_spill] sm:$0xff] %v9764_v56  ;;  %v9781_v21 = vsel %vm535_vm1, %v2419_v52, %v2423_v51  ;;  %6670 = vmatmul.msk.bf16.gmra.mxu1 %vm798_vm5, %v8702_v57  ;;  %3945 = vmatmul.bf16.gmra.mxu2 %v9712_v10  ;;  %v9788_v28 = vshll.u32 %v9488_v40, 16  ;;  %v2427_v53 = vor.u32 %v9772_v4, %v2415_v17  ;;  %v7886_v19 = vld [vmem:[#allocation2 + $0x1f0] sm:$0xff]  ;;  %v2494_v52 = vrot.slane %v9705_v43, 5 }
 0x1ca   : > { %11415 = vst [vmem:[#allocation28_spill] sm:$0xff] %v9769_v22  ;;  %v2431_v46 = vrot.slane %v9775_v0, 1  ;;  %v9795_v14 = vsel %vm2512_vm11, %v9657_v3, %v9697_v6  ;;  %v2134_v51 = vadd.f32 %v2093_v12, %v2090_v33  ;;  %v9798_v57 = vsel %vm590_vm0, %v2463_v55, %v2467_v24  ;;  %4088 = vmatpush.bf16.msrb.mxu0 %v7878_v31 }
 0x1cb   : > { %11416 = vst [vmem:[#allocation29_spill] sm:$0xff] %v9775_v0  ;;  %v2543_v22 = vrot.slane %v9731_v41, 5  ;;  %v2544_v16 = vrot.slane %v9715_v34, 6  ;;  %v2496_v3 = vrot.slane %v9712_v10, 5  ;;  %v2547_v33 = vrot.slane %v9772_v4, 5  ;;  %4122 = vmatpush.bf16.msrb.mxu1 %v7886_v19 }
 0x1cc   : > { %11417 = vst [vmem:[#allocation30_spill] sm:$0xff] %v9781_v21  ;;  %v1867_v21 = vpop.f32.mrf.mxu3  ;;  %v9803_v17 = vsel %vm535_vm1, %v2427_v53, %v2431_v46  ;;  %v11422_v55 = vrot.slane %v9603_v49, 5  ;;  %v2498_v53 = vrot.slane %v9701_v32, 5  ;;  %v11364_v31 = vshrl.u32 %v9701_v32, 16 }
 0x1cd   : > { %11418 = vst [vmem:[#allocation31_spill] sm:$0xff] %v9795_v14  ;;  %v1868_v12 = vadd.f32 %v1867_v21, %v1834_v25  ;;  %v9808_v14 = vpop.f32.mrf.mxu2  ;;  %v1801_v46 = vpop.f32.mrf.mxu0  ;;  %v2545_v20 = vor.u32 %v2544_v16, %v2543_v22  ;;  %v11424_v25 = vrot.slane %v9608_v36, 5  ;;  %v2554_v22 = vrot.slane %v9734_v2, 6 }
 0x1ce   : > { %11419 = vst [vmem:[#allocation32_spill] sm:$0xff] %v9798_v57  ;;  %v9813_v24 = vsel %vm2479_vm10, %v11422_v55, %v2494_v52  ;;  %v2548_v57 = vrot.slane %v9726_v38, 6  ;;  %v1802_v55 = vadd.f32 %v1801_v46, %v9560_v9  ;;  %v9828_v56 = vsel %vm2479_vm10, %v2494_v52, %v2498_v53 }
 0x1cf   : > { %11420 = vst [vmem:[#allocation33_spill] sm:$0xff] %v9803_v17  ;;  %v9818_v17 = vshll.u32 %v9493_v37, 16  ;;  %v9823_v21 = vsel %vm2479_vm10, %v11424_v25, %v2496_v3  ;;  %v2002_v1 = vmax.f32 %v1868_v12, 0.0  ;;  %v9832_v58 = vsel %vm2512_vm11, %v9677_v13, %v2545_v20 }
 0x1d0   : > { %11421 = vst [vmem:[#allocation34_spill] sm:$0xff] %v9808_v14  ;;  %v2549_v14 = vor.u32 %v2548_v57, %v2547_v33  ;;  %v2553_v16 = vrot.slane %v11364_v31, 5  ;;  %v2500_v19 = vrot.slane %v9722_v63, 5  ;;  %v11365_v52 = vshrl.u32 %v9722_v63, 16 }
 0x1d1   : > { %11423 = vst [vmem:[#allocation35_spill] sm:$0xff] %v9813_v24  ;;  %v1835_v24 = vpop.f32.mrf.mxu1  ;;  %v2096_v12 = vmul.f32 %v9397_v7, %v2002_v1  ;;  %v2560_v46 = vrot.slane %v9775_v0, 6  ;;  %v7877_v1 = vld [vmem:[#allocation2 + $0x1a8] sm:$0xff]  ;;  %v2447_v33 = vrot.slane %v9427_v15, 1  ;;  %v11432_v0 = vrot.slane %v9488_v40, 1 }
 0x1d2   : > { %11425 = vst [vmem:[#allocation36_spill] sm:$0xff] %v9823_v21  ;;  %v1836_v25 = vadd.f32 %v1835_v24, %v1802_v55  ;;  %v9841_v57 = vsel %vm2512_vm11, %v9697_v6, %v2549_v14  ;;  %v2555_v13 = vor.u32 %v2554_v22, %v2553_v16  ;;  %v9846_v53 = vsel %vm2479_vm10, %v2496_v3, %v2500_v19  ;;  %v7893_v21 = vld [vmem:[#allocation2 + $0x228] sm:$0xff] }
 0x1d3   : > { %11426 = vst [vmem:[#allocation37_spill] sm:$0xff] %v9828_v56  ;;  %v2135_v31 = vadd.f32 %v2134_v51, %v2096_v12  ;;  %v7901_v24 = vld [vmem:[#allocation2 + $0x268] sm:$0xff]  ;;  %v2559_v6 = vrot.slane %v11365_v52, 5  ;;  %v9855_v16 = vshrl.u32 %v9488_v40, 16  ;;  %v2367_v12 = vrot.slane %v9818_v17, 1  ;;  %4157 = vmatpush.bf16.msrb.mxu3 %v7893_v21  ;;  %4089 = vmatpush.bf16.msrb.mxu0 %v7877_v1 }
 0x1d4   : > { %11427 = vst [vmem:[#allocation38_spill] sm:$0xff] %v9832_v58  ;;  %v1869_v55 = vpop.f32.mrf.mxu3  ;;  %v7885_v3 = vld [vmem:[#allocation2 + $0x1e8] sm:$0xff]  ;;  %v9858_v22 = vsel %vm2512_vm11, %v2545_v20, %v2555_v13  ;;  %v2450_v56 = vrot.slane %v9433_v47, 1  ;;  %v11431_v58 = vshrl.u32 %v9427_v15, 16  ;;  %v2449_v20 = vsel %vm590_vm0, %v2447_v33, %v11432_v0  ;;  %4191 = vmatpush.bf16.msra.mxu2 %v7901_v24 }
 0x1d5   : > { %11428 = vst [vmem:[#allocation39_spill] sm:$0xff] %v9841_v57  ;;  %v2355_v57 = vrot.slane %v9788_v28, 1  ;;  %v1870_v51 = vadd.f32 %v1869_v55, %v1836_v25  ;;  %v9860_v19 = vpop.f32.mrf.mxu2  ;;  %v2561_v52 = vor.u32 %v2560_v46, %v2559_v6  ;;  %v11433_v25 = vshrl.u32 %v9433_v47, 16  ;;  %4123 = vmatpush.bf16.msrb.mxu1 %v7885_v3 }
 0x1d6   : > { %11429 = vst [vmem:[#allocation40_spill] sm:$0xff] %v9846_v53  ;;  %v1804_v53 = vpop.f32.mrf.mxu0  ;;  %v2351_v7 = vor.u32 %v9752_v26, %v11431_v58  ;;  %v11434_v46 = vrot.slane %v9493_v37, 1  ;;  %v2638_v0 = vrot.slane %v9855_v16, 2  ;;  %v2639_v33 = vrot.slane %v9788_v28, 3 }
 0x1d7   : > { %11430 = vst [vmem:[#allocation41_spill] sm:$0xff] %v9858_v22  ;;  %v2363_v13 = vor.u32 %v9756_v18, %v11433_v25  ;;  %v2007_v55 = vmax.f32 %v1870_v51, 0.0  ;;  %v1805_v21 = vadd.f32 %v1804_v53, %v9560_v9  ;;  %v9878_v26 = vsel %vm2512_vm11, %v2549_v14, %v2561_v52  ;;  %v7876_v51 = vld [vmem:[#allocation2 + $0x1a0] sm:$0xff] }
 0x1d8   : > { %v2452_v6 = vsel %vm590_vm0, %v2450_v56, %v11434_v46  ;;  %11435 = vst [vmem:[#allocation42_spill] sm:$0xff] %v9878_v26  ;;  %v2356_v58 = vsel %vm535_vm1, %v2351_v7, %v2355_v57  ;;  %v2641_v18 = vrot.slane %v9556_v30, 2  ;;  %4027 = vmatmul.bf16.vlgmr.msra.gmra.mxu3 %v2449_v20  ;;  %v2642_v56 = vrot.slane %v9541_v60, 3  ;;  %v7892_v7 = vld [vmem:[#allocation2 + $0x220] sm:$0xff]  ;;  %4090 = vmatpush.bf16.msrb.mxu0 %v7876_v51 }
 0x1d9   : > { %v1838_v1 = vpop.f32.mrf.mxu1  ;;  %v2099_v24 = vmul.f32 %v9417_v54, %v2007_v55  ;;  %3959 = vmatmul.bf16.vlgmr.msra.gmra.mxu0 %v2356_v58  ;;  %v2368_v53 = vsel %vm535_vm1, %v2363_v13, %v2367_v12  ;;  %4061 = vmatmul.bf16.vlgmr.msrb.gmra.mxu2 %v2452_v6  ;;  %v2640_v14 = vor.u32 %v2639_v33, %v2638_v0  ;;  %v7900_v25 = vld [vmem:[#allocation2 + $0x260] sm:$0xff]  ;;  %v2648_v30 = vrot.slane %v9581_v27, 2 }
 0x1da   : > { %v1839_v3 = vadd.f32 %v1838_v1, %v1805_v21  ;;  %3993 = vmatmul.bf16.vlgmr.msra.gmra.mxu1 %v2368_v53  ;;  %v9887_v46 = vor.u32 %v2642_v56, %v2641_v18  ;;  %v2649_v55 = vrot.slane %v9549_v11, 3  ;;  %v7884_v1 = vld [vmem:[#allocation2 + $0x1e0] sm:$0xff]  ;;  %4158 = vmatpush.bf16.msrb.mxu3 %v7892_v7  ;;  %v9900_v0 = vshrl.u32 %v9493_v37, 16 }
 0x1db   : > { %v2136_v52 = vadd.f32 %v2135_v31, %v2099_v24  ;;  %4192 = vmatpush.bf16.msra.mxu2 %v7900_v25  ;;  %4124 = vmatpush.bf16.msrb.mxu1 %v7884_v1  ;;  %v2371_v24 = vor.u32 %v9855_v16, %v2355_v57  ;;  %v11438_v7 = vrot.slane %v9488_v40, 1  ;;  %v11439_v25 = vrot.slane %v9536_v8, 1 }
 0x1dc   : > { %v1872_v21 = vpop.f32.mrf.mxu3  ;;  %v9895_v13 = vsel %vm742_vm3, %v2640_v14, %v9887_v46  ;;  %v9897_v31 = vor.u32 %v2649_v55, %v2648_v30  ;;  %v11437_v14 = vrot.slane %v9531_v23, 1  ;;  %v11440_v30 = vrot.slane %v9493_v37, 1 }
 0x1dd   : > { %v1873_v20 = vadd.f32 %v1872_v21, %v1839_v3  ;;  %v9891_v58 = vpop.f32.mrf.mxu2  ;;  %11436 = vst [vmem:[#allocation43_spill] sm:$0xff] %v9895_v13  ;;  %v2379_v3 = vor.u32 %v9900_v0, %v2367_v12  ;;  %v11369_v57 = vrot.slane %v9531_v23, 2  ;;  %v11442_v26 = vrot.slane %v9536_v8, 2 }
 0x1de   : > { %v1806_v6 = vpop.f32.mrf.mxu0  ;;  %v2454_v51 = vsel %vm590_vm0, %v11438_v7, %v11437_v14  ;;  %v2456_v55 = vsel %vm590_vm0, %v11440_v30, %v11439_v25  ;;  %v2615_v14 = vrot.slane %v9608_v36, 2  ;;  %v2584_v7 = vrot.slane %v9603_v49, 6 }
 0x1df   : > { %v2012_v27 = vmax.f32 %v1873_v20, 0.0  ;;  %v1807_v33 = vadd.f32 %v1806_v6, %v9560_v9  ;;  %v7891_v6 = vld [vmem:[#allocation2 + $0x218] sm:$0xff]  ;;  %v2652_v30 = vrot.slane %v9620_v29, 2  ;;  %v2656_v22 = vrot.slane %v9654_v5, 2 }
 0x1e0   : > { %4159 = vmatpush.bf16.msrb.mxu3 %v7891_v6  ;;  %v9937_v25 = vsel %vm695_vm2, %v11442_v26, %v2615_v14  ;;  %v11446_v6 = vrot.slane %v9608_v36, 6  ;;  %v2653_v26 = vrot.slane %v9611_v39, 3  ;;  %v2657_v39 = vrot.slane %v9615_v50, 3 }
 0x1e1   : > { %v1840_v18 = vpop.f32.mrf.mxu1  ;;  %v2102_v53 = vmul.f32 %v9463_v62, %v2012_v27  ;;  %v7875_v27 = vld [vmem:[#allocation2 + $0x198] sm:$0xff]  ;;  %11443 = vst [vmem:[#allocation45_spill] sm:$0xff] %v9937_v25 }
 0x1e2   : > { %v1841_v56 = vadd.f32 %v1840_v18, %v1807_v33  ;;  %v7899_v33 = vld [vmem:[#allocation2 + $0x258] sm:$0xff]  ;;  %v2613_v18 = vrot.slane %v9603_v49, 2  ;;  %4091 = vmatpush.bf16.msrb.mxu0 %v7875_v27  ;;  %v11447_v27 = vrot.slane %v9536_v8, 6  ;;  %v9966_v21 = vor.u32 %v2653_v26, %v2652_v30 }
 0x1e3   : > { %v2137_v20 = vadd.f32 %v2136_v52, %v2102_v53  ;;  %4193 = vmatpush.bf16.msra.mxu2 %v7899_v33 }
 0x1e4   : > { %v1874_v13 = vpop.f32.mrf.mxu3  ;;  %v9932_v53 = vsel %vm695_vm2, %v11369_v57, %v2613_v18  ;;  %v9950_v57 = vsel %vm2573_vm12, %v11447_v27, %v11446_v6  ;;  %v11452_v6 = vrot.slane %v9541_v60, 1  ;;  %v11456_v60 = vrot.slane %v9549_v11, 1 }
 0x1e5   : > { %v1875_v1 = vadd.f32 %v1874_v13, %v1841_v56  ;;  %v9927_v52 = vpop.f32.mrf.mxu2  ;;  %11441 = vst [vmem:[#allocation44_spill] sm:$0xff] %v9932_v53  ;;  %v11444_v13 = vrot.slane %v9531_v23, 6  ;;  %v11449_v53 = vrot.slane %v9603_v49, 3  ;;  %v9983_v50 = vsel %vm742_vm3, %v9887_v46, %v9966_v21 }
 0x1e6   : > { %v1809_v12 = vpop.f32.mrf.mxu0  ;;  %11448 = vst [vmem:[#allocation47_spill] sm:$0xff] %v9950_v57  ;;  %v2376_v27 = vsel %vm535_vm1, %v2371_v24, %v11452_v6  ;;  %v2384_v5 = vsel %vm535_vm1, %v2379_v3, %v11456_v60  ;;  %v9985_v24 = vor.u32 %v2657_v39, %v2656_v22  ;;  %v2588_v39 = vrot.slane %v9705_v43, 6 }
 0x1e7   : > { %v9943_v56 = vsel %vm2573_vm12, %v11444_v13, %v2584_v7  ;;  %v2017_v25 = vmax.f32 %v1875_v1, 0.0  ;;  %v1810_v29 = vadd.f32 %v1809_v12, %v9560_v9  ;;  %v11450_v13 = vrot.slane %v9531_v23, 3  ;;  %11457 = vst [vmem:[#allocation50_spill] sm:$0xff] %v9983_v50 }
 0x1e8   : > { %11445 = vst [vmem:[#allocation46_spill] sm:$0xff] %v9943_v56  ;;  %v11453_v12 = vrot.slane %v9608_v36, 3  ;;  %v11454_v1 = vrot.slane %v9536_v8, 3  ;;  %4032 = vmatmul.bf16.gmra.mxu3 %v2454_v51  ;;  %v2592_v60 = vrot.slane %v9701_v32, 6  ;;  %v2661_v50 = vrot.slane %v9715_v34, 3 }
 0x1e9   : > { %v1843_v33 = vpop.f32.mrf.mxu1  ;;  %v9960_v56 = vsel %vm786_vm4, %v11450_v13, %v11449_v53  ;;  %v2105_v53 = vmul.f32 %v9483_v48, %v2017_v25  ;;  %3964 = vmatmul.bf16.gmra.mxu0 %v2376_v27  ;;  %4066 = vmatmul.bf16.gmra.mxu2 %v2456_v55  ;;  %v9990_v25 = vsel %vm742_vm3, %v9897_v31, %v9985_v24  ;;  %v2619_v27 = vrot.slane %v9712_v10, 2 }
 0x1ea   : > { %11451 = vst [vmem:[#allocation48_spill] sm:$0xff] %v9960_v56  ;;  %v9974_v57 = vsel %vm786_vm4, %v11454_v1, %v11453_v12  ;;  %v1844_v13 = vadd.f32 %v1843_v33, %v1810_v29  ;;  %3998 = vmatmul.bf16.gmra.mxu1 %v2384_v5  ;;  %v11370_v1 = vrot.slane %v9701_v32, 2  ;;  %v2594_v56 = vrot.slane %v9722_v63, 6 }
 0x1eb   : > { %11455 = vst [vmem:[#allocation49_spill] sm:$0xff] %v9974_v57  ;;  %v2138_v30 = vadd.f32 %v2137_v20, %v2105_v53  ;;  %v2617_v20 = vrot.slane %v9705_v43, 2  ;;  %v2590_v53 = vrot.slane %v9712_v10, 6  ;;  %v7890_v57 = vld [vmem:[#allocation2 + $0x210] sm:$0xff] }
 0x1ec   : > { %v1877_v26 = vpop.f32.mrf.mxu3  ;;  %11458 = vst [vmem:[#allocation51_spill] sm:$0xff] %v9990_v25  ;;  %v10031_v25 = vsel %vm2573_vm12, %v2588_v39, %v2592_v60  ;;  %4160 = vmatpush.bf16.msrb.mxu3 %v7890_v57  ;;  %v11461_v57 = vshrl.u32 %v9701_v32, 16 }
 0x1ed   : > { %v1878_v51 = vadd.f32 %v1877_v26, %v1844_v13  ;;  %v9992_v11 = vpop.f32.mrf.mxu2  ;;  %v11371_v13 = vrot.slane %v9722_v63, 2 }
 0x1ee   : > { %v1811_v3 = vpop.f32.mrf.mxu0 }
 0x1ef   : > { %v2022_v29 = vmax.f32 %v1878_v51, 0.0  ;;  %v1812_v55 = vadd.f32 %v1811_v3, %v9560_v9  ;;  %v10009_v51 = vsel %vm695_vm2, %v2615_v14, %v2619_v27  ;;  %v10012_v3 = vsel %vm2573_vm12, %v2584_v7, %v2588_v39 }
 0x1f0   : > { %v10043_v39 = vsel %vm2573_vm12, %v2590_v53, %v2594_v56  ;;  %v2668_v56 = vrot.slane %v11461_v57, 2  ;;  %v11372_v57 = vrot.slane %v9722_v63, 3 }
 0x1f1   : > { %v1845_v33 = vpop.f32.mrf.mxu1  ;;  %v2108_v46 = vmul.f32 %v9501_v35, %v2022_v29 }
 0x1f2   : > { %v1846_v6 = vadd.f32 %v1845_v33, %v1812_v55  ;;  %v10017_v55 = vsel %vm695_vm2, %v2617_v20, %v11370_v1  ;;  %v11459_v33 = vrot.slane %v9608_v36, 6  ;;  %v7898_v1 = vld [vmem:[#allocation2 + $0x250] sm:$0xff] }
 0x1f3   : > { %v2139_v22 = vadd.f32 %v2138_v30, %v2108_v46  ;;  %v10006_v30 = vsel %vm695_vm2, %v2613_v18, %v2617_v20  ;;  %v10027_v18 = vsel %vm695_vm2, %v2619_v27, %v11371_v13  ;;  %v7874_v20 = vld [vmem:[#allocation2 + $0x190] sm:$0xff]  ;;  %4194 = vmatpush.bf16.msra.mxu2 %v7898_v1  ;;  %v11463_v1 = vshrl.u32 %v9722_v63, 16 }
 0x1f4   : > { %v1879_v12 = vpop.f32.mrf.mxu3  ;;  %v10022_v46 = vsel %vm2573_vm12, %v11459_v33, %v2590_v53  ;;  %v2660_v33 = vrot.slane %v9731_v41, 2  ;;  %v2664_v41 = vrot.slane %v9772_v4, 2  ;;  %4092 = vmatpush.bf16.msrb.mxu0 %v7874_v20 }
 0x1f5   : > { %v1880_v5 = vadd.f32 %v1879_v12, %v1846_v6  ;;  %v10003_v26 = vpop.f32.mrf.mxu2  ;;  %v7883_v12 = vld [vmem:[#allocation2 + $0x1d8] sm:$0xff] }
 0x1f6   : > { %v1814_v29 = vpop.f32.mrf.mxu0  ;;  %v2662_v60 = vor.u32 %v2661_v50, %v2660_v33  ;;  %4125 = vmatpush.bf16.msrb.mxu1 %v7883_v12  ;;  %v2669_v50 = vrot.slane %v9734_v2, 3 }
 0x1f7   : > { %v2027_v14 = vmax.f32 %v1880_v5, 0.0  ;;  %v1815_v7 = vadd.f32 %v1814_v29, %v9560_v9  ;;  %v2706_v5 = vrot.slane %v9705_v43, 3  ;;  %v7882_v29 = vld [vmem:[#allocation2 + $0x1d0] sm:$0xff] }
 0x1f8   : > { %4037 = vmatmul.bf16.gmra.mxu3 %v9630_v45  ;;  %v10055_v4 = vsel %vm742_vm3, %v9966_v21, %v2662_v60  ;;  %v2672_v21 = vrot.slane %v11463_v1, 2  ;;  %v10070_v12 = vor.u32 %v2669_v50, %v2668_v56 }
 0x1f9   : > { %v1848_v6 = vpop.f32.mrf.mxu1  ;;  %v2111_v27 = vmul.f32 %v9524_v42, %v2027_v14  ;;  %3969 = vmatmul.bf16.gmra.mxu0 %v9646_v61  ;;  %4071 = vmatmul.bf16.gmra.mxu2 %v9639_v59  ;;  %v7889_v14 = vld [vmem:[#allocation2 + $0x208] sm:$0xff]  ;;  %v11460_v61 = vrot.slane %v9603_v49, 3  ;;  %v2708_v59 = vrot.slane %v9712_v10, 3  ;;  %v11373_v49 = vrot.slane %v9701_v32, 3 }
 0x1fa   : > { %v1849_v13 = vadd.f32 %v1848_v6, %v1815_v7  ;;  %4003 = vmatmul.bf16.gmra.mxu1 %v9651_v44  ;;  %v2665_v44 = vrot.slane %v9726_v38, 3  ;;  %v11462_v10 = vrot.slane %v9608_v36, 3  ;;  %11464 = vst [vmem:[#allocation52_spill] sm:$0xff] %v10070_v12  ;;  %4161 = vmatpush.bf16.msrb.mxu3 %v7889_v14  ;;  %v11468_v14 = vld [vmem:[#allocation14_spill] sm:$0xff] }
 0x1fb   : > { %v2140_v34 = vadd.f32 %v2139_v22, %v2111_v27  ;;  %v10049_v45 = vsel %vm786_vm4, %v11460_v61, %v2706_v5  ;;  %v10075_v2 = vsel %vm786_vm4, %v2706_v5, %v11373_v49  ;;  %4126 = vmatpush.bf16.msrb.mxu1 %v7882_v29  ;;  %v7897_v61 = vld [vmem:[#allocation2 + $0x248] sm:$0xff]  ;;  %v10086_v5 = vsel %vm742_vm3, %v2662_v60, %v10070_v12  ;;  %v11472_v49 = vld [vmem:[#allocation15_spill] sm:$0xff]  ;;  %v7927_v12 = vld [vmem:[#allocation2 + $0x338] sm:$0xff] }
 0x1fc   : > { %v1882_v43 = vpop.f32.mrf.mxu3  ;;  %v2666_v38 = vor.u32 %v2665_v44, %v2664_v41  ;;  %v10066_v7 = vsel %vm786_vm4, %v11462_v10, %v2708_v59  ;;  %11465 = vst [vmem:[#allocation53_spill] sm:$0xff] %v10075_v2  ;;  %v7873_v41 = vld [vmem:[#allocation2 + $0x188] sm:$0xff]  ;;  %4195 = vmatpush.bf16.msra.mxu2 %v7897_v61  ;;  %v7888_v61 = vld [vmem:[#allocation2 + $0x200] sm:$0xff] }
 0x1fd   : > { %v1883_v22 = vadd.f32 %v1882_v43, %v1849_v13  ;;  %v10061_v53 = vpop.f32.mrf.mxu2  ;;  %v11466_v13 = vld [vmem:[#allocation29_spill] sm:$0xff]  ;;  %v7881_v44 = vld [vmem:[#allocation2 + $0x1c8] sm:$0xff]  ;;  %4093 = vmatpush.bf16.msrb.mxu0 %v7873_v41 }
 0x1fe   : > { %v1816_v6 = vpop.f32.mrf.mxu0  ;;  %v2673_v20 = vrot.slane %v11466_v13, 3  ;;  %v10081_v43 = vsel %vm742_vm3, %v9985_v24, %v2666_v38  ;;  %v10099_v24 = vsel %vm786_vm4, %v2708_v59, %v11372_v57  ;;  %v7872_v59 = vld [vmem:[#allocation2 + $0x180] sm:$0xff]  ;;  %4162 = vmatpush.bf16.msrb.mxu3 %v7888_v61 }
 0x1ff   : > { %v2032_v33 = vmax.f32 %v1883_v22, 0.0  ;;  %v1817_v27 = vadd.f32 %v1816_v6, %v9560_v9  ;;  %v8188_v9 = vld [vmem:[%s11318_s2] sm:$0x1f]  ;;  %11469 = vst [vmem:[#allocation14_spill] sm:$0xff] %v10099_v24  ;;  %4127 = vmatpush.bf16.msrb.mxu1 %v7881_v44  ;;  %v11474_v44 = vld [vmem:[#allocation24_spill] sm:$0xff] }
 0x200   : > { %v10088_v56 = vor.u32 %v2673_v20, %v2672_v21  ;;  %v10093_v29 = vperm.slane %v8188_v9, 4  ;;  %v11471_v21 = vld [vmem:[#allocation20_spill] sm:$0xff]  ;;  %v7896_v9 = vld [vmem:[#allocation2 + $0x240] sm:$0xff] }
 0x201   : > { %v1850_v36 = vpop.f32.mrf.mxu1  ;;  %v2114_v50 = vmul.f32 %v11468_v14, %v2032_v33  ;;  %v7880_v57 = vld [vmem:[#allocation2 + $0x1c0] sm:$0xff]  ;;  %4094 = vmatpush.bf16.msrb.mxu0 %v7872_v59  ;;  %4196 = vmatpush.bf16.msra.mxu2 %v7896_v9 }
 0x202   : > { %11467 = vst [vmem:[#allocation29_spill] sm:$0xff] %v10088_v56  ;;  %v1851_v22 = vadd.f32 %v1850_v36, %v1817_v27  ;;  %v10103_v60 = vsel %vm742_vm3, %v2666_v38, %v10088_v56  ;;  %v1897_v6 = vadd.f32 %v11471_v21, %v10093_v29  ;;  %4291 = vmatpush.bf16.msra.mxu3 %v7927_v12 }
 0x203   : > { %11470 = vst [vmem:[#allocation54_spill] sm:$0xff] %v10103_v60  ;;  %v2141_v10 = vadd.f32 %v2140_v34, %v2114_v50  ;;  %v11473_v34 = vld [vmem:[#allocation26_spill] sm:$0xff]  ;;  %v10115_v50 = vld [vmem:[%s11320_s4] ss:$0 sm:$0xff]  ;;  %4128 = vmatpush.bf16.msrb.mxu1 %v7880_v57 }
 0x204   : > { %v1884_v1 = vpop.f32.mrf.mxu3 }
 0x205   : > { %v1885_v13 = vadd.f32 %v1884_v1, %v1851_v22  ;;  %v10107_v20 = vpop.f32.mrf.mxu2  ;;  %v11475_v22 = vld [vmem:[#allocation27_spill] sm:$0xff]  ;;  %v11476_v1 = vld [vmem:[#allocation25_spill] sm:$0xff] }
 0x206   : > { %v1930_v33 = vpop.f32.mrf.mxu0 }
 0x207   : > { %v2037_v27 = vmax.f32 %v1885_v13, 0.0  ;;  %v1931_v36 = vadd.f32 %v1930_v33, %v1897_v6  ;;  %v11478_v13 = vld [vmem:[#allocation23_spill] sm:$0xff] }
 0x208   : > { %4042 = vmatmul.bf16.gmra.mxu3 %v11474_v44  ;;  %v1899_v33 = vadd.f32 %v11478_v13, %v10093_v29 }
 0x209   : > { %v1964_v41 = vpop.f32.mrf.mxu1  ;;  %v2117_v38 = vmul.f32 %v11472_v49, %v2037_v27  ;;  %3974 = vmatmul.bf16.gmra.mxu0 %v11473_v34  ;;  %4076 = vmatmul.bf16.gmra.mxu2 %v11476_v1  ;;  %v7911_v1 = vld [vmem:[#allocation2 + $0x2b8] sm:$0xff] }
 0x20a   : > { %v1965_v56 = vadd.f32 %v1964_v41, %v1931_v36  ;;  %4008 = vmatmul.bf16.gmra.mxu1 %v11475_v22  ;;  %4223 = vmatpush.bf16.msra.mxu0 %v7911_v1  ;;  %v7910_v1 = vld [vmem:[#allocation2 + $0x2b0] sm:$0xff] }
 0x20b   : > { %v10119_v21 = vadd.f32 %v2141_v10, %v2117_v38  ;;  %v7935_v10 = vld [vmem:[#allocation2 + $0x378] sm:$0xff] }
 0x20c   : > { %v3892_v6 = vpop.f32.mrf.mxu3  ;;  %v7919_v38 = vld [vmem:[#allocation2 + $0x2f8] sm:$0xff]  ;;  %v1993_v61 = vmax.f32 %v1965_v56, 0.0  ;;  %4325 = vmatpush.bf16.msrb.mxu2 %v7935_v10  ;;  %v7934_v10 = vld [vmem:[#allocation2 + $0x370] sm:$0xff] }
 0x20d   : > { %11477 = vst [vmem:[#allocation20_spill] sm:$0xff] %v10119_v21  ;;  %v3893_v27 = vadd.f32 %v10115_v50, %v3892_v6  ;;  %v3926_v36 = vpop.f32.mrf.mxu2  ;;  %4257 = vmatpush.bf16.msra.mxu1 %v7919_v38  ;;  %v11479_v6 = vld [vmem:[#allocation34_spill] sm:$0xff]  ;;  %v11480_v21 = vld [vmem:[#allocation5_spill] sm:$0xff] }
 0x20e   : > { %v1932_v41 = vpop.f32.mrf.mxu0  ;;  %v1902_v13 = vadd.f32 %v11479_v6, %v10093_v29  ;;  %v11483_v6 = vld [vmem:[#allocation28_spill] sm:$0xff]  ;;  %4224 = vmatpush.bf16.msra.mxu0 %v7910_v1  ;;  %v2517_v1 = vrot.slane %v9788_v28, 6 }
 0x20f   : > { %v10124_v34 = vadd.f32 %v3926_v36, %v3893_v27  ;;  %v1933_v44 = vadd.f32 %v1932_v41, %v1899_v33  ;;  %v2091_v27 = vmul.f32 %v11480_v21, %v1993_v61  ;;  %v11481_v36 = vld [vmem:[#allocation6_spill] sm:$0xff]  ;;  %v11484_v61 = vld [vmem:[#allocation33_spill] sm:$0xff]  ;;  %v11487_v21 = vld [vmem:[#allocation11_spill] sm:$0xff] }
 0x210   : > { %4326 = vmatpush.bf16.msrb.mxu2 %v7934_v10 }
 0x211   : > { %v1966_v22 = vpop.f32.mrf.mxu1 }
 0x212   : > { %v1967_v59 = vadd.f32 %v1966_v22, %v1933_v44  ;;  %v7926_v22 = vld [vmem:[#allocation2 + $0x330] sm:$0xff] }
 0x213   : > { %4292 = vmatpush.bf16.msra.mxu3 %v7926_v22  ;;  %v2516_v22 = vrot.slane %v9855_v16, 5 }
 0x214   : > { %v1998_v57 = vmax.f32 %v1967_v59, 0.0  ;;  %v3894_v9 = vpop.f32.mrf.mxu3  ;;  %v11482_v59 = vld [vmem:[#allocation30_spill] sm:$0xff] }
 0x215   : > { %v3895_v41 = vadd.f32 %v10115_v50, %v3894_v9  ;;  %v3928_v24 = vpop.f32.mrf.mxu2 }
 0x216   : > { %v2094_v33 = vmul.f32 %v11481_v36, %v1998_v57  ;;  %v1935_v60 = vpop.f32.mrf.mxu0  ;;  %v11485_v57 = vld [vmem:[#allocation32_spill] sm:$0xff] }
 0x217   : > { %v10131_v56 = vadd.f32 %v3928_v24, %v3895_v41  ;;  %v1936_v12 = vadd.f32 %v1935_v60, %v1902_v13  ;;  %v1904_v24 = vadd.f32 %v9860_v19, %v10093_v29  ;;  %v11486_v60 = vld [vmem:[#allocation7_spill] sm:$0xff]  ;;  %v2523_v19 = vrot.slane %v9900_v0, 5 }
 0x218   : > { %v2149_v2 = vadd.f32 %v2094_v33, %v2091_v27  ;;  %4047 = vmatmul.bf16.gmra.mxu3 %v11483_v6 }
 0x219   : > { %v1969_v44 = vpop.f32.mrf.mxu1  ;;  %3979 = vmatmul.bf16.gmra.mxu0 %v11482_v59  ;;  %4081 = vmatmul.bf16.gmra.mxu2 %v11485_v57  ;;  %v7918_v57 = vld [vmem:[#allocation2 + $0x2f0] sm:$0xff] }
 0x21a   : > { %v1970_v38 = vadd.f32 %v1969_v44, %v1936_v12  ;;  %4013 = vmatmul.bf16.gmra.mxu1 %v11484_v61 }
 0x21b   : > { %4258 = vmatpush.bf16.msra.mxu1 %v7918_v57 }
 0x21c   : > { %v2003_v9 = vmax.f32 %v1970_v38, 0.0  ;;  %v3897_v27 = vpop.f32.mrf.mxu3  ;;  %v7925_v38 = vld [vmem:[#allocation2 + $0x328] sm:$0xff] }
 0x21d   : > { %v3898_v33 = vadd.f32 %v10115_v50, %v3897_v27  ;;  %v3931_v41 = vpop.f32.mrf.mxu2  ;;  %4293 = vmatpush.bf16.msra.mxu3 %v7925_v38 }
 0x21e   : > { %v2097_v13 = vmul.f32 %v11486_v60, %v2003_v9  ;;  %v1937_v12 = vpop.f32.mrf.mxu0  ;;  %v2524_v9 = vrot.slane %v9818_v17, 6 }
 0x21f   : > { %v10141_v59 = vadd.f32 %v3931_v41, %v3898_v33  ;;  %v1938_v6 = vadd.f32 %v1937_v12, %v1904_v24  ;;  %v1907_v33 = vadd.f32 %v9891_v58, %v10093_v29  ;;  %v7933_v24 = vld [vmem:[#allocation2 + $0x368] sm:$0xff] }
 0x220   : > { %v2150_v44 = vadd.f32 %v2149_v2, %v2097_v13  ;;  %v2481_v2 = vrot.slane %v9488_v40, 5  ;;  %v2518_v13 = vor.u32 %v2517_v1, %v2516_v22  ;;  %v2525_v12 = vor.u32 %v2524_v9, %v2523_v19  ;;  %v7909_v1 = vld [vmem:[#allocation2 + $0x2a8] sm:$0xff]  ;;  %4327 = vmatpush.bf16.msrb.mxu2 %v7933_v24  ;;  %v7916_v24 = vld [vmem:[#allocation2 + $0x2e0] sm:$0xff] }
 0x221   : > { %v1971_v61 = vpop.f32.mrf.mxu1  ;;  %v2483_v22 = vrot.slane %v9433_v47, 5  ;;  %v7917_v19 = vld [vmem:[#allocation2 + $0x2e8] sm:$0xff]  ;;  %4225 = vmatpush.bf16.msra.mxu0 %v7909_v1  ;;  %v7932_v1 = vld [vmem:[#allocation2 + $0x360] sm:$0xff] }
 0x222   : > { %v1972_v10 = vadd.f32 %v1971_v61, %v1938_v6  ;;  %v2480_v61 = vrot.slane %v9427_v15, 5  ;;  %4259 = vmatpush.bf16.msra.mxu1 %v7917_v19 }
 0x224   : > { %v2008_v27 = vmax.f32 %v1972_v10, 0.0  ;;  %v3899_v60 = vpop.f32.mrf.mxu3  ;;  %v2482_v58 = vsel %vm2479_vm10, %v2480_v61, %v2481_v2  ;;  %4328 = vmatpush.bf16.msrb.mxu2 %v7932_v1  ;;  %v11497_v1 = vrot.slane %v9493_v37, 5 }
 0x225   : > { %v3900_v28 = vadd.f32 %v10115_v50, %v3899_v60  ;;  %v3933_v41 = vpop.f32.mrf.mxu2 }
 0x226   : > { %v2100_v16 = vmul.f32 %v9417_v54, %v2008_v27  ;;  %v1940_v6 = vpop.f32.mrf.mxu0  ;;  %v11488_v27 = vld [vmem:[#allocation10_spill] sm:$0xff]  ;;  %4260 = vmatpush.bf16.msra.mxu1 %v7916_v24  ;;  %v11498_v24 = vld [vmem:[#allocation17_spill] sm:$0xff] }
 0x227   : > { %v10154_v38 = vadd.f32 %v3933_v41, %v3900_v28  ;;  %v1941_v10 = vadd.f32 %v1940_v6, %v1907_v33  ;;  %v11489_v54 = vor.u32 %v11487_v21, %v11488_v27  ;;  %v11492_v28 = vld [vmem:[#allocation12_spill] sm:$0xff] }
 0x228   : > { %v2151_v57 = vadd.f32 %v2150_v44, %v2100_v16  ;;  %v11490_v44 = vrot.slane %v9493_v37, 5  ;;  %v11491_v16 = vld [vmem:[#allocation13_spill] sm:$0xff] }
 0x229   : > { %v1974_v36 = vpop.f32.mrf.mxu1  ;;  %v2519_v60 = vsel %vm2512_vm11, %v11489_v54, %v2518_v13  ;;  %4095 = vmatmul.bf16.vlgmr.msrb.gmra.mxu0 %v2482_v58  ;;  %v11493_v41 = vor.u32 %v11491_v16, %v11492_v28  ;;  %v1909_v54 = vadd.f32 %v9927_v52, %v10093_v29  ;;  %v7924_v16 = vld [vmem:[#allocation2 + $0x320] sm:$0xff] }
 0x22a   : > { %v1975_v9 = vadd.f32 %v1974_v36, %v1941_v10  ;;  %4163 = vmatmul.bf16.vlgmr.msrb.gmra.mxu3 %v2519_v60  ;;  %v2485_v33 = vsel %vm2479_vm10, %v2483_v22, %v11490_v44 }
 0x22b   : > { %v2526_v6 = vsel %vm2512_vm11, %v11493_v41, %v2525_v12  ;;  %4129 = vmatmul.bf16.vlgmr.msrb.gmra.mxu1 %v2485_v33  ;;  %4294 = vmatpush.bf16.msra.mxu3 %v7924_v16  ;;  %v1912_v41 = vadd.f32 %v9992_v11, %v10093_v29  ;;  %v11496_v11 = vrot.slane %v9536_v8, 5 }
 0x22c   : > { %4197 = vmatmul.bf16.vlgmr.msra.gmra.mxu2 %v2526_v6  ;;  %v2013_v61 = vmax.f32 %v1975_v9, 0.0  ;;  %v3902_v21 = vpop.f32.mrf.mxu3  ;;  %v7908_v9 = vld [vmem:[#allocation2 + $0x2a0] sm:$0xff] }
 0x22d   : > { %v3903_v10 = vadd.f32 %v10115_v50, %v3902_v21  ;;  %v3936_v22 = vpop.f32.mrf.mxu2  ;;  %4226 = vmatpush.bf16.msra.mxu0 %v7908_v9 }
 0x22e   : > { %v2103_v36 = vmul.f32 %v9463_v62, %v2013_v61  ;;  %v1942_v58 = vpop.f32.mrf.mxu0 }
 0x22f   : > { %v10173_v60 = vadd.f32 %v3936_v22, %v3903_v10  ;;  %v1943_v44 = vadd.f32 %v1942_v58, %v1909_v54  ;;  %v11494_v58 = vrot.slane %v9531_v23, 5 }
 0x230   : > { %v2152_v27 = vadd.f32 %v2151_v57, %v2103_v36 }
 0x231   : > { %v1976_v33 = vpop.f32.mrf.mxu1 }
 0x232   : > { %v1977_v28 = vadd.f32 %v1976_v33, %v1943_v44  ;;  %v2487_v44 = vsel %vm2479_vm10, %v2481_v2, %v11494_v58  ;;  %v11495_v33 = vld [vmem:[#allocation16_spill] sm:$0xff]  ;;  %v1914_v2 = vadd.f32 %v10003_v26, %v10093_v29  ;;  %v1917_v26 = vadd.f32 %v10061_v53, %v10093_v29 }
 0x233   : > { %v2530_v16 = vsel %vm2512_vm11, %v2518_v13, %v11495_v33  ;;  %v7907_v33 = vld [vmem:[#allocation2 + $0x298] sm:$0xff] }
 0x234   : > { %v2018_v52 = vmax.f32 %v1977_v28, 0.0  ;;  %v3904_v19 = vpop.f32.mrf.mxu3  ;;  %v2534_v28 = vsel %vm2512_vm11, %v2525_v12, %v11498_v24  ;;  %4227 = vmatpush.bf16.msra.mxu0 %v7907_v33  ;;  %v7905_v33 = vld [vmem:[#allocation2 + $0x288] sm:$0xff] }
 0x235   : > { %v3905_v6 = vadd.f32 %v10115_v50, %v3904_v19  ;;  %v3938_v61 = vpop.f32.mrf.mxu2 }
 0x236   : > { %v2106_v57 = vmul.f32 %v9483_v48, %v2018_v52  ;;  %v1945_v21 = vpop.f32.mrf.mxu0 }
 0x237   : > { %v10179_v36 = vadd.f32 %v3938_v61, %v3905_v6  ;;  %v1946_v10 = vadd.f32 %v1945_v21, %v1912_v41 }
 0x238   : > { %v2153_v54 = vadd.f32 %v2152_v27, %v2106_v57  ;;  %v2489_v27 = vsel %vm2479_vm10, %v11497_v1, %v11496_v11  ;;  %v7915_v11 = vld [vmem:[#allocation2 + $0x2d8] sm:$0xff] }
 0x239   : > { %v1979_v22 = vpop.f32.mrf.mxu1  ;;  %4100 = vmatmul.bf16.gmra.mxu0 %v2487_v44  ;;  %v7923_v44 = vld [vmem:[#allocation2 + $0x318] sm:$0xff]  ;;  %4261 = vmatpush.bf16.msra.mxu1 %v7915_v11  ;;  %v7913_v11 = vld [vmem:[#allocation2 + $0x2c8] sm:$0xff] }
 0x23a   : > { %v1980_v9 = vadd.f32 %v1979_v22, %v1946_v10  ;;  %4168 = vmatmul.bf16.gmra.mxu3 %v2530_v16  ;;  %v7931_v16 = vld [vmem:[#allocation2 + $0x358] sm:$0xff] }
 0x23b   : > { %4134 = vmatmul.bf16.gmra.mxu1 %v2489_v27  ;;  %4295 = vmatpush.bf16.msra.mxu3 %v7923_v44 }
 0x23c   : > { %4202 = vmatmul.bf16.gmra.mxu2 %v2534_v28  ;;  %v2023_v52 = vmax.f32 %v1980_v9, 0.0  ;;  %v3907_v19 = vpop.f32.mrf.mxu3 }
 0x23d   : > { %v3908_v41 = vadd.f32 %v10115_v50, %v3907_v19  ;;  %v3941_v57 = vpop.f32.mrf.mxu2  ;;  %4329 = vmatpush.bf16.msrb.mxu2 %v7931_v16 }
 0x23e   : > { %v2109_v13 = vmul.f32 %v9501_v35, %v2023_v52  ;;  %v1947_v6 = vpop.f32.mrf.mxu0 }
 0x23f   : > { %v10197_v21 = vadd.f32 %v3941_v57, %v3908_v41  ;;  %v1948_v10 = vadd.f32 %v1947_v6, %v1914_v2  ;;  %v7906_v41 = vld [vmem:[#allocation2 + $0x290] sm:$0xff] }
 0x240   : > { %v2154_v61 = vadd.f32 %v2153_v54, %v2109_v13  ;;  %v7922_v13 = vld [vmem:[#allocation2 + $0x310] sm:$0xff]  ;;  %4228 = vmatpush.bf16.msra.mxu0 %v7906_v41 }
 0x241   : > { %v1981_v22 = vpop.f32.mrf.mxu1  ;;  %v7930_v57 = vld [vmem:[#allocation2 + $0x350] sm:$0xff]  ;;  %4296 = vmatpush.bf16.msra.mxu3 %v7922_v13 }
 0x242   : > { %v1982_v58 = vadd.f32 %v1981_v22, %v1948_v10  ;;  %v7914_v6 = vld [vmem:[#allocation2 + $0x2d0] sm:$0xff]  ;;  %v11499_v10 = vld [vmem:[#allocation18_spill] sm:$0xff]  ;;  %4330 = vmatpush.bf16.msrb.mxu2 %v7930_v57 }
 0x243   : > { %v11500_v22 = vld [vmem:[#allocation22_spill] sm:$0xff]  ;;  %4262 = vmatpush.bf16.msra.mxu1 %v7914_v6  ;;  %v7920_v6 = vld [vmem:[#allocation2 + $0x300] sm:$0xff] }
 0x244   : > { %v2028_v12 = vmax.f32 %v1982_v58, 0.0  ;;  %v3909_v9 = vpop.f32.mrf.mxu3  ;;  %v11501_v58 = vld [vmem:[#allocation19_spill] sm:$0xff]  ;;  %4229 = vmatpush.bf16.msra.mxu0 %v7905_v33 }
 0x245   : > { %v3910_v27 = vadd.f32 %v10115_v50, %v3909_v9  ;;  %v3943_v24 = vpop.f32.mrf.mxu2  ;;  %v7929_v9 = vld [vmem:[#allocation2 + $0x348] sm:$0xff] }
 0x246   : > { %v2112_v1 = vmul.f32 %v9524_v42, %v2028_v12  ;;  %v1950_v54 = vpop.f32.mrf.mxu0  ;;  %v11502_v12 = vld [vmem:[#allocation31_spill] sm:$0xff]  ;;  %4331 = vmatpush.bf16.msrb.mxu2 %v7929_v9 }
 0x247   : > { %v10203_v52 = vadd.f32 %v3943_v24, %v3910_v27  ;;  %v1951_v19 = vadd.f32 %v1950_v54, %v1917_v26  ;;  %v1919_v26 = vadd.f32 %v10107_v20, %v10093_v29  ;;  %4263 = vmatpush.bf16.msra.mxu1 %v7913_v11  ;;  %v7912_v29 = vld [vmem:[#allocation2 + $0x2c0] sm:$0xff] }
 0x248   : > { %v2155_v28 = vadd.f32 %v2154_v61, %v2112_v1  ;;  %v7921_v61 = vld [vmem:[#allocation2 + $0x308] sm:$0xff] }
 0x249   : > { %v1984_v2 = vpop.f32.mrf.mxu1  ;;  %4105 = vmatmul.bf16.gmra.mxu0 %v11499_v10  ;;  %4297 = vmatpush.bf16.msra.mxu3 %v7921_v61  ;;  %v7928_v10 = vld [vmem:[#allocation2 + $0x340] sm:$0xff] }
 0x24a   : > { %v1985_v53 = vadd.f32 %v1984_v2, %v1951_v19  ;;  %4173 = vmatmul.bf16.gmra.mxu3 %v11500_v22  ;;  %4332 = vmatpush.bf16.msrb.mxu2 %v7928_v10 }
 0x24b   : > { %4139 = vmatmul.bf16.gmra.mxu1 %v11501_v58 }
 0x24c   : > { %4207 = vmatmul.bf16.gmra.mxu2 %v11502_v12  ;;  %v2033_v44 = vmax.f32 %v1985_v53, 0.0  ;;  %v3912_v16 = vpop.f32.mrf.mxu3  ;;  %v7904_v53 = vld [vmem:[#allocation2 + $0x280] sm:$0xff]  ;;  %4264 = vmatpush.bf16.msra.mxu1 %v7912_v29  ;;  %v7951_v29 = vld [vmem:[#allocation2 + $0x3f8] sm:$0xff] }
 0x24d   : > { %v3913_v27 = vadd.f32 %v10115_v50, %v3912_v16  ;;  %v3946_v24 = vpop.f32.mrf.mxu2  ;;  %4298 = vmatpush.bf16.msra.mxu3 %v7920_v6  ;;  %4230 = vmatpush.bf16.msra.mxu0 %v7904_v53 }
 0x24e   : > { %v2115_v1 = vmul.f32 %v11468_v14, %v2033_v44  ;;  %v1952_v54 = vpop.f32.mrf.mxu0 }
 0x24f   : > { %v10213_v2 = vadd.f32 %v3946_v24, %v3913_v27  ;;  %v1953_v13 = vadd.f32 %v1952_v54, %v1919_v26  ;;  %v11503_v26 = vld [vmem:[#allocation35_spill] sm:$0xff]  ;;  %v7959_v27 = vld [vmem:[#allocation2 + $0x438] sm:$0xff] }
 0x250   : > { %v2156_v19 = vadd.f32 %v2155_v28, %v2115_v1  ;;  %v11504_v1 = vld [vmem:[#allocation38_spill] sm:$0xff]  ;;  %v11505_v24 = vld [vmem:[#allocation36_spill] sm:$0xff]  ;;  %v11506_v54 = vld [vmem:[#allocation39_spill] sm:$0xff]  ;;  %4393 = vmatpush.bf16.msrb.mxu1 %v7951_v29 }
 0x251   : > { %v1986_v41 = vpop.f32.mrf.mxu1  ;;  %4427 = vmatpush.bf16.msrb.mxu3 %v7959_v27  ;;  %v7957_v29 = vld [vmem:[#allocation2 + $0x428] sm:$0xff] }
 0x252   : > { %v1987_v57 = vadd.f32 %v1986_v41, %v1953_v13  ;;  %v7967_v13 = vld [vmem:[#allocation2 + $0x478] sm:$0xff] }
 0x253   : > { %4461 = vmatpush.bf16.msra.mxu2 %v7967_v13  ;;  %v11510_v13 = vld [vmem:[#allocation42_spill] sm:$0xff] }
 0x254   : > { %v2038_v20 = vmax.f32 %v1987_v57, 0.0  ;;  %v3914_v22 = vpop.f32.mrf.mxu3 }
 0x255   : > { %v3915_v58 = vadd.f32 %v10115_v50, %v3914_v22  ;;  %v3948_v12 = vpop.f32.mrf.mxu2  ;;  %v7943_v50 = vld [vmem:[#allocation2 + $0x3b8] sm:$0xff]  ;;  %v7958_v22 = vld [vmem:[#allocation2 + $0x430] sm:$0xff] }
 0x256   : > { %v2118_v28 = vmul.f32 %v11472_v49, %v2038_v20  ;;  %v3960_v44 = vpop.f32.mrf.mxu0  ;;  %4359 = vmatpush.bf16.msrb.mxu0 %v7943_v50  ;;  %4428 = vmatpush.bf16.msrb.mxu3 %v7958_v22  ;;  %v11509_v50 = vld [vmem:[#allocation40_spill] sm:$0xff]  ;;  %v7941_v22 = vld [vmem:[#allocation2 + $0x3a8] sm:$0xff] }
 0x257   : > { %v10219_v33 = vadd.f32 %v3948_v12, %v3915_v58  ;;  %v3961_v16 = vadd.f32 %v3960_v44, %v10124_v34 }
 0x258   : > { %v10217_v61 = vadd.f32 %v2156_v19, %v2118_v28 }
 0x259   : > { %v3994_v9 = vpop.f32.mrf.mxu1  ;;  %4110 = vmatmul.bf16.gmra.mxu0 %v11503_v26  ;;  %v7942_v26 = vld [vmem:[#allocation2 + $0x3b0] sm:$0xff] }
 0x25a   : > { %v3995_v11 = vadd.f32 %v3994_v9, %v3961_v16  ;;  %4178 = vmatmul.bf16.gmra.mxu3 %v11504_v1  ;;  %v7966_v1 = vld [vmem:[#allocation2 + $0x470] sm:$0xff]  ;;  %4360 = vmatpush.bf16.msrb.mxu0 %v7942_v26  ;;  %v2578_v26 = vrot.slane %v9493_v37, 6 }
 0x25b   : > { %4144 = vmatmul.bf16.gmra.mxu1 %v11505_v24  ;;  %v11507_v24 = vld [vmem:[#allocation37_spill] sm:$0xff]  ;;  %4462 = vmatpush.bf16.msra.mxu2 %v7966_v1 }
 0x25c   : > { %4212 = vmatmul.bf16.gmra.mxu2 %v11506_v54  ;;  %v4028_v19 = vpop.f32.mrf.mxu3  ;;  %v7950_v54 = vld [vmem:[#allocation2 + $0x3f0] sm:$0xff]  ;;  %4429 = vmatpush.bf16.msrb.mxu3 %v7957_v29  ;;  %v7940_v29 = vld [vmem:[#allocation2 + $0x3a0] sm:$0xff] }
 0x25d   : > { %v4029_v41 = vadd.f32 %v4028_v19, %v3995_v11  ;;  %v4062_v57 = vpop.f32.mrf.mxu2  ;;  %4394 = vmatpush.bf16.msrb.mxu1 %v7950_v54 }
 0x25e   : > { %v3962_v34 = vpop.f32.mrf.mxu0  ;;  %4361 = vmatpush.bf16.msrb.mxu0 %v7941_v22 }
 0x25f   : > { %v10226_v6 = vadd.f32 %v4062_v57, %v4029_v41  ;;  %v3963_v53 = vadd.f32 %v3962_v34, %v10131_v56  ;;  %v11508_v56 = vld [vmem:[#allocation41_spill] sm:$0xff] }
 0x261   : > { %v3996_v10 = vpop.f32.mrf.mxu1 }
 0x262   : > { %v3997_v20 = vadd.f32 %v3996_v10, %v3963_v53  ;;  %4362 = vmatpush.bf16.msrb.mxu0 %v7940_v29  ;;  %v11514_v29 = vld [vmem:[#allocation44_spill] sm:$0xff] }
 0x264   : > { %v4030_v28 = vpop.f32.mrf.mxu3 }
 0x265   : > { %v4031_v58 = vadd.f32 %v4030_v28, %v3997_v20  ;;  %v4064_v12 = vpop.f32.mrf.mxu2  ;;  %v7965_v28 = vld [vmem:[#allocation2 + $0x468] sm:$0xff] }
 0x266   : > { %v3965_v44 = vpop.f32.mrf.mxu0  ;;  %4463 = vmatpush.bf16.msra.mxu2 %v7965_v28 }
 0x267   : > { %v10229_v16 = vadd.f32 %v4064_v12, %v4031_v58  ;;  %v3966_v9 = vadd.f32 %v3965_v44, %v10141_v59  ;;  %v7949_v58 = vld [vmem:[#allocation2 + $0x3e8] sm:$0xff]  ;;  %v2575_v44 = vrot.slane %v9488_v40, 6 }
 0x268   : > { %4395 = vmatpush.bf16.msrb.mxu1 %v7949_v58 }
 0x269   : > { %v3999_v11 = vpop.f32.mrf.mxu1  ;;  %4115 = vmatmul.bf16.gmra.mxu0 %v11507_v24 }
 0x26a   : > { %v4000_v27 = vadd.f32 %v3999_v11, %v3966_v9  ;;  %4183 = vmatmul.bf16.gmra.mxu3 %v11508_v56 }
 0x26b   : > { %4149 = vmatmul.bf16.gmra.mxu1 %v11509_v50  ;;  %v2577_v50 = vrot.slane %v9433_v47, 6  ;;  %v7964_v47 = vld [vmem:[#allocation2 + $0x460] sm:$0xff] }
 0x26c   : > { %4217 = vmatmul.bf16.gmra.mxu2 %v11510_v13  ;;  %v4033_v19 = vpop.f32.mrf.mxu3  ;;  %v2610_v13 = vrot.slane %v9493_v37, 2 }
 0x26d   : > { %v4034_v41 = vadd.f32 %v4033_v19, %v4000_v27  ;;  %v4067_v57 = vpop.f32.mrf.mxu2  ;;  %v2607_v27 = vrot.slane %v9488_v40, 2  ;;  %4464 = vmatpush.bf16.msra.mxu2 %v7964_v47  ;;  %v11515_v47 = vrot.slane %v9536_v8, 6 }
 0x26e   : > { %v3967_v59 = vpop.f32.mrf.mxu0 }
 0x26f   : > { %v10236_v34 = vadd.f32 %v4067_v57, %v4034_v41  ;;  %v3968_v53 = vadd.f32 %v3967_v59, %v10154_v38  ;;  %v2574_v38 = vrot.slane %v9427_v15, 6  ;;  %v11511_v41 = vrot.slane %v9531_v23, 2 }
 0x270   : > { %v2579_v15 = vsel %vm2573_vm12, %v2577_v50, %v2578_v26 }
 0x271   : > { %v4001_v10 = vpop.f32.mrf.mxu1  ;;  %v2576_v19 = vsel %vm2573_vm12, %v2574_v38, %v2575_v44  ;;  %v2609_v57 = vsel %vm695_vm2, %v2607_v27, %v11511_v41  ;;  %v7955_v27 = vld [vmem:[#allocation2 + $0x418] sm:$0xff] }
 0x272   : > { %v4002_v20 = vadd.f32 %v4001_v10, %v3968_v53  ;;  %v11512_v53 = vrot.slane %v9536_v8, 2  ;;  %v7956_v10 = vld [vmem:[#allocation2 + $0x420] sm:$0xff] }
 0x273   : > { %4430 = vmatpush.bf16.msrb.mxu3 %v7956_v10 }
 0x274   : > { %v4035_v12 = vpop.f32.mrf.mxu3 }
 0x275   : > { %v4036_v9 = vadd.f32 %v4035_v12, %v4002_v20  ;;  %v4069_v11 = vpop.f32.mrf.mxu2  ;;  %v7948_v20 = vld [vmem:[#allocation2 + $0x3e0] sm:$0xff] }
 0x276   : > { %v3970_v1 = vpop.f32.mrf.mxu0  ;;  %4396 = vmatpush.bf16.msrb.mxu1 %v7948_v20  ;;  %v2583_v20 = vsel %vm2573_vm12, %v2578_v26, %v11515_v47  ;;  %v7946_v26 = vld [vmem:[#allocation2 + $0x3d0] sm:$0xff]  ;;  %v7945_v47 = vld [vmem:[#allocation2 + $0x3c8] sm:$0xff] }
 0x277   : > { %v10243_v24 = vadd.f32 %v4069_v11, %v4036_v9  ;;  %v3971_v56 = vadd.f32 %v3970_v1, %v10173_v60  ;;  %v2612_v60 = vsel %vm695_vm2, %v2610_v13, %v11512_v53  ;;  %4431 = vmatpush.bf16.msrb.mxu3 %v7955_v27  ;;  %v7947_v53 = vld [vmem:[#allocation2 + $0x3d8] sm:$0xff]  ;;  %v7938_v27 = vld [vmem:[#allocation2 + $0x390] sm:$0xff] }
 0x279   : > { %v4004_v54 = vpop.f32.mrf.mxu1  ;;  %4231 = vmatmul.bf16.vlgmr.msra.gmra.mxu0 %v2576_v19 }
 0x27a   : > { %v4005_v59 = vadd.f32 %v4004_v54, %v3971_v56  ;;  %4299 = vmatmul.bf16.vlgmr.msra.gmra.mxu3 %v2609_v57  ;;  %v7939_v56 = vld [vmem:[#allocation2 + $0x398] sm:$0xff]  ;;  %4397 = vmatpush.bf16.msrb.mxu1 %v7947_v53 }
 0x27b   : > { %4265 = vmatmul.bf16.vlgmr.msra.gmra.mxu1 %v2579_v15  ;;  %v7963_v54 = vld [vmem:[#allocation2 + $0x458] sm:$0xff]  ;;  %4363 = vmatpush.bf16.msrb.mxu0 %v7939_v56  ;;  %v7962_v56 = vld [vmem:[#allocation2 + $0x450] sm:$0xff] }
 0x27c   : > { %4333 = vmatmul.bf16.vlgmr.msrb.gmra.mxu2 %v2612_v60  ;;  %v4038_v22 = vpop.f32.mrf.mxu3 }
 0x27d   : > { %v4039_v28 = vadd.f32 %v4038_v22, %v4005_v59  ;;  %v4072_v58 = vpop.f32.mrf.mxu2  ;;  %4465 = vmatpush.bf16.msra.mxu2 %v7963_v54  ;;  %v11516_v22 = vld [vmem:[#allocation45_spill] sm:$0xff] }
 0x27e   : > { %v3972_v12 = vpop.f32.mrf.mxu0  ;;  %4398 = vmatpush.bf16.msrb.mxu1 %v7946_v26 }
 0x27f   : > { %v10256_v9 = vadd.f32 %v4072_v58, %v4039_v28  ;;  %v3973_v11 = vadd.f32 %v3972_v12, %v10179_v36  ;;  %v11513_v36 = vrot.slane %v9531_v23, 6  ;;  %v7954_v28 = vld [vmem:[#allocation2 + $0x410] sm:$0xff]  ;;  %4364 = vmatpush.bf16.msrb.mxu0 %v7938_v27  ;;  %v7960_v27 = vld [vmem:[#allocation2 + $0x440] sm:$0xff] }
 0x280   : > { %4432 = vmatpush.bf16.msrb.mxu3 %v7954_v28 }
 0x281   : > { %v4006_v1 = vpop.f32.mrf.mxu1  ;;  %v2581_v60 = vsel %vm2573_vm12, %v2575_v44, %v11513_v36  ;;  %4466 = vmatpush.bf16.msra.mxu2 %v7962_v56  ;;  %v7953_v36 = vld [vmem:[#allocation2 + $0x408] sm:$0xff]  ;;  %v7944_v56 = vld [vmem:[#allocation2 + $0x3c0] sm:$0xff] }
 0x282   : > { %v4007_v38 = vadd.f32 %v4006_v1, %v3973_v11  ;;  %4399 = vmatpush.bf16.msrb.mxu1 %v7945_v47 }
 0x284   : > { %v4040_v50 = vpop.f32.mrf.mxu3  ;;  %4433 = vmatpush.bf16.msrb.mxu3 %v7953_v36 }
 0x285   : > { %v4041_v13 = vadd.f32 %v4040_v50, %v4007_v38  ;;  %v4074_v19 = vpop.f32.mrf.mxu2 }
 0x286   : > { %v3975_v41 = vpop.f32.mrf.mxu0  ;;  %4400 = vmatpush.bf16.msrb.mxu1 %v7944_v56 }
 0x287   : > { %v10259_v57 = vadd.f32 %v4074_v19, %v4041_v13  ;;  %v3976_v59 = vadd.f32 %v3975_v41, %v10197_v21 }
 0x289   : > { %v4009_v15 = vpop.f32.mrf.mxu1  ;;  %4236 = vmatmul.bf16.gmra.mxu0 %v2581_v60 }
 0x28a   : > { %v4010_v10 = vadd.f32 %v4009_v15, %v3976_v59  ;;  %4304 = vmatmul.bf16.gmra.mxu3 %v11514_v29  ;;  %v7961_v29 = vld [vmem:[#allocation2 + $0x448] sm:$0xff] }
 0x28b   : > { %4270 = vmatmul.bf16.gmra.mxu1 %v2583_v20  ;;  %v11518_v20 = vld [vmem:[#allocation47_spill] sm:$0xff]  ;;  %4467 = vmatpush.bf16.msra.mxu2 %v7961_v29 }
 0x28c   : > { %4338 = vmatmul.bf16.gmra.mxu2 %v11516_v22  ;;  %v4043_v21 = vpop.f32.mrf.mxu3 }
 0x28d   : > { %v4044_v58 = vadd.f32 %v4043_v21, %v4010_v10  ;;  %v4077_v12 = vpop.f32.mrf.mxu2  ;;  %v7937_v10 = vld [vmem:[#allocation2 + $0x388] sm:$0xff] }
 0x28e   : > { %v3977_v11 = vpop.f32.mrf.mxu0  ;;  %4365 = vmatpush.bf16.msrb.mxu0 %v7937_v10 }
 0x28f   : > { %v10270_v1 = vadd.f32 %v4077_v12, %v4044_v58  ;;  %v3978_v44 = vadd.f32 %v3977_v11, %v10203_v52  ;;  %v11517_v52 = vld [vmem:[#allocation46_spill] sm:$0xff]  ;;  %4468 = vmatpush.bf16.msra.mxu2 %v7960_v27 }
 0x291   : > { %v4011_v38 = vpop.f32.mrf.mxu1 }
 0x292   : > { %v4012_v54 = vadd.f32 %v4011_v38, %v3978_v44  ;;  %v7952_v44 = vld [vmem:[#allocation2 + $0x400] sm:$0xff] }
 0x293   : > { %v7936_v38 = vld [vmem:[#allocation2 + $0x380] sm:$0xff]  ;;  %4434 = vmatpush.bf16.msrb.mxu3 %v7952_v44 }
 0x294   : > { %v4045_v50 = vpop.f32.mrf.mxu3  ;;  %4366 = vmatpush.bf16.msrb.mxu0 %v7936_v38 }
 0x295   : > { %v4046_v13 = vadd.f32 %v4045_v50, %v4012_v54  ;;  %v4079_v19 = vpop.f32.mrf.mxu2 }
 0x296   : > { %v3980_v41 = vpop.f32.mrf.mxu0 }
 0x297   : > { %v10273_v59 = vadd.f32 %v4079_v19, %v4046_v13  ;;  %v3981_v15 = vadd.f32 %v3980_v41, %v10213_v2 }
 0x299   : > { %v4014_v53 = vpop.f32.mrf.mxu1  ;;  %4241 = vmatmul.bf16.gmra.mxu0 %v11517_v52 }
 0x29a   : > { %v4015_v60 = vadd.f32 %v4014_v53, %v3981_v15  ;;  %4309 = vmatmul.bf16.gmra.mxu3 %v10006_v30 }
 0x29b   : > { %4275 = vmatmul.bf16.gmra.mxu1 %v11518_v20  ;;  %v11519_v20 = vmov 0  }
 0x29c   : > { %4343 = vmatmul.bf16.gmra.mxu2 %v10009_v51  ;;  %v4048_v22 = vpop.f32.mrf.mxu3 }
 0x29d   : > { %v4049_v2 = vadd.f32 %v4048_v22, %v4015_v60  ;;  %v4082_v28 = vpop.f32.mrf.mxu2  ;;  %v10294_v22 = vrot.slane %v11519_v20, 2 }
 0x29e   : > { %v3982_v21 = vpop.f32.mrf.mxu0 }
 0x29f   : > { %v10280_v58 = vadd.f32 %v4082_v28, %v4049_v2  ;;  %v3983_v12 = vadd.f32 %v3982_v21, %v10219_v33  ;;  %v11520_v21 = vrot.slane %v9701_v32, 2 }
 0x2a1   : > { %v4016_v30 = vpop.f32.mrf.mxu1 }
 0x2a2   : > { %v4017_v11 = vadd.f32 %v4016_v30, %v3983_v12  ;;  %v2626_v12 = vsel %vm695_vm2, %v11520_v21, %v10294_v22  ;;  %v11521_v30 = vrot.slane %v9722_v63, 2 }
 0x2a4   : > { %v4050_v51 = vpop.f32.mrf.mxu3 }
 0x2a5   : > { %v4051_v54 = vadd.f32 %v4050_v51, %v4017_v11  ;;  %v4084_v26 = vpop.f32.mrf.mxu2  ;;  %v2627_v11 = vsel %vm695_vm2, %v11521_v30, %v10294_v22 }
 0x2a6   : > { %v4096_v50 = vpop.f32.mrf.mxu0 }
 0x2a7   : > { %v10283_v13 = vadd.f32 %v4084_v26, %v4051_v54  ;;  %v4097_v19 = vadd.f32 %v4096_v50, %v10226_v6  ;;  %v2646_v50 = vrot.slane %v9818_v17, 3  ;;  %v11523_v17 = vld [vmem:[#allocation43_spill] sm:$0xff] }
 0x2a9   : > { %v4130_v41 = vpop.f32.mrf.mxu1  ;;  %4246 = vmatmul.bf16.gmra.mxu0 %v10012_v3 }
 0x2aa   : > { %v4131_v33 = vadd.f32 %v4130_v41, %v4097_v19  ;;  %4314 = vmatmul.bf16.gmra.mxu3 %v10017_v55 }
 0x2ab   : > { %4280 = vmatmul.bf16.gmra.mxu1 %v10022_v46 }
 0x2ac   : > { %4348 = vmatmul.bf16.gmra.mxu2 %v10027_v18 }
 0x2ad   : > { %v4164_v15 = vpop.f32.mrf.mxu3 }
 0x2ae   : > { %v4165_v53 = vadd.f32 %v4164_v15, %v4131_v33  ;;  %v4098_v60 = vpop.f32.mrf.mxu0 }
 0x2af   : > { %v4198_v36 = vpop.f32.mrf.mxu2  ;;  %v4099_v10 = vadd.f32 %v4098_v60, %v10229_v16 }
 0x2b0   : > { %v10290_v52 = vadd.f32 %v4198_v36, %v4165_v53 }
 0x2b1   : > { %v4132_v29 = vpop.f32.mrf.mxu1 }
 0x2b2   : > { %v4133_v6 = vadd.f32 %v4132_v29, %v4099_v10  ;;  %v11522_v29 = vrot.slane %v9531_v23, 3 }
 0x2b5   : > { %v4166_v47 = vpop.f32.mrf.mxu3 }
 0x2b6   : > { %v4167_v3 = vadd.f32 %v4166_v47, %v4133_v6  ;;  %v4101_v2 = vpop.f32.mrf.mxu0 }
 0x2b7   : > { %v4200_v55 = vpop.f32.mrf.mxu2  ;;  %v4102_v18 = vadd.f32 %v4101_v2, %v10236_v34 }
 0x2b8   : > { %v10296_v46 = vadd.f32 %v4200_v55, %v4167_v3 }
 0x2b9   : > { %v4135_v28 = vpop.f32.mrf.mxu1  ;;  %4251 = vmatmul.bf16.gmra.mxu0 %v10031_v25  ;;  %v2645_v25 = vrot.slane %v9900_v0, 2 }
 0x2ba   : > { %v4136_v16 = vadd.f32 %v4135_v28, %v4102_v18  ;;  %4319 = vmatmul.bf16.gmra.mxu3 %v2626_v12 }
 0x2bb   : > { %4285 = vmatmul.bf16.gmra.mxu1 %v10043_v39  ;;  %v2696_v39 = vrot.slane %v9488_v40, 3  ;;  %v2647_v10 = vor.u32 %v2646_v50, %v2645_v25  ;;  %v11524_v40 = vrot.slane %v9536_v8, 3 }
 0x2bc   : > { %4353 = vmatmul.bf16.gmra.mxu2 %v2627_v11 }
 0x2bd   : > { %v4169_v44 = vpop.f32.mrf.mxu3  ;;  %v2698_v0 = vsel %vm786_vm4, %v2696_v39, %v11522_v29  ;;  %v2651_v47 = vsel %vm742_vm3, %v2647_v10, %v9897_v31 }
 0x2be   : > { %v4170_v34 = vadd.f32 %v4169_v44, %v4136_v16  ;;  %v4103_v27 = vpop.f32.mrf.mxu0 }
 0x2bf   : > { %v4203_v38 = vpop.f32.mrf.mxu2  ;;  %v4104_v51 = vadd.f32 %v4103_v27, %v10243_v24  ;;  %v2699_v24 = vrot.slane %v9493_v37, 3  ;;  %v11526_v27 = vld [vmem:[#allocation48_spill] sm:$0xff] }
 0x2c0   : > { %v10309_v56 = vadd.f32 %v4203_v38, %v4170_v34  ;;  %v11525_v38 = vld [vmem:[#allocation50_spill] sm:$0xff] }
 0x2c1   : > { %v4137_v54 = vpop.f32.mrf.mxu1  ;;  %v2701_v3 = vsel %vm786_vm4, %v2699_v24, %v11524_v40 }
 0x2c2   : > { %v4138_v26 = vadd.f32 %v4137_v54, %v4104_v51  ;;  %v11527_v51 = vld [vmem:[#allocation51_spill] sm:$0xff]  ;;  %v11528_v54 = vld [vmem:[#allocation49_spill] sm:$0xff] }
 0x2c5   : > { %v4171_v19 = vpop.f32.mrf.mxu3 }
 0x2c6   : > { %v4172_v41 = vadd.f32 %v4171_v19, %v4138_v26  ;;  %v4106_v15 = vpop.f32.mrf.mxu0 }
 0x2c7   : > { %v4205_v33 = vpop.f32.mrf.mxu2  ;;  %v4107_v36 = vadd.f32 %v4106_v15, %v10256_v9 }
 0x2c8   : > { %v10315_v53 = vadd.f32 %v4205_v33, %v4172_v41 }
 0x2c9   : > { %v4140_v60 = vpop.f32.mrf.mxu1  ;;  %4367 = vmatmul.bf16.vlgmr.msrb.gmra.mxu0 %v11523_v17 }
 0x2ca   : > { %v4141_v6 = vadd.f32 %v4140_v60, %v4107_v36  ;;  %4435 = vmatmul.bf16.vlgmr.msrb.gmra.mxu3 %v2698_v0 }
 0x2cb   : > { %4401 = vmatmul.bf16.vlgmr.msrb.gmra.mxu1 %v2651_v47 }
 0x2cc   : > { %4469 = vmatmul.bf16.vlgmr.msra.gmra.mxu2 %v2701_v3  ;;  %v7975_v3 = vld [vmem:[%s11321_s5 + $0x38] sm:$0xff] }
 0x2cd   : > { %v4174_v9 = vpop.f32.mrf.mxu3  ;;  %5366 = vmatpush.bf16.msra.mxu0 %v7975_v3 }
 0x2ce   : > { %v4175_v55 = vadd.f32 %v4174_v9, %v4141_v6  ;;  %v4108_v2 = vpop.f32.mrf.mxu0  ;;  %v11530_v9 = vld [vmem:[#allocation54_spill] sm:$0xff] }
 0x2cf   : > { %v4208_v37 = vpop.f32.mrf.mxu2  ;;  %v4109_v18 = vadd.f32 %v4108_v2, %v10259_v57 }
 0x2d0   : > { %v10328_v23 = vadd.f32 %v4208_v37, %v4175_v55  ;;  %v11531_v55 = vld [vmem:[#allocation14_spill] sm:$0xff] }
 0x2d1   : > { %v4142_v28 = vpop.f32.mrf.mxu1 }
 0x2d2   : > { %v4143_v21 = vadd.f32 %v4142_v28, %v4109_v18 }
 0x2d5   : > { %v4176_v12 = vpop.f32.mrf.mxu3 }
 0x2d6   : > { %v4177_v16 = vadd.f32 %v4176_v12, %v4143_v21  ;;  %v4111_v31 = vpop.f32.mrf.mxu0 }
 0x2d7   : > { %v4210_v30 = vpop.f32.mrf.mxu2  ;;  %v4112_v8 = vadd.f32 %v4111_v31, %v10270_v1  ;;  %v7974_v31 = vld [vmem:[%s11321_s5 + $0x30] sm:$0xff] }
 0x2d8   : > { %v10331_v11 = vadd.f32 %v4210_v30, %v4177_v16  ;;  %5367 = vmatpush.bf16.msra.mxu0 %v7974_v31 }
 0x2d9   : > { %v4145_v44 = vpop.f32.mrf.mxu1  ;;  %4372 = vmatmul.bf16.gmra.mxu0 %v11525_v38 }
 0x2da   : > { %v4146_v34 = vadd.f32 %v4145_v44, %v4112_v8  ;;  %4440 = vmatmul.bf16.gmra.mxu3 %v11526_v27  ;;  %v11533_v27 = vrot.slane %v9701_v32, 3 }
 0x2db   : > { %4406 = vmatmul.bf16.gmra.mxu1 %v11527_v51 }
 0x2dc   : > { %4474 = vmatmul.bf16.gmra.mxu2 %v11528_v54 }
 0x2dd   : > { %v4179_v57 = vpop.f32.mrf.mxu3 }
 0x2de   : > { %v4180_v26 = vadd.f32 %v4179_v57, %v4146_v34  ;;  %v10338_v50 = vpop.f32.mrf.mxu0  ;;  %v11534_v57 = vld [vmem:[#allocation29_spill] sm:$0xff] }
 0x2df   : > { %v4213_v25 = vpop.f32.mrf.mxu2 }
 0x2e0   : > { %v10340_v19 = vadd.f32 %v4213_v25, %v4180_v26 }
 0x2e1   : > { %v10342_v41 = vpop.f32.mrf.mxu1 }
 0x2e5   : > { %v10344_v1 = vpop.f32.mrf.mxu3 }
 0x2e6   : > { %v4116_v15 = vpop.f32.mrf.mxu0 }
 0x2e7   : > { %v10346_v33 = vpop.f32.mrf.mxu2  ;;  %v4117_v39 = vadd.f32 %v4116_v15, %v10280_v58 }
 0x2e9   : > { %v4150_v36 = vpop.f32.mrf.mxu1  ;;  %4377 = vmatmul.bf16.gmra.mxu0 %v10055_v4 }
 0x2ea   : > { %v4151_v60 = vadd.f32 %v4150_v36, %v4117_v39  ;;  %4445 = vmatmul.bf16.gmra.mxu3 %v10049_v45 }
 0x2eb   : > { %4411 = vmatmul.bf16.gmra.mxu1 %v10081_v43 }
 0x2ec   : > { %4479 = vmatmul.bf16.gmra.mxu2 %v10066_v7  ;;  %v11529_v7 = vld [vmem:[#allocation53_spill] sm:$0xff] }
 0x2ed   : > { %v4184_v10 = vpop.f32.mrf.mxu3 }
 0x2ee   : > { %v4185_v24 = vadd.f32 %v4184_v10, %v4151_v60  ;;  %v10353_v0 = vpop.f32.mrf.mxu0 }
 0x2ef   : > { %v4218_v29 = vpop.f32.mrf.mxu2 }
 0x2f0   : > { %v10355_v6 = vadd.f32 %v4218_v29, %v4185_v24  ;;  %v7973_v24 = vld [vmem:[%s11321_s5 + $0x28] sm:$0xff] }
 0x2f1   : > { %v10357_v17 = vpop.f32.mrf.mxu1  ;;  %5368 = vmatpush.bf16.msra.mxu0 %v7973_v24 }
 0x2f5   : > { %v10359_v58 = vpop.f32.mrf.mxu3 }
 0x2f6   : > { %v4232_v4 = vpop.f32.mrf.mxu0 }
 0x2f7   : > { %v10361_v47 = vpop.f32.mrf.mxu2  ;;  %v4233_v45 = vadd.f32 %v4232_v4, %v10290_v52 }
 0x2f9   : > { %v4266_v40 = vpop.f32.mrf.mxu1  ;;  %4382 = vmatmul.bf16.gmra.mxu0 %v10086_v5  ;;  %v10378_v5 = vrot.slane %v11519_v20, 3  ;;  %v11532_v20 = vld [vmem:[#allocation52_spill] sm:$0xff] }
 0x2fa   : > { %v4267_v43 = vadd.f32 %v4266_v40, %v4233_v45  ;;  %4450 = vmatmul.bf16.gmra.mxu3 %v11529_v7  ;;  %v7972_v7 = vld [vmem:[%s11321_s5 + $0x20] sm:$0xff] }
 0x2fb   : > { %4416 = vmatmul.bf16.gmra.mxu1 %v11530_v9  ;;  %v10384_v16 = vor.u32 %v10378_v5, %v10294_v22  ;;  %v2715_v51 = vsel %vm786_vm4, %v11533_v27, %v10378_v5  ;;  %5369 = vmatpush.bf16.msra.mxu0 %v7972_v7 }
 0x2fc   : > { %4484 = vmatmul.bf16.gmra.mxu2 %v11531_v55 }
 0x2fd   : > { %v4300_v37 = vpop.f32.mrf.mxu3  ;;  %v2684_v38 = vsel %vm742_vm3, %v11532_v20, %v10384_v16  ;;  %v2685_v26 = vsel %vm742_vm3, %v11534_v57, %v10384_v16  ;;  %v7970_v57 = vld [vmem:[%s11321_s5 + $0x10] sm:$0xff] }
 0x2fe   : > { %v4301_v2 = vadd.f32 %v4300_v37, %v4267_v43  ;;  %v10371_v28 = vpop.f32.mrf.mxu0 }
 0x2ff   : > { %v4334_v18 = vpop.f32.mrf.mxu2 }
 0x300   : > { %v10373_v52 = vadd.f32 %v4334_v18, %v4301_v2 }
 0x301   : > { %v10375_v21 = vpop.f32.mrf.mxu1 }
 0x305   : > { %v10380_v12 = vpop.f32.mrf.mxu3 }
 0x306   : > { %v4237_v8 = vpop.f32.mrf.mxu0 }
 0x307   : > { %v10386_v30 = vpop.f32.mrf.mxu2  ;;  %v4238_v44 = vadd.f32 %v4237_v8, %v10309_v56  ;;  %v11535_v56 = vrot.slane %v9722_v63, 3 }
 0x309   : > { %v4271_v34 = vpop.f32.mrf.mxu1  ;;  %4387 = vmatmul.bf16.gmra.mxu0 %v2684_v38  ;;  %v2716_v25 = vsel %vm786_vm4, %v11535_v56, %v10378_v5 }
 0x30a   : > { %v4272_v54 = vadd.f32 %v4271_v34, %v4238_v44  ;;  %4455 = vmatmul.bf16.gmra.mxu3 %v2715_v51 }
 0x30b   : > { %4421 = vmatmul.bf16.gmra.mxu1 %v2685_v26 }
 0x30c   : > { %4489 = vmatmul.bf16.gmra.mxu2 %v2716_v25 }
 0x30d   : > { %v4305_v15 = vpop.f32.mrf.mxu3 }
 0x30e   : > { %v4306_v39 = vadd.f32 %v4305_v15, %v4272_v54  ;;  %v10406_v32 = vpop.f32.mrf.mxu0 }
 0x30f   : > { %v4339_v36 = vpop.f32.mrf.mxu2 }
 0x310   : > { %v10408_v60 = vadd.f32 %v4339_v36, %v4306_v39 }
 0x311   : > { %v10410_v10 = vpop.f32.mrf.mxu1 }
 0x315   : > { %v10415_v29 = vpop.f32.mrf.mxu3 }
 0x316   : > { %v4242_v4 = vpop.f32.mrf.mxu0 }
 0x317   : > { %v10417_v63 = vpop.f32.mrf.mxu2  ;;  %v4243_v45 = vadd.f32 %v4242_v4, %v10328_v23  ;;  %v7971_v23 = vld [vmem:[%s11321_s5 + $0x18] sm:$0xff] }
 0x318   : > { %5370 = vmatpush.bf16.msra.mxu0 %v7971_v23 }
 0x319   : > { %v4276_v40 = vpop.f32.mrf.mxu1 }
 0x31a   : > { %v4277_v43 = vadd.f32 %v4276_v40, %v4243_v45 }
 0x31c   : > { %5371 = vmatpush.bf16.msra.mxu0 %v7970_v57  ;;  %v7998_v57 = vld [vmem:[%s11321_s5 + $0xf0] sm:$0xff] }
 0x31d   : > { %v4310_v3 = vpop.f32.mrf.mxu3 }
 0x31e   : > { %v4311_v9 = vadd.f32 %v4310_v3, %v4277_v43  ;;  %v10423_v37 = vpop.f32.mrf.mxu0 }
 0x31f   : > { %v4344_v55 = vpop.f32.mrf.mxu2 }
 0x320   : > { %v10425_v2 = vadd.f32 %v4344_v55, %v4311_v9  ;;  %v4235_v55 = vadd.f32 %v10371_v28, %v10296_v46  ;;  %v7999_v46 = vld [vmem:[%s11321_s5 + $0xf8] sm:$0xff]  ;;  %v7968_v28 = vld [vmem:[%s11321_s5] sm:$0xff] }
 0x321   : > { %v10427_v18 = vpop.f32.mrf.mxu1  ;;  %5468 = vmatpush.bf16.msrb.mxu2 %v7999_v46 }
 0x325   : > { %v10432_v31 = vpop.f32.mrf.mxu3  ;;  %5469 = vmatpush.bf16.msrb.mxu2 %v7998_v57 }
 0x326   : > { %v4247_v44 = vpop.f32.mrf.mxu0 }
 0x327   : > { %v10434_v8 = vpop.f32.mrf.mxu2  ;;  %v4248_v34 = vadd.f32 %v4247_v44, %v10340_v19 }
 0x329   : > { %v4281_v20 = vpop.f32.mrf.mxu1 }
 0x32a   : > { %v4282_v38 = vadd.f32 %v4281_v20, %v4248_v34  ;;  %v4269_v20 = vadd.f32 %v10375_v21, %v4235_v55  ;;  %v7983_v21 = vld [vmem:[%s11321_s5 + $0x78] sm:$0xff] }
 0x32b   : > { %5400 = vmatpush.bf16.msra.mxu1 %v7983_v21  ;;  %v11536_v21 = vld [vmem:[#allocation5_spill] sm:$0xff] }
 0x32d   : > { %v4315_v27 = vpop.f32.mrf.mxu3 }
 0x32e   : > { %v4316_v51 = vadd.f32 %v4315_v27, %v4282_v38  ;;  %v10440_v26 = vpop.f32.mrf.mxu0 }
 0x32f   : > { %v4349_v54 = vpop.f32.mrf.mxu2 }
 0x330   : > { %v10442_v56 = vadd.f32 %v4349_v54, %v4316_v51  ;;  %v7991_v51 = vld [vmem:[%s11321_s5 + $0xb8] sm:$0xff]  ;;  %v7990_v54 = vld [vmem:[%s11321_s5 + $0xb0] sm:$0xff] }
 0x331   : > { %v10444_v25 = vpop.f32.mrf.mxu1  ;;  %5434 = vmatpush.bf16.msra.mxu3 %v7991_v51 }
 0x335   : > { %v10446_v15 = vpop.f32.mrf.mxu3  ;;  %5435 = vmatpush.bf16.msra.mxu3 %v7990_v54 }
 0x336   : > { %v4252_v19 = vpop.f32.mrf.mxu0 }
 0x337   : > { %v10448_v39 = vpop.f32.mrf.mxu2  ;;  %v4253_v36 = vadd.f32 %v4252_v19, %v10355_v6  ;;  %v7969_v6 = vld [vmem:[%s11321_s5 + $0x8] sm:$0xff]  ;;  %v7982_v19 = vld [vmem:[%s11321_s5 + $0x70] sm:$0xff] }
 0x338   : > { %5372 = vmatpush.bf16.msra.mxu0 %v7969_v6  ;;  %5401 = vmatpush.bf16.msra.mxu1 %v7982_v19 }
 0x339   : > { %v4286_v24 = vpop.f32.mrf.mxu1 }
 0x33a   : > { %v4287_v4 = vadd.f32 %v4286_v24, %v4253_v36 }
 0x33c   : > { %5373 = vmatpush.bf16.msra.mxu0 %v7968_v28 }
 0x33d   : > { %v4320_v45 = vpop.f32.mrf.mxu3 }
 0x33e   : > { %v4321_v40 = vadd.f32 %v4320_v45, %v4287_v4  ;;  %v10451_v7 = vpop.f32.mrf.mxu0 }
 0x33f   : > { %v4354_v43 = vpop.f32.mrf.mxu2 }
 0x340   : > { %v10453_v3 = vadd.f32 %v4354_v43, %v4321_v40 }
 0x341   : > { %v10455_v9 = vpop.f32.mrf.mxu1 }
 0x345   : > { %v10459_v23 = vpop.f32.mrf.mxu3 }
 0x346   : > { %v4368_v34 = vpop.f32.mrf.mxu0 }
 0x347   : > { %v10461_v44 = vpop.f32.mrf.mxu2  ;;  %v4369_v38 = vadd.f32 %v4368_v34, %v10373_v52  ;;  %v4303_v52 = vadd.f32 %v10380_v12, %v4269_v20  ;;  %v4240_v34 = vadd.f32 %v10406_v32, %v10315_v53  ;;  %v7997_v53 = vld [vmem:[%s11321_s5 + $0xe8] sm:$0xff] }
 0x348   : > { %v7981_v32 = vld [vmem:[%s11321_s5 + $0x68] sm:$0xff]  ;;  %5470 = vmatpush.bf16.msrb.mxu2 %v7997_v53 }
 0x349   : > { %v4402_v27 = vpop.f32.mrf.mxu1  ;;  %v4337_v12 = vadd.f32 %v10386_v30, %v4303_v52  ;;  %v4274_v30 = vadd.f32 %v10410_v10, %v4240_v34  ;;  %5402 = vmatpush.bf16.msra.mxu1 %v7981_v32  ;;  %v8006_v34 = vld [vmem:[%s11321_s5 + $0x130] sm:$0xff] }
 0x34a   : > { %v4403_v36 = vadd.f32 %v4402_v27, %v4369_v38  ;;  %v7986_v32 = vld [vmem:[%s11321_s5 + $0x90] sm:$0xff] }
 0x34b   : > { %v4308_v10 = vadd.f32 %v10415_v29, %v4274_v30  ;;  %v7980_v29 = vld [vmem:[%s11321_s5 + $0x60] sm:$0xff] }
 0x34d   : > { %v4436_v24 = vpop.f32.mrf.mxu3  ;;  %5403 = vmatpush.bf16.msra.mxu1 %v7980_v29 }
 0x34e   : > { %v4437_v4 = vadd.f32 %v4436_v24, %v4403_v36  ;;  %v4370_v40 = vpop.f32.mrf.mxu0  ;;  %v7989_v36 = vld [vmem:[%s11321_s5 + $0xa8] sm:$0xff] }
 0x34f   : > { %v4470_v45 = vpop.f32.mrf.mxu2  ;;  %v4371_v55 = vadd.f32 %v4370_v40, %v4337_v12  ;;  %5436 = vmatpush.bf16.msra.mxu3 %v7989_v36  ;;  %v7996_v12 = vld [vmem:[%s11321_s5 + $0xe0] sm:$0xff]  ;;  %v11537_v40 = vld [vmem:[#allocation6_spill] sm:$0xff] }
 0x350   : > { %v4471_v43 = vadd.f32 %v4470_v45, %v4437_v4  ;;  %v8007_v4 = vld [vmem:[%s11321_s5 + $0x138] sm:$0xff]  ;;  %5471 = vmatpush.bf16.msrb.mxu2 %v7996_v12 }
 0x351   : > { %v4404_v6 = vpop.f32.mrf.mxu1  ;;  %5502 = vmatpush.bf16.msrb.mxu0 %v8007_v4 }
 0x352   : > { %v4495_v20 = vmax.f32 %v4471_v43, 0.0  ;;  %v4405_v51 = vadd.f32 %v4404_v6, %v4371_v55 }
 0x354   : > { %v4505_v52 = vmul.f32 %v4495_v20, %v11536_v21  ;;  %v4342_v20 = vadd.f32 %v10417_v63, %v4308_v10  ;;  %v7994_v10 = vld [vmem:[%s11321_s5 + $0xd0] sm:$0xff] }
 0x355   : > { %v4438_v46 = vpop.f32.mrf.mxu3  ;;  %5503 = vmatpush.bf16.msrb.mxu0 %v8006_v34 }
 0x356   : > { %v4439_v38 = vadd.f32 %v4438_v46, %v4405_v51  ;;  %v4373_v28 = vpop.f32.mrf.mxu0  ;;  %v4515_v45 = vpack.c.bf16 %v4505_v52, %v4505_v52  ;;  %v7979_v52 = vld [vmem:[%s11321_s5 + $0x58] sm:$0xff] }
 0x357   : > { %v4472_v27 = vpop.f32.mrf.mxu2  ;;  %v4374_v57 = vadd.f32 %v4373_v28, %v10408_v60  ;;  %v7988_v60 = vld [vmem:[%s11321_s5 + $0xa0] sm:$0xff]  ;;  %v7995_v28 = vld [vmem:[%s11321_s5 + $0xd8] sm:$0xff]  ;;  %5404 = vmatpush.bf16.msra.mxu1 %v7979_v52 }
 0x358   : > { %v4473_v54 = vadd.f32 %v4472_v27, %v4439_v38  ;;  %5437 = vmatpush.bf16.msra.mxu3 %v7988_v60  ;;  %v7987_v27 = vld [vmem:[%s11321_s5 + $0x98] sm:$0xff]  ;;  %v4535_v63 = vunpack.c.l.b16 %v4515_v45  ;;  %5472 = vmatpush.bf16.msrb.mxu2 %v7995_v28  ;;  %v7978_v60 = vld [vmem:[%s11321_s5 + $0x50] sm:$0xff] }
 0x359   : > { %v4407_v19 = vpop.f32.mrf.mxu1 }
 0x35a   : > { %v4496_v24 = vmax.f32 %v4473_v54, 0.0  ;;  %v4408_v55 = vadd.f32 %v4407_v19, %v4374_v57 }
 0x35b   : > { %5405 = vmatpush.bf16.msra.mxu1 %v7978_v60 }
 0x35c   : > { %v4506_v43 = vmul.f32 %v4496_v24, %v11537_v40  ;;  %5438 = vmatpush.bf16.msra.mxu3 %v7987_v27  ;;  %v4245_v24 = vadd.f32 %v10423_v37, %v10331_v11  ;;  %5473 = vmatpush.bf16.msrb.mxu2 %v7994_v10 }
 0x35d   : > { %v4441_v6 = vpop.f32.mrf.mxu3 }
 0x35e   : > { %v4516_v51 = vpack.c.bf16 %v4506_v43, %v4506_v43  ;;  %v4442_v46 = vadd.f32 %v4441_v6, %v4408_v55  ;;  %v4375_v30 = vpop.f32.mrf.mxu0  ;;  %v4279_v11 = vadd.f32 %v10427_v18, %v4245_v24  ;;  %v11540_v24 = vld [vmem:[#allocation9_spill] sm:$0xff] }
 0x35f   : > { %v4475_v38 = vpop.f32.mrf.mxu2  ;;  %v4376_v19 = vadd.f32 %v4375_v30, %v4342_v20 }
 0x360   : > { %v4536_v54 = vunpack.c.l.b16 %v4516_v51  ;;  %v4476_v57 = vadd.f32 %v4475_v38, %v4442_v46  ;;  %5439 = vmatpush.bf16.msra.mxu3 %v7986_v32  ;;  %v4114_v51 = vadd.f32 %v10338_v50, %v10273_v59  ;;  %v11538_v46 = vld [vmem:[#allocation7_spill] sm:$0xff]  ;;  %v7977_v59 = vld [vmem:[%s11321_s5 + $0x48] sm:$0xff]  ;;  %v4313_v50 = vadd.f32 %v10432_v31, %v4279_v11  ;;  %v7976_v32 = vld [vmem:[%s11321_s5 + $0x40] sm:$0xff] }
 0x361   : > { %v4409_v36 = vpop.f32.mrf.mxu1  ;;  %5406 = vmatpush.bf16.msra.mxu1 %v7977_v59 }
 0x362   : > { %v4545_v53 = vpack.c.b16 %v4536_v54, %v4535_v63  ;;  %v4497_v29 = vmax.f32 %v4476_v57, 0.0  ;;  %v4410_v45 = vadd.f32 %v4409_v36, %v4376_v19  ;;  %v7985_v63 = vld [vmem:[%s11321_s5 + $0x88] sm:$0xff]  ;;  %v7984_v19 = vld [vmem:[%s11321_s5 + $0x80] sm:$0xff]  ;;  %v4148_v31 = vadd.f32 %v10342_v41, %v4114_v51 }
 0x363   : > { %v7993_v54 = vld [vmem:[%s11321_s5 + $0xc8] sm:$0xff]  ;;  %v7992_v36 = vld [vmem:[%s11321_s5 + $0xc0] sm:$0xff] }
 0x364   : > { %v4551_v12 = vshrl.u32 %v4545_v53, 16  ;;  %v4554_v4 = vshll.u32 %v4545_v53, 16  ;;  %v4507_v38 = vmul.f32 %v4497_v29, %v11538_v46  ;;  %5440 = vmatpush.bf16.msra.mxu3 %v7985_v63  ;;  %5474 = vmatpush.bf16.msrb.mxu2 %v7993_v54  ;;  %v8005_v53 = vld [vmem:[%s11321_s5 + $0x128] sm:$0xff]  ;;  %v4119_v54 = vadd.f32 %v10353_v0, %v10283_v13  ;;  %v8004_v13 = vld [vmem:[%s11321_s5 + $0x120] sm:$0xff] }
 0x365   : > { %v4443_v43 = vpop.f32.mrf.mxu3  ;;  %5504 = vmatpush.bf16.msrb.mxu0 %v8005_v53  ;;  %5407 = vmatpush.bf16.msra.mxu1 %v7976_v32  ;;  %v8016_v57 = vld [vmem:[%s11321_s5 + $0x180] sm:$0xff] }
 0x366   : > { %v4553_v55 = vrot.slane %v4551_v12, 2  ;;  %v4556_v6 = vrot.slane %v4554_v4, 3  ;;  %v4444_v34 = vadd.f32 %v4443_v43, %v4410_v45  ;;  %v4378_v37 = vpop.f32.mrf.mxu0  ;;  %v4517_v10 = vpack.c.bf16 %v4507_v38, %v4507_v38 }
 0x367   : > { %v4477_v20 = vpop.f32.mrf.mxu2  ;;  %v4379_v28 = vadd.f32 %v4378_v37, %v10425_v2  ;;  %v4182_v4 = vadd.f32 %v10344_v1, %v4148_v31  ;;  %v4347_v45 = vadd.f32 %v10434_v8, %v4313_v50  ;;  %v4153_v0 = vadd.f32 %v10357_v17, %v4119_v54 }
 0x368   : > { %v4478_v27 = vadd.f32 %v4477_v20, %v4444_v34  ;;  %v4557_v52 = vor.u32 %v4556_v6, %v4553_v55  ;;  %5441 = vmatpush.bf16.msra.mxu3 %v7984_v19  ;;  %5475 = vmatpush.bf16.msrb.mxu2 %v7992_v36  ;;  %v4537_v34 = vunpack.c.l.b16 %v4517_v10 }
 0x369   : > { %v4412_v30 = vpop.f32.mrf.mxu1  ;;  %v4216_v38 = vadd.f32 %v10346_v33, %v4182_v4  ;;  %5505 = vmatpush.bf16.msrb.mxu0 %v8004_v13 }
 0x36a   : > { %v4498_v18 = vmax.f32 %v4478_v27, 0.0  ;;  %v10560_v2 = vsel %vm9413_vm9, 0, %v4557_v52  ;;  %v4413_v12 = vadd.f32 %v4412_v30, %v4379_v28 }
 0x36b   : > { %5374 = vmatmul.bf16.vlgmr.msra.gmra.mxu0 %v10560_v2  ;;  %v4250_v1 = vadd.f32 %v10440_v26, %v4216_v38  ;;  %v4605_v50 = vshll.u32 %v10560_v2, 16 }
 0x36c   : > { %v4508_v60 = vmul.f32 %v4498_v18, %v11540_v24 }
 0x36d   : > { %v4446_v29 = vpop.f32.mrf.mxu3  ;;  %v4284_v31 = vadd.f32 %v10444_v25, %v4250_v1  ;;  %v4607_v25 = vrot.slane %v4605_v50, 1 }
 0x36e   : > { %v4518_v43 = vpack.c.bf16 %v4508_v60, %v4508_v60  ;;  %v4447_v55 = vadd.f32 %v4446_v29, %v4413_v12  ;;  %v4380_v6 = vpop.f32.mrf.mxu0 }
 0x36f   : > { %v4480_v41 = vpop.f32.mrf.mxu2  ;;  %v4381_v11 = vadd.f32 %v4380_v6, %v4347_v45  ;;  %v4318_v4 = vadd.f32 %v10446_v15, %v4284_v31  ;;  %v4603_v15 = vshrl.u32 %v10560_v2, 16  ;;  %v4187_v6 = vadd.f32 %v10359_v58, %v4153_v0 }
 0x370   : > { %v4538_v20 = vunpack.c.l.b16 %v4518_v43  ;;  %v4481_v51 = vadd.f32 %v4480_v41, %v4447_v55  ;;  %v4653_v43 = vrot.slane %v10560_v2, 1 }
 0x371   : > { %v4414_v37 = vpop.f32.mrf.mxu1  ;;  %v4352_v58 = vadd.f32 %v10448_v39, %v4318_v4  ;;  %v4221_v31 = vadd.f32 %v10361_v47, %v4187_v6 }
 0x372   : > { %v4546_v27 = vpack.c.b16 %v4538_v20, %v4537_v34  ;;  %v4499_v8 = vmax.f32 %v4481_v51, 0.0  ;;  %v4415_v63 = vadd.f32 %v4414_v37, %v4381_v11 }
 0x373   : > { %v4255_v39 = vadd.f32 %v10451_v7, %v4221_v31  ;;  %v8031_v31 = vld [vmem:[%s11321_s5 + $0x1f8] sm:$0xff] }
 0x374   : > { %v4559_v28 = vshrl.u32 %v4546_v27, 16  ;;  %v4562_v30 = vshll.u32 %v4546_v27, 16  ;;  %v4509_v26 = vmul.f32 %v4499_v8, %v9463_v62  ;;  %v4608_v27 = vor.u32 %v4607_v25, %v4603_v15  ;;  %5604 = vmatpush.bf16.msra.mxu2 %v8031_v31 }
 0x375   : > { %v4448_v59 = vpop.f32.mrf.mxu3 }
 0x376   : > { %v4561_v18 = vrot.slane %v4559_v28, 2  ;;  %v4564_v19 = vrot.slane %v4562_v30, 3  ;;  %v4449_v36 = vadd.f32 %v4448_v59, %v4415_v63  ;;  %v4383_v33 = vpop.f32.mrf.mxu0  ;;  %v4519_v34 = vpack.c.bf16 %v4509_v26, %v4509_v26 }
 0x377   : > { %v4482_v53 = vpop.f32.mrf.mxu2  ;;  %v4384_v60 = vadd.f32 %v4383_v33, %v10442_v56  ;;  %v4669_v56 = vrot.slane %v10560_v2, 5 }
 0x378   : > { %v10585_v32 = vor.u32 %v4564_v19, %v4561_v18  ;;  %v4483_v10 = vadd.f32 %v4482_v53, %v4449_v36  ;;  %v4539_v59 = vunpack.c.l.b16 %v4519_v34 }
 0x379   : > { %v4417_v12 = vpop.f32.mrf.mxu1 }
 0x37a   : > { %v10598_v29 = vsel %vm742_vm3, %v4557_v52, %v10585_v32  ;;  %v4500_v45 = vmax.f32 %v4483_v10, 0.0  ;;  %v8003_v52 = vld [vmem:[%s11321_s5 + $0x118] sm:$0xff]  ;;  %v4418_v51 = vadd.f32 %v4417_v12, %v4384_v60 }
 0x37b   : > { %5379 = vmatmul.bf16.gmra.mxu0 %v10598_v29  ;;  %v4654_v55 = vrot.slane %v10598_v29, 1  ;;  %v4670_v17 = vrot.slane %v10598_v29, 5  ;;  %v10607_v41 = vshll.u32 %v10598_v29, 16 }
 0x37c   : > { %v4510_v20 = vmul.f32 %v4500_v45, %v9483_v48  ;;  %5506 = vmatpush.bf16.msrb.mxu0 %v8003_v52  ;;  %v4289_v52 = vadd.f32 %v10455_v9, %v4255_v39  ;;  %v8002_v9 = vld [vmem:[%s11321_s5 + $0x110] sm:$0xff] }
 0x37d   : > { %v4451_v11 = vpop.f32.mrf.mxu3  ;;  %v4655_v37 = vsel %vm590_vm0, %v4653_v43, %v4654_v55  ;;  %v4671_v38 = vsel %vm2479_vm10, %v4669_v56, %v4670_v17  ;;  %v4612_v1 = vrot.slane %v10607_v41, 1 }
 0x37e   : > { %v4520_v28 = vpack.c.bf16 %v4510_v20, %v4510_v20  ;;  %v4452_v30 = vadd.f32 %v4451_v11, %v4418_v51  ;;  %5442 = vmatmul.bf16.vlgmr.msra.gmra.mxu3 %v4655_v37  ;;  %5476 = vmatmul.bf16.vlgmr.msrb.gmra.mxu2 %v4671_v38  ;;  %v4385_v63 = vpop.f32.mrf.mxu0  ;;  %v4323_v7 = vadd.f32 %v10459_v23, %v4289_v52  ;;  %v10639_v37 = vshrl.u32 %v10598_v29, 16 }
 0x37f   : > { %v4485_v8 = vpop.f32.mrf.mxu2  ;;  %v4613_v54 = vsel %vm535_vm1, %v4608_v27, %v4612_v1  ;;  %v4386_v36 = vadd.f32 %v4385_v63, %v4352_v58 }
 0x380   : > { %v4540_v18 = vunpack.c.l.b16 %v4520_v28  ;;  %v4486_v19 = vadd.f32 %v4485_v8, %v4452_v30  ;;  %5408 = vmatmul.bf16.vlgmr.msra.gmra.mxu1 %v4613_v54  ;;  %5507 = vmatpush.bf16.msrb.mxu0 %v8002_v9  ;;  %v8001_v28 = vld [vmem:[%s11321_s5 + $0x108] sm:$0xff]  ;;  %v4616_v54 = vor.u32 %v10639_v37, %v4612_v1 }
 0x381   : > { %v4419_v53 = vpop.f32.mrf.mxu1 }
 0x382   : > { %v4547_v33 = vpack.c.b16 %v4540_v18, %v4539_v59  ;;  %v4501_v26 = vmax.f32 %v4486_v19, 0.0  ;;  %v4420_v12 = vadd.f32 %v4419_v53, %v4386_v36  ;;  %v4357_v18 = vadd.f32 %v10461_v44, %v4323_v7 }
 0x384   : > { %v4568_v10 = vshrl.u32 %v4547_v33, 16  ;;  %v4571_v60 = vshll.u32 %v4547_v33, 16  ;;  %v4511_v43 = vmul.f32 %v4501_v26, %v9501_v35  ;;  %5508 = vmatpush.bf16.msrb.mxu0 %v8001_v28 }
 0x385   : > { %v4453_v13 = vpop.f32.mrf.mxu3 }
 0x386   : > { %v4570_v0 = vrot.slane %v4568_v10, 2  ;;  %v4573_v4 = vrot.slane %v4571_v60, 3  ;;  %v4454_v25 = vadd.f32 %v4453_v13, %v4420_v12  ;;  %v4388_v56 = vpop.f32.mrf.mxu0  ;;  %v4521_v38 = vpack.c.bf16 %v4511_v43, %v4511_v43  ;;  %v8000_v10 = vld [vmem:[%s11321_s5 + $0x100] sm:$0xff]  ;;  %v8015_v60 = vld [vmem:[%s11321_s5 + $0x178] sm:$0xff] }
 0x387   : > { %v4487_v45 = vpop.f32.mrf.mxu2  ;;  %v4389_v6 = vadd.f32 %v4388_v56, %v10453_v3  ;;  %v4685_v12 = vrot.slane %v4603_v15, 5  ;;  %v4689_v43 = vrot.slane %v10607_v41, 6  ;;  %5536 = vmatpush.bf16.msrb.mxu1 %v8015_v60  ;;  %v8014_v15 = vld [vmem:[%s11321_s5 + $0x170] sm:$0xff] }
 0x388   : > { %v10629_v34 = vor.u32 %v4573_v4, %v4570_v0  ;;  %v4488_v47 = vadd.f32 %v4487_v45, %v4454_v25  ;;  %v8022_v0 = vld [vmem:[%s11321_s5 + $0x1b0] sm:$0xff]  ;;  %v4686_v25 = vrot.slane %v4605_v50, 6  ;;  %v4688_v45 = vrot.slane %v10639_v37, 5  ;;  %5509 = vmatpush.bf16.msrb.mxu0 %v8000_v10  ;;  %v8021_v50 = vld [vmem:[%s11321_s5 + $0x1a8] sm:$0xff]  ;;  %v8012_v10 = vld [vmem:[%s11321_s5 + $0x160] sm:$0xff] }
 0x389   : > { %v4422_v20 = vpop.f32.mrf.mxu1  ;;  %v8030_v4 = vld [vmem:[%s11321_s5 + $0x1f0] sm:$0xff] }
 0x38a   : > { %v4502_v51 = vmax.f32 %v4488_v47, 0.0  ;;  %v10636_v11 = vsel %vm742_vm3, %v10585_v32, %v10629_v34  ;;  %v4423_v58 = vadd.f32 %v4422_v20, %v4389_v6  ;;  %v4687_v52 = vor.u32 %v4686_v25, %v4685_v12  ;;  %5605 = vmatpush.bf16.msra.mxu2 %v8030_v4  ;;  %v8027_v25 = vld [vmem:[%s11321_s5 + $0x1d8] sm:$0xff] }
 0x38b   : > { %5384 = vmatmul.bf16.gmra.mxu0 %v10636_v11  ;;  %v4656_v3 = vrot.slane %v10636_v11, 1  ;;  %v4672_v23 = vrot.slane %v10636_v11, 5  ;;  %v10648_v27 = vshll.u32 %v10636_v11, 16  ;;  %v10697_v47 = vor.u32 %v4689_v43, %v4688_v45  ;;  %5537 = vmatpush.bf16.msrb.mxu1 %v8014_v15  ;;  %v8011_v43 = vld [vmem:[%s11321_s5 + $0x158] sm:$0xff] }
 0x38c   : > { %v4512_v32 = vmul.f32 %v4502_v51, %v9524_v42 }
 0x38d   : > { %v4456_v30 = vpop.f32.mrf.mxu3  ;;  %v4657_v8 = vsel %vm590_vm0, %v4654_v55, %v4656_v3  ;;  %v4673_v63 = vsel %vm2479_vm10, %v4670_v17, %v4672_v23  ;;  %v4620_v59 = vrot.slane %v10648_v27, 1  ;;  %v8023_v55 = vld [vmem:[%s11321_s5 + $0x1b8] sm:$0xff]  ;;  %v4541_v17 = vunpack.c.l.b16 %v4521_v38  ;;  %v8029_v38 = vld [vmem:[%s11321_s5 + $0x1e8] sm:$0xff] }
 0x38e   : > { %v4522_v19 = vpack.c.bf16 %v4512_v32, %v4512_v32  ;;  %v4457_v36 = vadd.f32 %v4456_v30, %v4423_v58  ;;  %5447 = vmatmul.bf16.gmra.mxu3 %v4657_v8  ;;  %5481 = vmatmul.bf16.gmra.mxu2 %v4673_v63  ;;  %v4390_v33 = vpop.f32.mrf.mxu0  ;;  %v10707_v32 = vsel %vm2512_vm11, %v4687_v52, %v10697_v47  ;;  %v8013_v63 = vld [vmem:[%s11321_s5 + $0x168] sm:$0xff]  ;;  %v4693_v15 = vrot.slane %v10648_v27, 6  ;;  %v8018_v52 = vld [vmem:[%s11321_s5 + $0x190] sm:$0xff] }
 0x38f   : > { %v4490_v53 = vpop.f32.mrf.mxu2  ;;  %v4621_v1 = vsel %vm535_vm1, %v4616_v54, %v4620_v59  ;;  %v4391_v39 = vadd.f32 %v4390_v33, %v4357_v18  ;;  %5570 = vmatpush.bf16.msrb.mxu3 %v8023_v55  ;;  %5606 = vmatpush.bf16.msra.mxu2 %v8029_v38 }
 0x390   : > { %v4542_v44 = vunpack.c.l.b16 %v4522_v19  ;;  %v4491_v26 = vadd.f32 %v4490_v53, %v4457_v36  ;;  %5413 = vmatmul.bf16.gmra.mxu1 %v4621_v1  ;;  %v8020_v1 = vld [vmem:[%s11321_s5 + $0x1a0] sm:$0xff] }
 0x391   : > { %v4424_v13 = vpop.f32.mrf.mxu1  ;;  %5538 = vmatpush.bf16.msrb.mxu1 %v8013_v63 }
 0x392   : > { %v4548_v56 = vpack.c.b16 %v4542_v44, %v4541_v17  ;;  %v4503_v7 = vmax.f32 %v4491_v26, 0.0  ;;  %v4425_v51 = vadd.f32 %v4424_v13, %v4391_v39  ;;  %v10724_v17 = vshrl.u32 %v10636_v11, 16  ;;  %v8039_v39 = vld [vmem:[%s11321_s5 + $0x238] sm:$0xff] }
 0x393   : > { %5571 = vmatpush.bf16.msrb.mxu3 %v8022_v0  ;;  %5638 = vmatpush.bf16.msra.mxu0 %v8039_v39 }
 0x394   : > { %v4577_v6 = vshrl.u32 %v4548_v56, 16  ;;  %v4580_v20 = vshll.u32 %v4548_v56, 16  ;;  %v4513_v18 = vmul.f32 %v4503_v7, %v11468_v14  ;;  %v4624_v13 = vor.u32 %v10724_v17, %v4620_v59 }
 0x395   : > { %v4458_v9 = vpop.f32.mrf.mxu3  ;;  %5539 = vmatpush.bf16.msrb.mxu1 %v8012_v10  ;;  %v4692_v56 = vrot.slane %v10724_v17, 5 }
 0x396   : > { %v4579_v58 = vrot.slane %v4577_v6, 2  ;;  %v4582_v28 = vrot.slane %v4580_v20, 3  ;;  %v4459_v30 = vadd.f32 %v4458_v9, %v4425_v51  ;;  %v4523_v44 = vpack.c.bf16 %v4513_v18, %v4513_v18  ;;  %v8026_v6 = vld [vmem:[%s11321_s5 + $0x1d0] sm:$0xff]  ;;  %v8009_v18 = vld [vmem:[%s11321_s5 + $0x148] sm:$0xff] }
 0x397   : > { %v4492_v8 = vpop.f32.mrf.mxu2  ;;  %5572 = vmatpush.bf16.msrb.mxu3 %v8021_v50  ;;  %v8038_v20 = vld [vmem:[%s11321_s5 + $0x230] sm:$0xff]  ;;  %v10777_v51 = vor.u32 %v4693_v15, %v4692_v56  ;;  %v4732_v56 = vrot.slane %v10636_v11, 2 }
 0x398   : > { %v10712_v54 = vor.u32 %v4582_v28, %v4579_v58  ;;  %v4493_v19 = vadd.f32 %v4492_v8, %v4459_v30  ;;  %v4543_v59 = vunpack.c.l.b16 %v4523_v44  ;;  %v8010_v9 = vld [vmem:[%s11321_s5 + $0x150] sm:$0xff]  ;;  %5639 = vmatpush.bf16.msra.mxu0 %v8038_v20  ;;  %v8017_v28 = vld [vmem:[%s11321_s5 + $0x188] sm:$0xff]  ;;  %v4715_v44 = vrot.slane %v10560_v2, 6  ;;  %v8024_v2 = vld [vmem:[%s11321_s5 + $0x1c0] sm:$0xff] }
 0x399   : > { %5540 = vmatpush.bf16.msrb.mxu1 %v8011_v43  ;;  %v10785_v58 = vsel %vm2512_vm11, %v10697_v47, %v10777_v51  ;;  %v8025_v30 = vld [vmem:[%s11321_s5 + $0x1c8] sm:$0xff]  ;;  %v4749_v20 = vrot.slane %v10724_v17, 2 }
 0x39a   : > { %v4504_v36 = vmax.f32 %v4493_v19, 0.0  ;;  %v10718_v53 = vsel %vm742_vm3, %v10629_v34, %v10712_v54  ;;  %v8028_v34 = vld [vmem:[%s11321_s5 + $0x1e0] sm:$0xff] }
 0x39b   : > { %5389 = vmatmul.bf16.gmra.mxu0 %v10718_v53  ;;  %v4658_v55 = vrot.slane %v10718_v53, 1  ;;  %v4674_v31 = vrot.slane %v10718_v53, 5  ;;  %v10727_v33 = vshll.u32 %v10718_v53, 16  ;;  %5573 = vmatpush.bf16.msrb.mxu3 %v8020_v1  ;;  %v10797_v47 = vshrl.u32 %v10718_v53, 16 }
 0x39c   : > { %v4514_v26 = vmul.f32 %v4504_v36, %v11472_v49  ;;  %5607 = vmatpush.bf16.msra.mxu2 %v8028_v34 }
 0x39d   : > { %v4659_v60 = vsel %vm590_vm0, %v4656_v3, %v4658_v55  ;;  %v4675_v12 = vsel %vm2479_vm10, %v4672_v23, %v4674_v31  ;;  %v4628_v0 = vrot.slane %v10727_v33, 1  ;;  %v8019_v3 = vld [vmem:[%s11321_s5 + $0x198] sm:$0xff]  ;;  %5541 = vmatpush.bf16.msrb.mxu1 %v8010_v9  ;;  %v4750_v9 = vrot.slane %v10648_v27, 3 }
 0x39e   : > { %v4524_v4 = vpack.c.bf16 %v4514_v26, %v4514_v26  ;;  %5452 = vmatmul.bf16.gmra.mxu3 %v4659_v60  ;;  %5486 = vmatmul.bf16.gmra.mxu2 %v4675_v12 }
 0x39f   : > { %v4629_v23 = vsel %vm535_vm1, %v4624_v13, %v4628_v0  ;;  %5574 = vmatpush.bf16.msrb.mxu3 %v8019_v3  ;;  %v4632_v34 = vor.u32 %v10797_v47, %v4628_v0  ;;  %v8008_v0 = vld [vmem:[%s11321_s5 + $0x140] sm:$0xff]  ;;  %v4751_v17 = vor.u32 %v4750_v9, %v4749_v20 }
 0x3a0   : > { %v4544_v45 = vunpack.c.l.b16 %v4524_v4  ;;  %5418 = vmatmul.bf16.gmra.mxu1 %v4629_v23  ;;  %5608 = vmatpush.bf16.msra.mxu2 %v8027_v25  ;;  %v4731_v4 = vrot.slane %v10598_v29, 2 }
 0x3a1   : > { %5542 = vmatpush.bf16.msrb.mxu1 %v8009_v18 }
 0x3a2   : > { %v4549_v7 = vpack.c.b16 %v4544_v45, %v4543_v59 }
 0x3a3   : > { %5575 = vmatpush.bf16.msrb.mxu3 %v8018_v52 }
 0x3a4   : > { %v4586_v50 = vshrl.u32 %v4549_v7, 16  ;;  %v4589_v38 = vshll.u32 %v4549_v7, 16  ;;  %5609 = vmatpush.bf16.msra.mxu2 %v8026_v6  ;;  %v4747_v6 = vrot.slane %v10607_v41, 3  ;;  %v4733_v7 = vsel %vm695_vm2, %v4731_v4, %v4732_v56 }
 0x3a5   : > { %5543 = vmatpush.bf16.msrb.mxu1 %v8008_v0  ;;  %v4697_v41 = vrot.slane %v10727_v33, 6  ;;  %v8034_v0 = vld [vmem:[%s11321_s5 + $0x210] sm:$0xff] }
 0x3a6   : > { %v4588_v8 = vrot.slane %v4586_v50, 2  ;;  %v4591_v63 = vrot.slane %v4589_v38, 3  ;;  %v8036_v50 = vld [vmem:[%s11321_s5 + $0x220] sm:$0xff]  ;;  %v4696_v38 = vrot.slane %v10797_v47, 5 }
 0x3a7   : > { %5576 = vmatpush.bf16.msrb.mxu3 %v8017_v28 }
 0x3a8   : > { %v4592_v19 = vor.u32 %v4591_v63, %v4588_v8  ;;  %5610 = vmatpush.bf16.msra.mxu2 %v8025_v30  ;;  %v4698_v63 = vor.u32 %v4697_v41, %v4696_v38 }
 0x3aa   : > { %v10801_v36 = vsel %vm742_vm3, %v10712_v54, %v4592_v19  ;;  %v10805_v1 = vsel %vm9413_vm9, %v4592_v19, 0  ;;  %v4699_v18 = vsel %vm2512_vm11, %v10777_v51, %v4698_v63  ;;  %v4734_v19 = vrot.slane %v10718_v53, 2 }
 0x3ab   : > { %5394 = vmatmul.bf16.gmra.mxu0 %v10801_v36  ;;  %v4660_v26 = vrot.slane %v10801_v36, 1  ;;  %v4676_v39 = vrot.slane %v10801_v36, 5  ;;  %v10813_v10 = vshll.u32 %v10801_v36, 16  ;;  %v4662_v54 = vrot.slane %v10805_v1, 1  ;;  %5577 = vmatpush.bf16.msrb.mxu3 %v8016_v57 }
 0x3ac   : > { %v4678_v60 = vrot.slane %v10805_v1, 5  ;;  %v10824_v12 = vshrl.u32 %v10801_v36, 16  ;;  %v10827_v13 = vshll.u32 %v10805_v1, 16  ;;  %5611 = vmatpush.bf16.msra.mxu2 %v8024_v2  ;;  %v4754_v57 = vrot.slane %v10727_v33, 3 }
 0x3ad   : > { %v4661_v3 = vsel %vm590_vm0, %v4658_v55, %v4660_v26  ;;  %v4677_v25 = vsel %vm2479_vm10, %v4674_v31, %v4676_v39  ;;  %v4636_v23 = vrot.slane %v10813_v10, 1  ;;  %v4663_v59 = vsel %vm590_vm0, %v4660_v26, %v4662_v54  ;;  %v8037_v31 = vld [vmem:[%s11321_s5 + $0x228] sm:$0xff] }
 0x3ae   : > { %5457 = vmatmul.bf16.gmra.mxu3 %v4661_v3  ;;  %5491 = vmatmul.bf16.gmra.mxu2 %v4677_v25  ;;  %v4679_v45 = vsel %vm2479_vm10, %v4676_v39, %v4678_v60  ;;  %v4644_v43 = vrot.slane %v10827_v13, 1  ;;  %v4746_v55 = vrot.slane %v10639_v37, 2  ;;  %v4716_v37 = vrot.slane %v10598_v29, 6 }
 0x3af   : > { %v4637_v15 = vsel %vm535_vm1, %v4632_v34, %v4636_v23  ;;  %v4640_v52 = vor.u32 %v10824_v12, %v4636_v23  ;;  %5640 = vmatpush.bf16.msra.mxu0 %v8037_v31  ;;  %v4718_v34 = vrot.slane %v10636_v11, 6  ;;  %v4771_v26 = vrot.slane %v10598_v29, 3  ;;  %v8035_v29 = vld [vmem:[%s11321_s5 + $0x218] sm:$0xff] }
 0x3b0   : > { %5423 = vmatmul.bf16.gmra.mxu1 %v4637_v15  ;;  %v4748_v30 = vor.u32 %v4747_v6, %v4746_v55  ;;  %v4717_v8 = vsel %vm2573_vm12, %v4715_v44, %v4716_v37  ;;  %v4772_v39 = vrot.slane %v10636_v11, 3  ;;  %v4735_v54 = vsel %vm695_vm2, %v4732_v56, %v4734_v19 }
 0x3b1   : > { %v4645_v28 = vsel %vm535_vm1, %v4640_v52, %v4644_v43  ;;  %v4753_v44 = vrot.slane %v10797_v47, 2  ;;  %v4719_v51 = vsel %vm2573_vm12, %v4716_v37, %v4718_v34  ;;  %v4700_v60 = vrot.slane %v10824_v12, 5 }
 0x3b2   : > { %v4752_v27 = vsel %vm742_vm3, %v4748_v30, %v4751_v17  ;;  %v4701_v47 = vrot.slane %v10813_v10, 6  ;;  %v4736_v4 = vrot.slane %v10801_v36, 2  ;;  %v4720_v3 = vrot.slane %v10718_v53, 6  ;;  %v7723_v30 = vld [vmem:[%s11327_s11 + $0xf0] sm:$0xf] }
 0x3b3   : > { %5641 = vmatpush.bf16.msra.mxu0 %v8036_v50  ;;  %v4755_v2 = vor.u32 %v4754_v57, %v4753_v44  ;;  %v4774_v25 = vrot.slane %v10718_v53, 3  ;;  %v8033_v53 = vld [vmem:[%s11321_s5 + $0x208] sm:$0xff]  ;;  %v4704_v15 = vshrl.u32 %v10805_v1, 16  ;;  %v4738_v52 = vrot.slane %v10805_v1, 2  ;;  %v7707_v44 = vld [vmem:[%s11327_s11 + $0xd0] sm:$0xf] }
 0x3b4   : > { %v4702_v33 = vor.u32 %v4701_v47, %v4700_v60  ;;  %v4721_v43 = vsel %vm2573_vm12, %v4718_v34, %v4720_v3  ;;  %v4722_v6 = vrot.slane %v10801_v36, 6  ;;  %v4724_v20 = vrot.slane %v10805_v1, 6  ;;  %v8032_v34 = vld [vmem:[%s11321_s5 + $0x200] sm:$0xff]  ;;  %v8083_v57 = vld [vmem:[%s11327_s11 + $0xd4] sm:$0xf0] }
 0x3b5   : > { %v4756_v11 = vsel %vm742_vm3, %v4751_v17, %v4755_v2  ;;  %v10896_v56 = vsel %vm786_vm4, %v4772_v39, %v4774_v25  ;;  %v4778_v37 = vrot.slane %v10805_v1, 3  ;;  %v4739_v50 = vsel %vm695_vm2, %v4736_v4, %v4738_v52  ;;  %v7691_v47 = vld [vmem:[%s11327_s11 + $0xb0] sm:$0xf] }
 0x3b6   : > { %v4703_v23 = vsel %vm2512_vm11, %v4698_v63, %v4702_v33  ;;  %v4761_v38 = vrot.slane %v4704_v15, 2  ;;  %v4723_v41 = vsel %vm2573_vm12, %v4720_v3, %v4722_v6  ;;  %v10922_v63 = vsel %vm2573_vm12, %v4722_v6, %v4724_v20  ;;  %v7683_v3 = vld [vmem:[%s11327_s11 + $0xa0] sm:$0xf] }
 0x3b7   : > { %5642 = vmatpush.bf16.msra.mxu0 %v8035_v29  ;;  %v7699_v29 = vld [vmem:[%s11327_s11 + $0xc0] sm:$0xf]  ;;  %v2158_v20 = vrot.slane %v10217_v61, 4  ;;  %vm6202_vm10 = vcmask 1042434  }
 0x3bb   : > { %5510 = vmatmul.bf16.vlgmr.msrb.gmra.mxu0 %v10707_v32  ;;  %v10875_v32 = vsel %vm786_vm4, %v4771_v26, %v4772_v39  ;;  %v7715_v26 = vld [vmem:[%s11327_s11 + $0xe0] sm:$0xf]  ;;  %v8085_v39 = vld [vmem:[%s11327_s11 + $0xe4] sm:$0xf0] }
 0x3bc   : > { %5643 = vmatpush.bf16.msra.mxu0 %v8034_v0 }
 0x3be   : > { %5462 = vmatmul.bf16.gmra.mxu3 %v4663_v59  ;;  %5496 = vmatmul.bf16.gmra.mxu2 %v4679_v45  ;;  %v4737_v59 = vsel %vm695_vm2, %v4734_v19, %v4736_v4  ;;  %v4758_v45 = vrot.slane %v10813_v10, 3  ;;  %v4706_v10 = vrot.slane %v4704_v15, 5  ;;  %v8073_v15 = vld [vmem:[%s11327_s11 + $0x84] sm:$0xf0] }
 0x3c0   : > { %5428 = vmatmul.bf16.gmra.mxu1 %v4645_v28  ;;  %5644 = vmatpush.bf16.msra.mxu0 %v8033_v53  ;;  %v4762_v28 = vrot.slane %v10827_v13, 3 }
 0x3c4   : > { %5645 = vmatpush.bf16.msra.mxu0 %v8032_v34 }
 0x3cb   : > { %5515 = vmatmul.bf16.gmra.mxu0 %v10785_v58  ;;  %v4757_v58 = vrot.slane %v10824_v12, 2  ;;  %v4707_v12 = vrot.slane %v10827_v13, 6 }
 0x3cd   : > { %v4759_v55 = vor.u32 %v4758_v45, %v4757_v58  ;;  %v4708_v9 = vor.u32 %v4707_v12, %v4706_v10  ;;  %v8075_v58 = vld [vmem:[%s11327_s11 + $0x94] sm:$0xf0] }
 0x3ce   : > { %5578 = vmatmul.bf16.vlgmr.msrb.gmra.mxu3 %v4733_v7  ;;  %5612 = vmatmul.bf16.vlgmr.msra.gmra.mxu2 %v4752_v27  ;;  %v4776_v7 = vrot.slane %v10801_v36, 3  ;;  %v8087_v36 = vld [vmem:[%s11327_s11 + $0xf4] sm:$0xf0]  ;;  %v10924_v27 = vor.u32 %v4762_v28, %v4761_v38 }
 0x3cf   : > { %v4760_v31 = vsel %vm742_vm3, %v4755_v2, %v4759_v55  ;;  %v4709_v17 = vsel %vm2512_vm11, %v4702_v33, %v4708_v9  ;;  %v8079_v33 = vld [vmem:[%s11327_s11 + $0xb4] sm:$0xf0]  ;;  %vm6200_vm11 = vcmask 1040384  }
 0x3d0   : > { %5544 = vmatmul.bf16.vlgmr.msrb.gmra.mxu1 %v4717_v8  ;;  %v7724_v8 = vor.u32 %v8087_v36, %v7723_v30  ;;  %v10927_v13 = vsel %vm786_vm4, %v4774_v25, %v4776_v7  ;;  %v4764_v19 = vsel %vm742_vm3, %v4759_v55, %v10924_v27  ;;  %v7692_v0 = vor.u32 %v8079_v33, %v7691_v47  ;;  %v8077_v25 = vld [vmem:[%s11327_s11 + $0xa4] sm:$0xf0] }
 0x3d1   : > { %v2159_v30 = vadd.f32 %v2158_v20, %v10217_v61  ;;  %v4740_v61 = vsel %vm695_vm2, %v4738_v52, %v10294_v22 }
 0x3d2   : > { %6091 = vmatpush.bf16.msrb.mxu2 %v7724_v8 }
 0x3d3   : > { %v2160_v34 = vrot.slane %v2159_v30, 2 }
 0x3db   : > { %5520 = vmatmul.bf16.gmra.mxu0 %v4699_v18  ;;  %v10932_v18 = vsel %vm786_vm4, %v4776_v7, %v4778_v37 }
 0x3de   : > { %5583 = vmatmul.bf16.gmra.mxu3 %v4735_v54  ;;  %5617 = vmatmul.bf16.gmra.mxu2 %v4756_v11  ;;  %v7716_v54 = vor.u32 %v8085_v39, %v7715_v26  ;;  %v8081_v11 = vld [vmem:[%s11327_s11 + $0xc4] sm:$0xf0] }
 0x3df   : > { %v7700_v60 = vor.u32 %v8081_v11, %v7699_v29 }
 0x3e0   : > { %5549 = vmatmul.bf16.gmra.mxu1 %v4719_v51  ;;  %6092 = vmatpush.bf16.msrb.mxu2 %v7716_v54  ;;  %v7708_v51 = vor.u32 %v8083_v57, %v7707_v44  ;;  %v2161_v44 = vadd.f32 %v2160_v34, %v2159_v30 }
 0x3e2   : > { %v2162_v11 = vrot.slane %v2161_v44, 1 }
 0x3e4   : > { %6093 = vmatpush.bf16.msrb.mxu2 %v7708_v51 }
 0x3e8   : > { %v5375_v2 = vpop.f32.mrf.mxu0  ;;  %6094 = vmatpush.bf16.msrb.mxu2 %v7700_v60 }
 0x3eb   : > { %5525 = vmatmul.bf16.gmra.mxu0 %v4703_v23  ;;  %v7684_v23 = vor.u32 %v8077_v25, %v7683_v3 }
 0x3ec   : > { %6095 = vmatpush.bf16.msrb.mxu2 %v7692_v0  ;;  %v2163_v0 = vadd.f32 %v2162_v11, %v2161_v44 }
 0x3ee   : > { %5588 = vmatmul.bf16.gmra.mxu3 %v4737_v59  ;;  %5622 = vmatmul.bf16.gmra.mxu2 %v4760_v31  ;;  %v7675_v59 = vld [vmem:[%s11327_s11 + $0x90] sm:$0xf]  ;;  %v7667_v31 = vld [vmem:[%s11327_s11 + $0x80] sm:$0xf] }
 0x3ef   : > { %v7676_v45 = vor.u32 %v8075_v58, %v7675_v59  ;;  %v7668_v10 = vor.u32 %v8073_v15, %v7667_v31 }
 0x3f0   : > { %v5377_v4 = vpop.f32.mrf.mxu0  ;;  %5554 = vmatmul.bf16.gmra.mxu1 %v4721_v43  ;;  %6096 = vmatpush.bf16.msrb.mxu2 %v7684_v23  ;;  %v10978_v43 = vld [vmem:[%s11322_s6] ss:$0 sm:$0xff]  ;;  %v2166_v23 = vmul.f32 0.015625, %v2163_v0 }
 0x3f1   : > { %v5376_v53 = vadd.f32 %v10978_v43, %v5375_v2  ;;  %v5378_v8 = vadd.f32 %v10978_v43, %v5377_v4  ;;  %v4765_v2 = vsel %vm742_vm3, %v10924_v27, %v10384_v16 }
 0x3f4   : > { %6097 = vmatpush.bf16.msrb.mxu2 %v7676_v45 }
 0x3f8   : > { %v5380_v55 = vpop.f32.mrf.mxu0  ;;  %6098 = vmatpush.bf16.msrb.mxu2 %v7668_v10 }
 0x3fb   : > { %5530 = vmatmul.bf16.gmra.mxu0 %v4709_v17 }
 0x3fd   : > { %v5409_v12 = vpop.f32.mrf.mxu1 }
 0x3fe   : > { %v5410_v6 = vadd.f32 %v5409_v12, %v5376_v53  ;;  %5593 = vmatmul.bf16.gmra.mxu3 %v4739_v50  ;;  %5627 = vmatmul.bf16.gmra.mxu2 %v4764_v19 }
 0x400   : > { %v5382_v7 = vpop.f32.mrf.mxu0  ;;  %5559 = vmatmul.bf16.gmra.mxu1 %v4723_v41  ;;  %v5381_v41 = vadd.f32 %v10978_v43, %v5380_v55 }
 0x401   : > { %v5443_v9 = vpop.f32.mrf.mxu3  ;;  %v5477_v38 = vpop.f32.mrf.mxu2  ;;  %v5383_v4 = vadd.f32 %v10978_v43, %v5382_v7 }
 0x402   : > { %v5444_v28 = vadd.f32 %v5443_v9, %v5410_v6 }
 0x404   : > { %v10989_v36 = vadd.f32 %v5477_v38, %v5444_v28 }
 0x405   : > { %v5411_v17 = vpop.f32.mrf.mxu1 }
 0x406   : > { %v5412_v26 = vadd.f32 %v5411_v17, %v5378_v8 }
 0x408   : > { %v5385_v39 = vpop.f32.mrf.mxu0 }
 0x409   : > { %v5445_v50 = vpop.f32.mrf.mxu3  ;;  %v5479_v19 = vpop.f32.mrf.mxu2  ;;  %v5386_v58 = vadd.f32 %v10978_v43, %v5385_v39 }
 0x40a   : > { %v5446_v54 = vadd.f32 %v5445_v50, %v5412_v26 }
 0x40b   : > { %5646 = vmatmul.bf16.vlgmr.msra.gmra.mxu0 %v10875_v32 }
 0x40c   : > { %v10994_v57 = vadd.f32 %v5479_v19, %v5446_v54 }
 0x40d   : > { %v5414_v51 = vpop.f32.mrf.mxu1 }
 0x40e   : > { %v5415_v29 = vadd.f32 %v5414_v51, %v5381_v41  ;;  %5598 = vmatmul.bf16.gmra.mxu3 %v4740_v61  ;;  %5632 = vmatmul.bf16.gmra.mxu2 %v4765_v2 }
 0x410   : > { %v5387_v32 = vpop.f32.mrf.mxu0  ;;  %5564 = vmatmul.bf16.gmra.mxu1 %v10922_v63  ;;  %v11007_v63 = vpack.c.bf16 %v2166_v23, %v2166_v23 }
 0x411   : > { %v5448_v60 = vpop.f32.mrf.mxu3  ;;  %v5482_v47 = vpop.f32.mrf.mxu2  ;;  %v5388_v6 = vadd.f32 %v10978_v43, %v5387_v32 }
 0x412   : > { %v5449_v33 = vadd.f32 %v5448_v60, %v5415_v29 }
 0x414   : > { %v5483_v3 = vadd.f32 %v5482_v47, %v5449_v33 }
 0x415   : > { %v5416_v25 = vpop.f32.mrf.mxu1 }
 0x416   : > { %v5417_v22 = vadd.f32 %v5416_v25, %v5383_v4 }
 0x418   : > { %v5390_v52 = vpop.f32.mrf.mxu0 }
 0x419   : > { %v5450_v59 = vpop.f32.mrf.mxu3  ;;  %v5484_v16 = vpop.f32.mrf.mxu2  ;;  %v5391_v17 = vadd.f32 %v10978_v43, %v5390_v52 }
 0x41a   : > { %v5451_v27 = vadd.f32 %v5450_v59, %v5417_v22 }
 0x41b   : > { %5651 = vmatmul.bf16.gmra.mxu0 %v10896_v56 }
 0x41c   : > { %v5485_v45 = vadd.f32 %v5484_v16, %v5451_v27 }
 0x41d   : > { %v5419_v55 = vpop.f32.mrf.mxu1 }
 0x41e   : > { %v5420_v53 = vadd.f32 %v5419_v55, %v5386_v58  ;;  %6099 = vmatmul.bf16.vlgmr.msrb.gmra.mxu2 %v11007_v63 }
 0x420   : > { %v5392_v31 = vpop.f32.mrf.mxu0 }
 0x421   : > { %v5453_v15 = vpop.f32.mrf.mxu3  ;;  %v5487_v12 = vpop.f32.mrf.mxu2  ;;  %v5393_v44 = vadd.f32 %v10978_v43, %v5392_v31 }
 0x422   : > { %v5454_v10 = vadd.f32 %v5453_v15, %v5420_v53  ;;  %v4780_v15 = vsel %vm786_vm4, %v4778_v37, %v10378_v5 }
 0x424   : > { %v5488_v20 = vadd.f32 %v5487_v12, %v5454_v10 }
 0x425   : > { %v5421_v7 = vpop.f32.mrf.mxu1 }
 0x426   : > { %v5422_v9 = vadd.f32 %v5421_v7, %v5388_v6 }
 0x428   : > { %v5395_v38 = vpop.f32.mrf.mxu0 }
 0x429   : > { %v5455_v56 = vpop.f32.mrf.mxu3  ;;  %v5489_v28 = vpop.f32.mrf.mxu2  ;;  %v5396_v60 = vadd.f32 %v10978_v43, %v5395_v38 }
 0x42a   : > { %v5456_v30 = vadd.f32 %v5455_v56, %v5422_v9 }
 0x42b   : > { %5656 = vmatmul.bf16.gmra.mxu0 %v10927_v13 }
 0x42c   : > { %v5490_v8 = vadd.f32 %v5489_v28, %v5456_v30 }
 0x42d   : > { %v5424_v34 = vpop.f32.mrf.mxu1 }
 0x42e   : > { %v5425_v26 = vadd.f32 %v5424_v34, %v5391_v17 }
 0x430   : > { %v5397_v39 = vpop.f32.mrf.mxu0 }
 0x431   : > { %v5458_v50 = vpop.f32.mrf.mxu3  ;;  %v5492_v19 = vpop.f32.mrf.mxu2  ;;  %v5398_v59 = vadd.f32 %v10978_v43, %v5397_v39 }
 0x432   : > { %v5459_v54 = vadd.f32 %v5458_v50, %v5425_v26 }
 0x434   : > { %v5493_v41 = vadd.f32 %v5492_v19, %v5459_v54 }
 0x435   : > { %v5426_v51 = vpop.f32.mrf.mxu1 }
 0x436   : > { %v5427_v61 = vadd.f32 %v5426_v51, %v5393_v44 }
 0x438   : > { %v5511_v2 = vpop.f32.mrf.mxu0 }
 0x439   : > { %v5512_v29 = vadd.f32 %v5511_v2, %v10989_v36  ;;  %v5460_v11 = vpop.f32.mrf.mxu3  ;;  %v5494_v32 = vpop.f32.mrf.mxu2 }
 0x43a   : > { %v5461_v13 = vadd.f32 %v5460_v11, %v5427_v61 }
 0x43b   : > { %5661 = vmatmul.bf16.gmra.mxu0 %v10932_v18 }
 0x43c   : > { %v5495_v47 = vadd.f32 %v5494_v32, %v5461_v13 }
 0x43d   : > { %v5429_v33 = vpop.f32.mrf.mxu1 }
 0x43e   : > { %v5430_v0 = vadd.f32 %v5429_v33, %v5396_v60 }
 0x440   : > { %v5513_v4 = vpop.f32.mrf.mxu0 }
 0x441   : > { %v5514_v25 = vadd.f32 %v5513_v4, %v10994_v57  ;;  %v5463_v22 = vpop.f32.mrf.mxu3  ;;  %v5497_v52 = vpop.f32.mrf.mxu2 }
 0x442   : > { %v5464_v23 = vadd.f32 %v5463_v22, %v5430_v0 }
 0x444   : > { %v5498_v16 = vadd.f32 %v5497_v52, %v5464_v23 }
 0x445   : > { %v5431_v36 = vpop.f32.mrf.mxu1 }
 0x446   : > { %v5432_v27 = vadd.f32 %v5431_v36, %v5398_v59 }
 0x448   : > { %v5516_v58 = vpop.f32.mrf.mxu0 }
 0x449   : > { %v5517_v55 = vadd.f32 %v5516_v58, %v5483_v3  ;;  %v5465_v53 = vpop.f32.mrf.mxu3  ;;  %v5499_v18 = vpop.f32.mrf.mxu2 }
 0x44a   : > { %v5466_v31 = vadd.f32 %v5465_v53, %v5432_v27 }
 0x44b   : > { %5666 = vmatmul.bf16.gmra.mxu0 %v4780_v15 }
 0x44c   : > { %v5500_v57 = vadd.f32 %v5499_v18, %v5466_v31 }
 0x44d   : > { %v5545_v12 = vpop.f32.mrf.mxu1 }
 0x44e   : > { %v5546_v10 = vadd.f32 %v5545_v12, %v5512_v29 }
 0x450   : > { %v5518_v6 = vpop.f32.mrf.mxu0 }
 0x451   : > { %v5519_v7 = vadd.f32 %v5518_v6, %v5485_v45  ;;  %v5579_v43 = vpop.f32.mrf.mxu3  ;;  %v5613_v9 = vpop.f32.mrf.mxu2 }
 0x452   : > { %v5580_v38 = vadd.f32 %v5579_v43, %v5546_v10  ;;  %v8047_v10 = vld [vmem:[%s11323_s7 + $0x34] sm:$0xf0] }
 0x454   : > { %v5614_v56 = vadd.f32 %v5613_v9, %v5580_v38 }
 0x455   : > { %v5547_v28 = vpop.f32.mrf.mxu1 }
 0x456   : > { %v5548_v3 = vadd.f32 %v5547_v28, %v5514_v25 }
 0x458   : > { %v5521_v30 = vpop.f32.mrf.mxu0 }
 0x459   : > { %v5522_v17 = vadd.f32 %v5521_v30, %v5488_v20  ;;  %v5581_v34 = vpop.f32.mrf.mxu3  ;;  %v5615_v26 = vpop.f32.mrf.mxu2 }
 0x45a   : > { %v5582_v39 = vadd.f32 %v5581_v34, %v5548_v3 }
 0x45c   : > { %v5616_v1 = vadd.f32 %v5615_v26, %v5582_v39 }
 0x45d   : > { %v5550_v50 = vpop.f32.mrf.mxu1 }
 0x45e   : > { %v5551_v5 = vadd.f32 %v5550_v50, %v5517_v55 }
 0x460   : > { %v5523_v37 = vpop.f32.mrf.mxu0 }
 0x461   : > { %v5524_v19 = vadd.f32 %v5523_v37, %v5490_v8  ;;  %v5584_v54 = vpop.f32.mrf.mxu3  ;;  %v5618_v44 = vpop.f32.mrf.mxu2 }
 0x462   : > { %v5585_v51 = vadd.f32 %v5584_v54, %v5551_v5 }
 0x464   : > { %v5619_v45 = vadd.f32 %v5618_v44, %v5585_v51 }
 0x465   : > { %v5552_v61 = vpop.f32.mrf.mxu1 }
 0x466   : > { %v5553_v2 = vadd.f32 %v5552_v61, %v5519_v7 }
 0x468   : > { %v5526_v29 = vpop.f32.mrf.mxu0 }
 0x469   : > { %v5527_v11 = vadd.f32 %v5526_v29, %v5493_v41  ;;  %v5586_v32 = vpop.f32.mrf.mxu3  ;;  %v5620_v13 = vpop.f32.mrf.mxu2 }
 0x46a   : > { %v5587_v60 = vadd.f32 %v5586_v32, %v5553_v2 }
 0x46c   : > { %v5621_v20 = vadd.f32 %v5620_v13, %v5587_v60 }
 0x46d   : > { %v5555_v33 = vpop.f32.mrf.mxu1 }
 0x46e   : > { %v5556_v0 = vadd.f32 %v5555_v33, %v5522_v17 }
 0x470   : > { %v5528_v4 = vpop.f32.mrf.mxu0 }
 0x471   : > { %v5529_v25 = vadd.f32 %v5528_v4, %v5495_v47  ;;  %v5589_v22 = vpop.f32.mrf.mxu3  ;;  %v5623_v52 = vpop.f32.mrf.mxu2  ;;  %v7561_v47 = vld [vmem:[%s11323_s7 + $0x30] sm:$0xf] }
 0x472   : > { %v5590_v23 = vadd.f32 %v5589_v22, %v5556_v0  ;;  %v7562_v43 = vor.u32 %v8047_v10, %v7561_v47 }
 0x474   : > { %v5624_v8 = vadd.f32 %v5623_v52, %v5590_v23  ;;  %5780 = vmatpush.bf16.msra.mxu1 %v7562_v43 }
 0x475   : > { %v5557_v59 = vpop.f32.mrf.mxu1 }
 0x476   : > { %v5558_v36 = vadd.f32 %v5557_v59, %v5524_v19  ;;  %v8045_v19 = vld [vmem:[%s11323_s7 + $0x24] sm:$0xf0] }
 0x478   : > { %v5531_v27 = vpop.f32.mrf.mxu0 }
 0x479   : > { %v11023_v58 = vadd.f32 %v5531_v27, %v5498_v16  ;;  %v5591_v55 = vpop.f32.mrf.mxu3  ;;  %v5625_v53 = vpop.f32.mrf.mxu2 }
 0x47a   : > { %v5592_v41 = vadd.f32 %v5591_v55, %v5558_v36 }
 0x47c   : > { %v11025_v18 = vadd.f32 %v5625_v53, %v5592_v41 }
 0x47d   : > { %v5560_v31 = vpop.f32.mrf.mxu1 }
 0x47e   : > { %v5561_v15 = vadd.f32 %v5560_v31, %v5527_v11  ;;  %v8044_v31 = vld [vmem:[%s11323_s7 + $0x24] sm:$0xf] }
 0x480   : > { %v5533_v12 = vpop.f32.mrf.mxu0 }
 0x481   : > { %v11033_v6 = vadd.f32 %v5533_v12, %v5500_v57  ;;  %v5594_v16 = vpop.f32.mrf.mxu3  ;;  %v5628_v7 = vpop.f32.mrf.mxu2  ;;  %v7553_v57 = vld [vmem:[%s11323_s7 + $0x20] sm:$0xf] }
 0x482   : > { %v5595_v9 = vadd.f32 %v5594_v16, %v5561_v15  ;;  %v7554_v51 = vor.u32 %v8045_v19, %v7553_v57  ;;  %v7555_v15 = vld [vmem:[%s11323_s7 + $0x28] sm:$0xf0] }
 0x483   : > { %v7558_v10 = vor.u32 %v8044_v31, %v7555_v15  ;;  %v8065_v15 = vld [vmem:[%s11327_s11 + $0x44] sm:$0xf0] }
 0x484   : > { %v11035_v38 = vadd.f32 %v5628_v7, %v5595_v9  ;;  %5781 = vmatpush.bf16.msra.mxu1 %v7554_v51  ;;  %v8042_v9 = vld [vmem:[%s11323_s7 + $0x14] sm:$0xf] }
 0x485   : > { %v5562_v28 = vpop.f32.mrf.mxu1 }
 0x486   : > { %v5563_v3 = vadd.f32 %v5562_v28, %v5529_v25  ;;  %v7547_v28 = vld [vmem:[%s11323_s7 + $0x18] sm:$0xf0] }
 0x488   : > { %v5647_v30 = vpop.f32.mrf.mxu0 }
 0x489   : > { %v5596_v17 = vpop.f32.mrf.mxu3  ;;  %v5630_v34 = vpop.f32.mrf.mxu2  ;;  %v5648_v39 = vadd.f32 %v5647_v30, %v5614_v56 }
 0x48a   : > { %v5597_v26 = vadd.f32 %v5596_v17, %v5563_v3  ;;  %v7537_v3 = vld [vmem:[%s11323_s7] sm:$0xf]  ;;  %v8041_v17 = vld [vmem:[%s11323_s7 + $0x4] sm:$0xf0] }
 0x48b   : > { %v5672_v5 = vmax.f32 %v5648_v39, 0.0  ;;  %v7538_v39 = vor.u32 %v8041_v17, %v7537_v3  ;;  %v8061_v17 = vld [vmem:[%s11327_s11 + $0x24] sm:$0xf0] }
 0x48c   : > { %v11037_v50 = vadd.f32 %v5630_v34, %v5597_v26  ;;  %v8040_v34 = vld [vmem:[%s11323_s7 + $0x4] sm:$0xf]  ;;  %v7539_v26 = vld [vmem:[%s11323_s7 + $0x8] sm:$0xf0] }
 0x48d   : > { %v5682_v61 = vmul.f32 %v5672_v5, %v11536_v21  ;;  %v8055_v5 = vld [vmem:[%s11325_s9 + $0x38] sm:$0xff]  ;;  %v7542_v19 = vor.u32 %v8040_v34, %v7539_v26  ;;  %v8050_v26 = vld [vmem:[%s11325_s9 + $0x10] sm:$0xff] }
 0x48f   : > { %v5692_v29 = vsel %vm809_vm7, %v5682_v61, 0.0 }
 0x490   : > { %v5649_v37 = vpop.f32.mrf.mxu0 }
 0x491   : > { %v5650_v54 = vadd.f32 %v5649_v37, %v5616_v1  ;;  %v11045_v44 = vpop.f32.mrf.mxu2  ;;  %v8071_v37 = vld [vmem:[%s11327_s11 + $0x74] sm:$0xf0] }
 0x493   : > { %v5673_v2 = vmax.f32 %v5650_v54, 0.0 }
 0x495   : > { %v5683_v56 = vmul.f32 %v5673_v2, %v11537_v40 }
 0x497   : > { %v5693_v11 = vsel %vm809_vm7, %v5683_v56, 0.0 }
 0x498   : > { %v5694_v32 = vadd.f32 %v5693_v11, %v5692_v29  ;;  %v5652_v13 = vpop.f32.mrf.mxu0 }
 0x499   : > { %v5653_v60 = vadd.f32 %v5652_v13, %v5619_v45  ;;  %v11051_v33 = vpop.f32.mrf.mxu2  ;;  %v8046_v45 = vld [vmem:[%s11323_s7 + $0x34] sm:$0xf] }
 0x49b   : > { %v5674_v0 = vmax.f32 %v5653_v60, 0.0  ;;  %v5599_v60 = vpop.f32.mrf.mxu3 }
 0x49d   : > { %v5684_v1 = vmul.f32 %v5674_v0, %v11538_v46  ;;  %v7563_v46 = vld [vmem:[%s11323_s7 + $0x38] sm:$0xf0] }
 0x49e   : > { %v7566_v41 = vor.u32 %v8046_v45, %v7563_v46  ;;  %v8054_v45 = vld [vmem:[%s11325_s9 + $0x30] sm:$0xff] }
 0x49f   : > { %v5695_v4 = vsel %vm809_vm7, %v5684_v1, 0.0 }
 0x4a0   : > { %v5696_v25 = vadd.f32 %v5695_v4, %v5694_v32  ;;  %v5654_v21 = vpop.f32.mrf.mxu0  ;;  %5793 = vmatpush.bf16.msra.mxu3 %v7566_v41  ;;  %v5565_v32 = vpop.f32.mrf.mxu1 }
 0x4a1   : > { %v5655_v22 = vadd.f32 %v5654_v21, %v5621_v20  ;;  %v11055_v52 = vpop.f32.mrf.mxu2  ;;  %v7545_v20 = vld [vmem:[%s11323_s7 + $0x10] sm:$0xf] }
 0x4a3   : > { %v5675_v40 = vmax.f32 %v5655_v22, 0.0 }
 0x4a4   : > { %5794 = vmatpush.bf16.msra.mxu3 %v7558_v10 }
 0x4a5   : > { %v5685_v23 = vmul.f32 %v5675_v40, %v11540_v24  ;;  %v8043_v24 = vld [vmem:[%s11323_s7 + $0x14] sm:$0xf0] }
 0x4a6   : > { %v7546_v12 = vor.u32 %v8043_v24, %v7545_v20  ;;  %v7643_v20 = vld [vmem:[%s11327_s11 + $0x50] sm:$0xf] }
 0x4a7   : > { %v5697_v59 = vsel %vm809_vm7, %v5685_v23, 0.0 }
 0x4a8   : > { %v5698_v36 = vadd.f32 %v5697_v59, %v5696_v25  ;;  %v5657_v27 = vpop.f32.mrf.mxu0  ;;  %5782 = vmatpush.bf16.msra.mxu1 %v7546_v12  ;;  %v5567_v23 = vpop.f32.mrf.mxu1 }
 0x4a9   : > { %v5658_v55 = vadd.f32 %v5657_v27, %v5624_v8  ;;  %v6102_v53 = vpop.f32.mrf.mxu2 }
 0x4aa   : > { %v8053_v53 = vld [vmem:[%s11325_s9 + $0x28] sm:$0xff] }
 0x4ab   : > { %v5676_v47 = vmax.f32 %v5658_v55, 0.0  ;;  %v8067_v55 = vld [vmem:[%s11327_s11 + $0x54] sm:$0xf0] }
 0x4ac   : > { %5783 = vmatpush.bf16.msra.mxu1 %v7538_v39  ;;  %v7644_v31 = vor.u32 %v8067_v55, %v7643_v20  ;;  %v8084_v20 = vld [vmem:[%s11327_s11 + $0xe4] sm:$0xf]  ;;  %v7717_v55 = vld [vmem:[%s11327_s11 + $0xe8] sm:$0xf0] }
 0x4ad   : > { %v5686_v8 = vmul.f32 %v5676_v47, %v9463_v62  ;;  %v7550_v62 = vor.u32 %v8042_v9, %v7547_v28  ;;  %v8052_v47 = vld [vmem:[%s11325_s9 + $0x20] sm:$0xff]  ;;  %v7627_v9 = vld [vmem:[%s11327_s11 + $0x30] sm:$0xf] }
 0x4af   : > { %v5699_v16 = vsel %vm809_vm7, %v5686_v8, 0.0  ;;  %5795 = vmatpush.bf16.msra.mxu3 %v7550_v62  ;;  %v7619_v62 = vld [vmem:[%s11327_s11 + $0x20] sm:$0xf] }
 0x4b0   : > { %v5700_v7 = vadd.f32 %v5699_v16, %v5698_v36  ;;  %v5659_v43 = vpop.f32.mrf.mxu0  ;;  %5867 = vmatpush.bf16.msrb.mxu1 %v8055_v5  ;;  %v5601_v36 = vpop.f32.mrf.mxu3  ;;  %v7620_v5 = vor.u32 %v8061_v17, %v7619_v62  ;;  %v8062_v17 = vld [vmem:[%s11327_s11 + $0x34] sm:$0xf] }
 0x4b1   : > { %v5660_v30 = vadd.f32 %v5659_v43, %v11025_v18  ;;  %v7659_v18 = vld [vmem:[%s11327_s11 + $0x70] sm:$0xf] }
 0x4b2   : > { %v7660_v54 = vor.u32 %v8071_v37, %v7659_v18  ;;  %v7611_v37 = vld [vmem:[%s11327_s11 + $0x10] sm:$0xf] }
 0x4b3   : > { %v5677_v57 = vmax.f32 %v5660_v30, 0.0  ;;  %5796 = vmatpush.bf16.msra.mxu3 %v7542_v19  ;;  %v11541_v19 = vld [vmem:[#allocation21_spill] sm:$0xff] }
 0x4b4   : > { %5868 = vmatpush.bf16.msrb.mxu1 %v8054_v45 }
 0x4b5   : > { %v5687_v51 = vmul.f32 %v5677_v57, %v9483_v48  ;;  %v5566_v48 = vadd.f32 %v5565_v32, %v11023_v58  ;;  %v7651_v58 = vld [vmem:[%s11327_s11 + $0x60] sm:$0xf]  ;;  %v8059_v57 = vld [vmem:[%s11327_s11 + $0x14] sm:$0xf0]  ;;  %v8057_v32 = vld [vmem:[%s11327_s11 + $0x4] sm:$0xf0] }
 0x4b7   : > { %v5701_v61 = vsel %vm809_vm7, %v5687_v51, 0.0  ;;  %6078 = vmatpush.bf16.msrb.mxu3 %v7660_v54  ;;  %v5600_v21 = vadd.f32 %v5599_v60, %v5566_v48  ;;  %v8049_v51 = vld [vmem:[%s11325_s9 + $0x8] sm:$0xff] }
 0x4b8   : > { %v5702_v2 = vadd.f32 %v5701_v61, %v5700_v7  ;;  %v5662_v56 = vpop.f32.mrf.mxu0  ;;  %5869 = vmatpush.bf16.msrb.mxu1 %v8053_v53  ;;  %v11542_v61 = vld [vmem:[#allocation20_spill] sm:$0xff] }
 0x4b9   : > { %v5663_v29 = vadd.f32 %v5662_v56, %v11035_v38  ;;  %v5634_v38 = vadd.f32 %v11045_v44, %v5600_v21  ;;  %v7612_v56 = vor.u32 %v8059_v57, %v7611_v37  ;;  %v8060_v37 = vld [vmem:[%s11327_s11 + $0x24] sm:$0xf] }
 0x4bb   : > { %v5678_v11 = vmax.f32 %v5663_v29, 0.0 }
 0x4bc   : > { %5870 = vmatpush.bf16.msrb.mxu1 %v8052_v47  ;;  %v7709_v47 = vld [vmem:[%s11327_s11 + $0xd8] sm:$0xf0] }
 0x4bd   : > { %v5688_v13 = vmul.f32 %v5678_v11, %v9501_v35  ;;  %v7603_v11 = vld [vmem:[%s11327_s11] sm:$0xf] }
 0x4bf   : > { %v5703_v0 = vsel %vm809_vm7, %v5688_v13, 0.0 }
 0x4c0   : > { %v5704_v1 = vadd.f32 %v5703_v0, %v5702_v2  ;;  %v5664_v4 = vpop.f32.mrf.mxu0  ;;  %v2143_v2 = vrot.slane %v11542_v61, 4  ;;  %v8048_v0 = vld [vmem:[%s11325_s9] sm:$0xff] }
 0x4c1   : > { %v5665_v25 = vadd.f32 %v5664_v4, %v11037_v50  ;;  %v5568_v50 = vadd.f32 %v5567_v23, %v11033_v6  ;;  %v7635_v6 = vld [vmem:[%s11327_s11 + $0x40] sm:$0xf]  ;;  %v7604_v4 = vor.u32 %v8057_v32, %v7603_v11  ;;  %v8074_v11 = vld [vmem:[%s11327_s11 + $0x94] sm:$0xf]  ;;  %v7677_v32 = vld [vmem:[%s11327_s11 + $0x98] sm:$0xf0] }
 0x4c2   : > { %v7636_v16 = vor.u32 %v8065_v15, %v7635_v6  ;;  %v8066_v6 = vld [vmem:[%s11327_s11 + $0x54] sm:$0xf]  ;;  %v7645_v15 = vld [vmem:[%s11327_s11 + $0x58] sm:$0xf0] }
 0x4c3   : > { %v5679_v22 = vmax.f32 %v5665_v25, 0.0  ;;  %v5602_v41 = vadd.f32 %v5601_v36, %v5568_v50  ;;  %v7725_v36 = vld [vmem:[%s11327_s11 + $0xf8] sm:$0xf0]  ;;  %v8068_v50 = vld [vmem:[%s11327_s11 + $0x64] sm:$0xf] }
 0x4c5   : > { %v5689_v40 = vmul.f32 %v5679_v22, %v9524_v42  ;;  %v8069_v42 = vld [vmem:[%s11327_s11 + $0x64] sm:$0xf0]  ;;  %v5636_v10 = vadd.f32 %v11051_v33, %v5602_v41  ;;  %v8051_v33 = vld [vmem:[%s11325_s9 + $0x18] sm:$0xff] }
 0x4c6   : > { %v7652_v46 = vor.u32 %v8069_v42, %v7651_v58  ;;  %5871 = vmatpush.bf16.msrb.mxu1 %v8051_v33 }
 0x4c7   : > { %v5705_v59 = vsel %vm809_vm7, %v5689_v40, 0.0  ;;  %v8070_v40 = vld [vmem:[%s11327_s11 + $0x74] sm:$0xf] }
 0x4c8   : > { %v5706_v35 = vadd.f32 %v5705_v59, %v5704_v1  ;;  %v5667_v27 = vpop.f32.mrf.mxu0  ;;  %6079 = vmatpush.bf16.msrb.mxu3 %v7652_v46  ;;  %v2144_v1 = vadd.f32 %v2143_v2, %v11542_v61  ;;  %v8086_v59 = vld [vmem:[%s11327_s11 + $0xf4] sm:$0xf]  ;;  %v7653_v46 = vld [vmem:[%s11327_s11 + $0x68] sm:$0xf0] }
 0x4c9   : > { %v5668_v44 = vadd.f32 %v5667_v27, %v5634_v38  ;;  %v7661_v38 = vld [vmem:[%s11327_s11 + $0x78] sm:$0xf0]  ;;  %v7728_v42 = vor.u32 %v8086_v59, %v7725_v36  ;;  %v5818_v59 = vld [vmem:[%s11326_s10] sm:$0x1] }
 0x4ca   : > { %5872 = vmatpush.bf16.msrb.mxu1 %v8050_v26  ;;  %v2145_v22 = vrot.slane %v2144_v1, 2  ;;  %v7664_v58 = vor.u32 %v8070_v40, %v7661_v38  ;;  %v8078_v26 = vld [vmem:[%s11327_s11 + $0xb4] sm:$0xf] }
 0x4cb   : > { %v5680_v24 = vmax.f32 %v5668_v44, 0.0 }
 0x4cc   : > { %6080 = vmatpush.bf16.msrb.mxu3 %v7644_v31  ;;  %v2146_v45 = vadd.f32 %v2145_v22, %v2144_v1  ;;  %v7720_v31 = vor.u32 %v8084_v20, %v7717_v55  ;;  %v7605_v1 = vld [vmem:[%s11327_s11 + $0x8] sm:$0xf0] }
 0x4cd   : > { %v5690_v12 = vmul.f32 %v5680_v24, %v11468_v14  ;;  %v8063_v14 = vld [vmem:[%s11327_s11 + $0x34] sm:$0xf0]  ;;  %v7656_v24 = vor.u32 %v8068_v50, %v7653_v46 }
 0x4ce   : > { %v7628_v30 = vor.u32 %v8063_v14, %v7627_v9  ;;  %5873 = vmatpush.bf16.msrb.mxu1 %v8049_v51  ;;  %v2147_v41 = vrot.slane %v2146_v45, 1  ;;  %v7637_v9 = vld [vmem:[%s11327_s11 + $0x48] sm:$0xf0]  ;;  %v8080_v14 = vld [vmem:[%s11327_s11 + $0xc4] sm:$0xf] }
 0x4cf   : > { %v5707_v8 = vsel %vm809_vm7, %v5690_v12, 0.0  ;;  %v8082_v12 = vld [vmem:[%s11327_s11 + $0xd4] sm:$0xf]  ;;  %v7685_v51 = vld [vmem:[%s11327_s11 + $0xa8] sm:$0xf0] }
 0x4d0   : > { %v5708_v7 = vadd.f32 %v5707_v8, %v5706_v35  ;;  %v5669_v43 = vpop.f32.mrf.mxu0  ;;  %6081 = vmatpush.bf16.msrb.mxu3 %v7636_v16  ;;  %v2148_v8 = vadd.f32 %v2147_v41, %v2146_v45  ;;  %v7648_v16 = vor.u32 %v8066_v6, %v7645_v15 }
 0x4d1   : > { %v5670_v28 = vadd.f32 %v5669_v43, %v5636_v10  ;;  %v8064_v43 = vld [vmem:[%s11327_s11 + $0x44] sm:$0xf] }
 0x4d2   : > { %5874 = vmatpush.bf16.msrb.mxu1 %v8048_v0  ;;  %v7640_v33 = vor.u32 %v8064_v43, %v7637_v9  ;;  %v2165_v62 = vmul.f32 0.015625, %v2148_v8  ;;  %v8056_v0 = vld [vmem:[%s11327_s11 + $0x4] sm:$0xf] }
 0x4d3   : > { %v5681_v3 = vmax.f32 %v5670_v28, 0.0  ;;  %v7701_v28 = vld [vmem:[%s11327_s11 + $0xc8] sm:$0xf0] }
 0x4d4   : > { %6082 = vmatpush.bf16.msrb.mxu3 %v7628_v30 }
 0x4d5   : > { %v5691_v34 = vmul.f32 %v5681_v3, %v11472_v49  ;;  %v2128_v49 = vrot.slane %v11541_v19, 4  ;;  %v7704_v3 = vor.u32 %v8080_v14, %v7701_v28 }
 0x4d7   : > { %v5709_v39 = vsel %vm809_vm7, %v5691_v34, 0.0  ;;  %v2129_v13 = vadd.f32 %v2128_v49, %v11541_v19  ;;  %v7629_v34 = vld [vmem:[%s11327_s11 + $0x38] sm:$0xf0]  ;;  %v2168_v19 = vpack.c.bf16 %v2165_v62, %v2165_v62  ;;  %v7621_v49 = vld [vmem:[%s11327_s11 + $0x28] sm:$0xf0] }
 0x4d8   : > { %v5710_v18 = vadd.f32 %v5709_v39, %v5708_v7  ;;  %6083 = vmatpush.bf16.msrb.mxu3 %v7620_v5  ;;  %v7712_v7 = vor.u32 %v8082_v12, %v7709_v47  ;;  %v7693_v39 = vld [vmem:[%s11327_s11 + $0xb8] sm:$0xf0]  ;;  %v7632_v5 = vor.u32 %v8062_v17, %v7629_v34  ;;  %v7624_v61 = vor.u32 %v8060_v37, %v7621_v49 }
 0x4d9   : > { %v2130_v25 = vrot.slane %v2129_v13, 2 }
 0x4da   : > { %v5711_v54 = vrot.slane %v5710_v18, 4 }
 0x4db   : > { %v2131_v35 = vadd.f32 %v2130_v25, %v2129_v13  ;;  %v7608_v25 = vor.u32 %v8056_v0, %v7605_v1 }
 0x4dc   : > { %v5712_v29 = vadd.f32 %v5711_v54, %v5710_v18  ;;  %6084 = vmatpush.bf16.msrb.mxu3 %v7612_v56  ;;  %v7696_v18 = vor.u32 %v8078_v26, %v7693_v39  ;;  %v8076_v54 = vld [vmem:[%s11327_s11 + $0xa4] sm:$0xf]  ;;  %v8058_v56 = vld [vmem:[%s11327_s11 + $0x14] sm:$0xf] }
 0x4dd   : > { %v2132_v53 = vrot.slane %v2131_v35, 1  ;;  %v7688_v2 = vor.u32 %v8076_v54, %v7685_v51 }
 0x4de   : > { %v5713_v60 = vrot.slane %v5712_v29, 2 }
 0x4df   : > { %v2133_v10 = vadd.f32 %v2132_v53, %v2131_v35  ;;  %v5912_v35 = vld [vmem:[%s11328_s12] sm:$0x3] }
 0x4e0   : > { %v5714_v48 = vadd.f32 %v5713_v60, %v5712_v29  ;;  %6085 = vmatpush.bf16.msrb.mxu3 %v7604_v4  ;;  %v7613_v29 = vld [vmem:[%s11327_s11 + $0x18] sm:$0xf0]  ;;  %v7680_v60 = vor.u32 %v8074_v11, %v7677_v32  ;;  %v8072_v4 = vld [vmem:[%s11327_s11 + $0x84] sm:$0xf] }
 0x4e1   : > { %v2164_v30 = vmul.f32 0.015625, %v2133_v10  ;;  %v7616_v13 = vor.u32 %v8058_v56, %v7613_v29 }
 0x4e2   : > { %v5715_v21 = vrot.slane %v5714_v48, 1 }
 0x4e3   : > { %v2167_v57 = vpack.c.bf16 %v2164_v30, %v2164_v30 }
 0x4e4   : > { %v5716_v23 = vadd.f32 %v5715_v21, %v5714_v48  ;;  %v7669_v48 = vld [vmem:[%s11327_s11 + $0x88] sm:$0xf0] }
 0x4e5   : > { %v7672_v21 = vor.u32 %v8072_v4, %v7669_v48 }
 0x4e6   : > { %v5717_v27 = vmul.f32 0.015625, %v5716_v23 }
 0x4e8   : > { %v5718_v44 = vpack.c.bf16 %v5717_v27, %v5717_v27 }
 0x4ea   : > { %7567 = vmatmul.msk.bf16.vlgmr.msra.gmra.mxu1 %vm809_vm7, %v5718_v44  ;;  %7568 = vmatmul.msk.bf16.vlgmr.msra.gmra.mxu3 %vm809_vm7, %v5718_v44 }
 0x4eb   : > { %6104 = vmatpush.bf16.msra.mxu1 %v7664_v58  ;;  %6117 = vmatpush.bf16.msra.mxu3 %v7728_v42  ;;  %v6074_v58 = vperm.slane %v5912_v35, 0 }
 0x4ef   : > { %6105 = vmatpush.bf16.msra.mxu1 %v7656_v24  ;;  %6118 = vmatpush.bf16.msra.mxu3 %v7720_v31  ;;  %v6075_v24 = vperm.slane %v5912_v35, 1  ;;  %v6207_v35 = vlaneseq }
 0x4f3   : > { %6106 = vmatpush.bf16.msra.mxu1 %v7648_v16  ;;  %6119 = vmatpush.bf16.msra.mxu3 %v7712_v7 }
 0x4f7   : > { %6107 = vmatpush.bf16.msra.mxu1 %v7640_v33  ;;  %6120 = vmatpush.bf16.msra.mxu3 %v7704_v3 }
 0x4fa   : > { %5875 = vmatmul.bf16.vlgmr.msrb.gmra.mxu1 %v2167_v57  ;;  %6086 = vmatmul.bf16.vlgmr.msrb.gmra.mxu3 %v2168_v19 }
 0x4fb   : > { %6108 = vmatpush.bf16.msra.mxu1 %v7632_v5  ;;  %6121 = vmatpush.bf16.msra.mxu3 %v7696_v18 }
 0x4ff   : > { %6109 = vmatpush.bf16.msra.mxu1 %v7624_v61  ;;  %6122 = vmatpush.bf16.msra.mxu3 %v7688_v2 }
 0x503   : > { %6110 = vmatpush.bf16.msra.mxu1 %v7616_v13  ;;  %6123 = vmatpush.bf16.msra.mxu3 %v7680_v60 }
 0x507   : > { %6111 = vmatpush.bf16.msra.mxu1 %v7608_v25  ;;  %6124 = vmatpush.bf16.msra.mxu3 %v7672_v21 }
 0x50a   : > { %6112 = vmatmul.bf16.vlgmr.msra.gmra.mxu1 %v2168_v19  ;;  %6125 = vmatmul.bf16.vlgmr.msra.gmra.mxu3 %v11007_v63 }
 0x567   : > { %v11289_v22 = vpop.f32.mrf.mxu1 }
 0x56d   : > { %v11291_v40 = vpop.f32.mrf.mxu3 }
 0x56f   : > { %v5787_v23 = vpop.f32.mrf.mxu1 }
 0x570   : > { %v5727_v23 = vld [vmem:[%s11324_s8] sm:$0x3] }
 0x575   : > { %v5800_v38 = vpop.f32.mrf.mxu3 }
 0x576   : > { %v5770_v38 = vperm.slane %v5727_v23, 1 }
 0x577   : > { %v5876_v36 = vpop.f32.mrf.mxu1 }
 0x578   : > { %v5877_v27 = vadd.f32 %v5876_v36, %v5818_v59  ;;  %v5769_v59 = vperm.slane %v5727_v23, 0  ;;  %v5799_v36 = vadd.f32 %v11291_v40, %v5770_v38 }
 0x57a   : > { %v7729_v45 = vmul.f32 -1.442695, %v5877_v27 }
 0x57c   : > { %8176 = vpow2.f32 %v7729_v45 }
 0x57d   : > { %v6087_v63 = vpop.f32.mrf.mxu3 }
 0x57e   : > { %v6088_v42 = vadd.f32 %v6087_v63, %v6074_v58  ;;  %v5786_v58 = vadd.f32 %v11289_v22, %v5769_v59 }
 0x57f   : > { %v5878_v50 = vpop.f32.mrf.mxu1 }
 0x580   : > { %v6101_v44 = vadd.f32 %v11055_v52, %v6088_v42 }
 0x582   : > { %v8177_v46 = vpop.eup %8176  ;;  %v7730_v20 = vmul.f32 -1.442695, %v6101_v44 }
 0x583   : > { %v6133_v55 = vadd.f32 1.0, %v8177_v46 }
 0x584   : > { %8178 = vpow2.f32 %v7730_v20 }
 0x585   : > { %8180 = vrcp.f32 %v6133_v55  ;;  %v6089_v53 = vpop.f32.mrf.mxu3  ;;  %v6145_v43 = vand.u32 2147483648, %v6133_v55  ;;  %v6143_v14 = vand.u32 2147483647, %v6133_v55  ;;  %vm6139_vm14 = vweird.f32 %v6133_v55 }
 0x587   : > { %v6113_v41 = vpop.f32.mrf.mxu1  ;;  %v6146_v33 = vor.u32 1.1754944e-38, %v6145_v43  ;;  %vm6144_vm0 = vcmp.eq.f32.partialorder %v6143_v14, 8.507059e+37 }
 0x588   : > { %v6114_v12 = vadd.f32 %v6113_v41, %v6075_v24 }
 0x58a   : > { %v8179_v31 = vpop.eup %8178 }
 0x58b   : > { %v8181_v6 = vpop.eup %8180  ;;  %v6155_v15 = vadd.f32 1.0, %v8179_v31 }
 0x58c   : > { %v6135_v47 = vmul.f32 %v8181_v6, %v6133_v55  ;;  %vm6140_vm13 = vweird.f32 %v8181_v6 }
 0x58d   : > { %v6126_v10 = vpop.f32.mrf.mxu3  ;;  %8182 = vrcp.f32 %v6155_v15  ;;  %vm6141_vm15 = vmor %vm6139_vm14, %vm6140_vm13  ;;  %v6168_v49 = vand.u32 2147483648, %v6155_v15  ;;  %vm6162_vm2 = vweird.f32 %v6155_v15  ;;  %v6166_v51 = vand.u32 2147483647, %v6155_v15 }
 0x58e   : > { %v6127_v8 = vadd.f32 %v6126_v10, %v6114_v12  ;;  %v6136_v16 = vsub.f32 1.0, %v6135_v47  ;;  %vm6209_vm13 = vcmp.lt.s32.totalorder %v6207_v35, 512 }
 0x58f   : > { %v6115_v7 = vpop.f32.mrf.mxu1  ;;  %v6169_v11 = vor.u32 1.1754944e-38, %v6168_v49  ;;  %vm6167_vm8 = vcmp.eq.f32.partialorder %v6166_v51, 8.507059e+37 }
 0x590   : > { %v7731_v52 = vmul.f32 -1.442695, %v6127_v8  ;;  %v6137_v9 = vmul.f32 %v8181_v6, %v6136_v16 }
 0x592   : > { %8184 = vpow2.f32 %v7731_v52  ;;  %v6138_v28 = vadd.f32 %v8181_v6, %v6137_v9 }
 0x593   : > { %v8183_v3 = vpop.eup %8182 }
 0x594   : > { %v6142_v30 = vsel %vm6141_vm15, %v8181_v6, %v6138_v28  ;;  %v6158_v34 = vmul.f32 %v8183_v3, %v6155_v15  ;;  %vm6163_vm1 = vweird.f32 %v8183_v3 }
 0x595   : > { %v6128_v62 = vpop.f32.mrf.mxu3  ;;  %v6147_v17 = vsel %vm6144_vm0, %v6146_v33, %v6142_v30  ;;  %vm6164_vm3 = vmor %vm6162_vm2, %vm6163_vm1 }
 0x596   : > { %6188 = vrot.lane.b32.xlu2 %v6147_v17, %s8236_s22  ;;  %v6159_v5 = vsub.f32 1.0, %v6158_v34 }
 0x598   : > { %v8185_v26 = vpop.eup %8184  ;;  %v6160_v18 = vmul.f32 %v8183_v3, %v6159_v5 }
 0x599   : > { %v6156_v39 = vadd.f32 1.0, %v8185_v26 }
 0x59a   : > { %v6161_v19 = vadd.f32 %v8183_v3, %v6160_v18 }
 0x59b   : > { %8186 = vrcp.f32 %v6156_v39  ;;  %v6183_v61 = vand.u32 2147483648, %v6156_v39  ;;  %v6181_v56 = vand.u32 2147483647, %v6156_v39  ;;  %vm6177_vm5 = vweird.f32 %v6156_v39 }
 0x59c   : > { %v6165_v29 = vsel %vm6164_vm3, %v8183_v3, %v6161_v19 }
 0x59d   : > { %v6184_v13 = vor.u32 1.1754944e-38, %v6183_v61  ;;  %vm6182_vm9 = vcmp.eq.f32.partialorder %v6181_v56, 8.507059e+37  ;;  %v6170_v60 = vsel %vm6167_vm8, %v6169_v11, %v6165_v29 }
 0x59e   : > { %v6198_v48 = vrot.slane %v6170_v60, 6 }
 0x5a1   : > { %v8187_v37 = vpop.eup %8186 }
 0x5a2   : > { %v6173_v57 = vmul.f32 %v8187_v37, %v6156_v39  ;;  %vm6178_vm4 = vweird.f32 %v8187_v37 }
 0x5a3   : > { %vm6179_vm6 = vmor %vm6177_vm5, %vm6178_vm4 }
 0x5a4   : > { %v6174_v54 = vsub.f32 1.0, %v6173_v57 }
 0x5a6   : > { %v6175_v2 = vmul.f32 %v8187_v37, %v6174_v54 }
 0x5a8   : > { %v6176_v32 = vadd.f32 %v8187_v37, %v6175_v2 }
 0x5aa   : > { %v6180_v0 = vsel %vm6179_vm6, %v8187_v37, %v6176_v32 }
 0x5ab   : > { %v6185_v1 = vsel %vm6182_vm9, %v6184_v13, %v6180_v0 }
 0x5ac   : > { %v6192_v4 = vsel %vm809_vm7, %v6185_v1, 0.0 }
 0x5ad   : > { %v6199_v25 = vrot.slane %v6192_v4, 5 }
 0x5af   : > { %v6203_v21 = vsel %vm6202_vm10, %v6198_v48, %v6199_v25 }
 0x5f0   : > { %v6189_v27 = vpop.permute.xlu2 %6188 }
 0x5f1   : > { %v6191_v45 = vsel %vm809_vm7, %v5799_v36, %v6189_v27 }
 0x5f2   : > { %v6197_v63 = vrot.slane %v6191_v45, 7 }
 0x5f4   : > { %v6201_v42 = vsel %vm6200_vm11, %v5786_v58, %v6197_v63 }
 0x5f5   : > { %v6205_v50 = vsel %vm2573_vm12, %v6201_v42, %v6203_v21 }
 0x5f6   : > { %6211 = vst.msk [vmem:[%s482_s23] sm:$0xf] %vm6209_vm13, %v6205_v50 }
 0x5f7 PF: > { %s25_s29 = sadd.s32 1, %s8229_s29  }
 0x5f8   : > { %p22_p7 = scmp.ge.s32.totalorder %s25_s29, 4  }
 0x5fa   :  { %24 = sbr.rel (!%p22_p7) target bundleno = 1 (0x1), region = 111 }
 0x5ff   :  { %6231 = vsyncpa [#allocation3], 1 }
 0x600   :  { %6233 = vsyncpa [#allocation3 + $0x1], 1 }

</bundles_post_ra>
